<compile_context>
chip_gen: v5e
topology: v5e:2x2
jax: 0.10.0
libtpu: 0.0.40
codegen_flags: <defaults>
</compile_context>

<pallas_src>
import functools

import jax
import jax.numpy as jnp
from jax.experimental import pallas as pl
from jax.experimental.pallas import tpu as pltpu


VMEM_LIMIT = 32 * 1024 * 1024  # explicit scoped-VMEM budget (safe on v5e/v6e/v7x)


# ----------------------------------------------------------------------------
# Pallas kernels
# ----------------------------------------------------------------------------
def _conv_kernel(*refs, H, W, Cin, Cout, KH, act, has_add):
    """Stride-1 'same' conv on one batch element, single im2col MXU matmul.

    refs: x, [add], shift, w_flat, bias, out, xpad_scratch, patch_scratch
      x      : (1, H, W, Cin)  f32
      add    : (1, H, W, Cin)  f32   (optional, fused elementwise add)
      shift  : (1, Cin)        f32   (fused per-channel input shift, e.g. -rgb_mean)
      w_flat : (KH*KH*Cin, Cout) bf16 (im2col-flattened weight)
      bias   : (1, Cout)       f32
      out    : (1, H, W, Cout) f32
    """
    it = iter(refs)
    x_ref = next(it)
    add_ref = next(it) if has_add else None
    shift_ref = next(it)
    w_ref = next(it)
    b_ref = next(it)
    o_ref = next(it)
    xpad_ref = next(it)
    patch_ref = next(it)

    pad = (KH - 1) // 2
    xin = x_ref[0] + shift_ref[...]
    if has_add:
        xin = xin + add_ref[0]

    # Fused zero padding: stage the (shifted) input into a zeroed bf16 scratch.
    xpad_ref[...] = jnp.zeros_like(xpad_ref)
    xpad_ref[pad:pad + H, pad:pad + W, :] = xin.astype(jnp.bfloat16)

    # im2col: build one (H*W, KH*KH*Cin) patch, then a single MXU matmul.
    for t in range(KH * KH):
        kh, kw = divmod(t, KH)
        patch_ref[:, t * Cin:(t + 1) * Cin] = (
            xpad_ref[kh:kh + H, kw:kw + W, :].reshape(H * W, Cin))

    acc = jnp.dot(patch_ref[...], w_ref[...],
                  preferred_element_type=jnp.float32) + b_ref[...]
    if act == "lrelu":
        acc = jnp.where(acc >= 0, acc, 0.2 * acc)
    o_ref[0] = acc.reshape(H, W, Cout).astype(o_ref.dtype)


def _resblock_kernel(*refs, H, W, C1, C2, Cm, res_scale, has_res, dual):
    """Fully fused ResBlock on one batch element.

    conv1(3x3)+LeakyReLU -> conv2(3x3) -> channel attention -> *res_scale + skip
    If `dual`, the torch channel-concat of (x, skip_feat) is fused by staging
    both inputs at their channel offsets in the padded scratch.
    If `has_res`, the skip path is a fused 1x1 res_conv, else identity.
    """
    it = iter(refs)
    x1_ref = next(it)
    x2_ref = next(it) if dual else None
    w1_ref = next(it); b1_ref = next(it)
    w2_ref = next(it); b2_ref = next(it)
    cw1_ref = next(it); cb1_ref = next(it)
    cw2_ref = next(it); cb2_ref = next(it)
    rw_ref = next(it) if has_res else None
    rb_ref = next(it) if has_res else None
    o_ref = next(it)
    xpad_ref = next(it); p1_ref = next(it)
    hpad_ref = next(it); p2_ref = next(it)

    Cin = C1 + C2

    # Stage (optionally concatenated) input into a zero-padded bf16 scratch.
    xpad_ref[...] = jnp.zeros_like(xpad_ref)
    xpad_ref[1:1 + H, 1:1 + W, 0:C1] = x1_ref[0].astype(jnp.bfloat16)
    if dual:
        xpad_ref[1:1 + H, 1:1 + W, C1:Cin] = x2_ref[0].astype(jnp.bfloat16)

    # conv1 (3x3) + LeakyReLU(0.2): one im2col matmul, K = 9*Cin.
    for t in range(9):
        kh, kw = divmod(t, 3)
        p1_ref[:, t * Cin:(t + 1) * Cin] = (
            xpad_ref[kh:kh + H, kw:kw + W, :].reshape(H * W, Cin))
    h = jnp.dot(p1_ref[...], w1_ref[...],
                preferred_element_type=jnp.float32) + b1_ref[...]
    h = jnp.where(h >= 0, h, 0.2 * h)

    # conv2 (3x3): h never leaves VMEM.
    hpad_ref[...] = jnp.zeros_like(hpad_ref)
    hpad_ref[1:1 + H, 1:1 + W, :] = h.reshape(H, W, Cm).astype(jnp.bfloat16)
    for t in range(9):
        kh, kw = divmod(t, 3)
        p2_ref[:, t * Cm:(t + 1) * Cm] = (
            hpad_ref[kh:kh + H, kw:kw + W, :].reshape(H * W, Cm))
    h2 = jnp.dot(p2_ref[...], w2_ref[...],
                 preferred_element_type=jnp.float32) + b2_ref[...]

    # Channel attention: spatial mean -> fc -> relu -> fc -> sigmoid -> gate.
    y = jnp.mean(h2, axis=0, keepdims=True)                       # (1, Cm)
    y = jnp.dot(y, cw1_ref[...], preferred_element_type=jnp.float32) + cb1_ref[...]
    y = jnp.maximum(y, 0.0)
    y = jnp.dot(y, cw2_ref[...], preferred_element_type=jnp.float32) + cb2_ref[...]
    gate = jax.nn.sigmoid(y)                                      # (1, Cm)

    # Skip path (identity or fused 1x1 res_conv) + residual scale-add.
    if has_res:
        xflat = xpad_ref[1:1 + H, 1:1 + W, :].reshape(H * W, Cin)
        skip = jnp.dot(xflat, rw_ref[...],
                       preferred_element_type=jnp.float32) + rb_ref[...]
    else:
        skip = x1_ref[0].reshape(H * W, Cm)                       # Cin == Cm
    out = (h2 * gate) * res_scale + skip
    o_ref[0] = out.reshape(H, W, Cm).astype(o_ref.dtype)


# ----------------------------------------------------------------------------
# Memoized pallas_call builders
# ----------------------------------------------------------------------------
@functools.lru_cache(maxsize=None)
def _build_conv(N, H, W, Cin, Cout, KH, act, has_add):
    K = KH * KH * Cin
    pad = (KH - 1) // 2
    kernel = functools.partial(_conv_kernel, H=H, W=W, Cin=Cin, Cout=Cout,
                               KH=KH, act=act, has_add=has_add)
    xspec = pl.BlockSpec((1, H, W, Cin), lambda n: (n, 0, 0, 0))
    in_specs = [xspec] + ([xspec] if has_add else []) + [
        pl.BlockSpec((1, Cin), lambda n: (0, 0)),
        pl.BlockSpec((K, Cout), lambda n: (0, 0)),
        pl.BlockSpec((1, Cout), lambda n: (0, 0)),
    ]
    return pl.pallas_call(
        kernel,
        out_shape=jax.ShapeDtypeStruct((N, H, W, Cout), jnp.float32),
        grid=(N,),
        in_specs=in_specs,
        out_specs=pl.BlockSpec((1, H, W, Cout), lambda n: (n, 0, 0, 0)),
        scratch_shapes=[
            pltpu.VMEM((H + 2 * pad, W + 2 * pad, Cin), jnp.bfloat16),
            pltpu.VMEM((H * W, K), jnp.bfloat16),
        ],
        compiler_params=pltpu.CompilerParams(
            dimension_semantics=("parallel",), vmem_limit_bytes=VMEM_LIMIT),
    )


@functools.lru_cache(maxsize=None)
def _build_resblock(N, H, W, C1, C2, Cm, Cr, res_scale, has_res, dual):
    Cin = C1 + C2
    kernel = functools.partial(_resblock_kernel, H=H, W=W, C1=C1, C2=C2, Cm=Cm,
                               res_scale=res_scale, has_res=has_res, dual=dual)
    in_specs = [pl.BlockSpec((1, H, W, C1), lambda n: (n, 0, 0, 0))]
    if dual:
        in_specs.append(pl.BlockSpec((1, H, W, C2), lambda n: (n, 0, 0, 0)))
    in_specs += [
        pl.BlockSpec((9 * Cin, Cm), lambda n: (0, 0)),
        pl.BlockSpec((1, Cm), lambda n: (0, 0)),
        pl.BlockSpec((9 * Cm, Cm), lambda n: (0, 0)),
        pl.BlockSpec((1, Cm), lambda n: (0, 0)),
        pl.BlockSpec((Cm, Cr), lambda n: (0, 0)),
        pl.BlockSpec((1, Cr), lambda n: (0, 0)),
        pl.BlockSpec((Cr, Cm), lambda n: (0, 0)),
        pl.BlockSpec((1, Cm), lambda n: (0, 0)),
    ]
    if has_res:
        in_specs += [
            pl.BlockSpec((Cin, Cm), lambda n: (0, 0)),
            pl.BlockSpec((1, Cm), lambda n: (0, 0)),
        ]
    return pl.pallas_call(
        kernel,
        out_shape=jax.ShapeDtypeStruct((N, H, W, Cm), jnp.float32),
        grid=(N,),
        in_specs=in_specs,
        out_specs=pl.BlockSpec((1, H, W, Cm), lambda n: (n, 0, 0, 0)),
        scratch_shapes=[
            pltpu.VMEM((H + 2, W + 2, Cin), jnp.bfloat16),
            pltpu.VMEM((H * W, 9 * Cin), jnp.bfloat16),
            pltpu.VMEM((H + 2, W + 2, Cm), jnp.bfloat16),
            pltpu.VMEM((H * W, 9 * Cm), jnp.bfloat16),
        ],
        compiler_params=pltpu.CompilerParams(
            dimension_semantics=("parallel",), vmem_limit_bytes=VMEM_LIMIT),
    )


# ----------------------------------------------------------------------------
# Thin wrappers
# ----------------------------------------------------------------------------
def conv2d(x, p, *, shift=None, add=None, act=None):
    """'same'-padded conv with optional fused input shift / add / LeakyReLU."""
    N, H, W, Cin = x.shape
    K, Cout = p["w"].shape
    KH = p["k"]
    if shift is None:
        shift = jnp.zeros((1, Cin), jnp.float32)
    fn = _build_conv(N, H, W, Cin, Cout, KH, act, add is not None)
    args = [x] + ([add] if add is not None else []) + [shift, p["w"], p["b"]]
    return fn(*args)


def resblock(p, x, skip_feat=None):
    """Fused ResBlock; skip_feat (if given) replaces the HBM channel concat."""
    N, H, W, C1 = x.shape
    dual = skip_feat is not None
    C2 = skip_feat.shape[-1] if dual else 0
    Cm = p["b1"].shape[-1]
    Cr = p["ca_b1"].shape[-1]
    has_res = p["rw"] is not None
    fn = _build_resblock(N, H, W, C1, C2, Cm, Cr, p["res_scale"], has_res, dual)
    args = [x] + ([skip_feat] if dual else []) + [
        p["w1"], p["b1"], p["w2"], p["b2"],
        p["ca_w1"], p["ca_b1"], p["ca_w2"], p["ca_b2"],
    ]
    if has_res:
        args += [p["rw"], p["rb"]]
    return fn(*args)


def upsample_nearest_2x(x):
    # TODO(synk): fuse the nearest-2x upsample into the following up-conv kernel
    # (sub-pixel weight decomposition) to avoid the 4x-sized HBM intermediate.
    return jnp.repeat(jnp.repeat(x, 2, axis=1), 2, axis=2)


# ----------------------------------------------------------------------------
# Parameter construction (deterministic, PyTorch-default-style uniform init)
# ----------------------------------------------------------------------------
class ParamGen:
    def __init__(self, key):
        self.key = key

    def _next(self):
        self.key, sub = jax.random.split(self.key)
        return sub

    def conv(self, cin, cout, k):
        bound = 1.0 / ((cin * k * k) ** 0.5)
        w = jax.random.uniform(self._next(), (k, k, cin, cout),
                               jnp.float32, -bound, bound)
        b = jax.random.uniform(self._next(), (1, cout), jnp.float32, -bound, bound)
        # im2col-flattened bf16 weight: row index = (kh*k + kw)*cin + c
        return {"w": w.reshape(k * k * cin, cout).astype(jnp.bfloat16),
                "b": b, "k": k}

    def dense(self, cin, cout):
        bound = 1.0 / (cin ** 0.5)
        w = jax.random.uniform(self._next(), (cin, cout), jnp.float32, -bound, bound)
        b = jax.random.uniform(self._next(), (1, cout), jnp.float32, -bound, bound)
        return {"w": w, "b": b}


def make_resblock(pg, in_dim, out_dim, *, reduction=16, res_scale=0.1):
    cr = max(out_dim // reduction, 1)
    c1 = pg.conv(in_dim, out_dim, 3)
    c2 = pg.conv(out_dim, out_dim, 3)
    ca1 = pg.dense(out_dim, cr)
    ca2 = pg.dense(cr, out_dim)
    if in_dim != out_dim:
        rc = pg.conv(in_dim, out_dim, 1)
        rw, rb = rc["w"], rc["b"]          # (in_dim, out_dim) bf16, (1, out_dim) f32
    else:
        rw, rb = None, None
    return {"w1": c1["w"], "b1": c1["b"], "w2": c2["w"], "b2": c2["b"],
            "ca_w1": ca1["w"], "ca_b1": ca1["b"],
            "ca_w2": ca2["w"], "ca_b2": ca2["b"],
            "rw": rw, "rb": rb, "res_scale": float(res_scale)}


def build_model(pg, *, in_channel=3, out_channel=3, inner_channel=16,
                n_resblocks=1, res_scale=0.1):
    res_blocks = 4
    channel_mults = [1, 2, 4, 4]
    num_mults = len(channel_mults)
    pre_channel = inner_channel
    feat_channels = [pre_channel]

    params = {"conv_first": pg.conv(in_channel, inner_channel, 3)}

    downs = [("conv", pg.conv(in_channel, inner_channel, 3))]
    for ind in range(num_mults):
        is_last = ind == num_mults - 1
        channel_mult = inner_channel * channel_mults[ind]
        for _ in range(res_blocks):
            downs.append(("res", make_resblock(pg, pre_channel, channel_mult,
                                               res_scale=res_scale)))
            feat_channels.append(channel_mult)
            pre_channel = channel_mult
        if not is_last:
            downs.append(("down", pg.conv(pre_channel, pre_channel, 3)))
            feat_channels.append(pre_channel)
    params["downs"] = downs

    params["mid"] = [make_resblock(pg, pre_channel, pre_channel,
                                   res_scale=res_scale)
                     for _ in range(n_resblocks)]

    ups = []
    for ind in reversed(range(num_mults)):
        is_last = ind < 1
        channel_mult = inner_channel * channel_mults[ind]
        for _ in range(res_blocks + 1):
            ups.append(("res", make_resblock(pg, pre_channel + feat_channels.pop(),
                                             channel_mult, res_scale=res_scale)))
            pre_channel = channel_mult
        if not is_last:
            ups.append(("up", pg.conv(pre_channel, pre_channel, 3)))
    params["ups"] = ups

    params["conv_hr"] = pg.conv(pre_channel, pre_channel, 3)
    params["final_conv"] = pg.conv(pre_channel, out_channel, 3)

    # MeanShift(sign=-1) with rgb_std=1 is "x - rgb_mean"; it is folded as an
    # in-kernel per-channel shift into the two convs that consume it
    # (conv_first and downs[0]) -- exact, incl. zero-padding-after-shift.
    rgb_mean = jnp.array([[0.4488, 0.4371, 0.404]], jnp.float32)
    params["sub_mean_shift"] = -rgb_mean
    # add_mean exists in the torch module but is never used in forward(); omitted.
    return params


# ----------------------------------------------------------------------------
# Full forward pass (mirrors EDSRUNetSkipConnection.forward)
# ----------------------------------------------------------------------------
def forward(params, x):
    shift = params["sub_mean_shift"]                       # folded sub_mean
    h = conv2d(x, params["conv_first"], shift=shift)

    feats = []
    cur = x
    for kind, p in params["downs"]:
        if kind == "conv":
            cur = conv2d(cur, p, shift=shift)
        elif kind == "down":
            # stride-2 conv == stride-1 conv subsampled (k=3, pad=1).
            # TODO(synk): move the subsample into the kernel via strided pl.ds
            # patch loads to skip 3/4 of the MXU work and the full-res writeback.
            cur = conv2d(cur, p)[:, ::2, ::2, :]
        else:  # "res"
            cur = resblock(p, cur)
        feats.append(cur)

    for p in params["mid"]:
        cur = resblock(p, cur)

    for kind, p in params["ups"]:
        if kind == "res":
            cur = resblock(p, cur, skip_feat=feats.pop())   # concat fused in-kernel
        else:  # "up"
            cur = conv2d(upsample_nearest_2x(cur), p)

    out = conv2d(cur, params["conv_hr"], add=h, act="lrelu")  # (h + x) fused
    out = conv2d(out, params["final_conv"])
    return out


# ----------------------------------------------------------------------------
if __name__ == "__main__":
    key = jax.random.PRNGKey(0)
    k_in, k_par = jax.random.split(key)

    # Small config: batch=2, 3->3 channels, 16x16 spatial, inner_channel=16,
    # 1 mid resblock.  (NHWC; the torch-equivalent input is (2, 3, 16, 16).)
    x = jax.random.normal(k_in, (2, 16, 16, 3), jnp.float32)

    pg = ParamGen(k_par)
    params = build_model(pg, in_channel=3, out_channel=3, inner_channel=16,
                         n_resblocks=1, res_scale=0.1)

    out = forward(params, x)
    out = jax.block_until_ready(out)

    assert out.shape == (2, 16, 16, 3), out.shape
    assert bool(jnp.all(jnp.isfinite(out)))
    print("KERNEL_OK")
</pallas_src>

<mosaic_0001>
module attributes {stable_mosaic.version = 11 : i64} {
  func.func @_conv_kernel(%arg0: i32, %arg1: memref<1x16x16x3xf32, #tpu.memory_space<vmem>>, %arg2: memref<1x3xf32, #tpu.memory_space<vmem>>, %arg3: memref<27x16xbf16, #tpu.memory_space<vmem>>, %arg4: memref<1x16xf32, #tpu.memory_space<vmem>>, %arg5: memref<1x16x16x16xf32, #tpu.memory_space<vmem>>, %arg6: memref<18x18x3xbf16, #tpu.memory_space<vmem>>, %arg7: memref<256x27xbf16, #tpu.memory_space<vmem>>) attributes {dimension_semantics = [#tpu.dimension_semantics<parallel>], iteration_bounds = array<i64: 2>, scalar_prefetch = 0 : i64, scratch_operands = 2 : i64, tpu.core_type = #tpu.core_type<tc>, window_params = [{transform_indices = @transform_0, window_bounds = array<i64: 1, 16, 16, 3>}, {pipeline_mode = #tpu.pipeline_mode<synchronous>, transform_indices = @transform_1, window_bounds = array<i64: 1, 3>}, {pipeline_mode = #tpu.pipeline_mode<synchronous>, transform_indices = @transform_2, window_bounds = array<i64: 27, 16>}, {pipeline_mode = #tpu.pipeline_mode<synchronous>, transform_indices = @transform_3, window_bounds = array<i64: 1, 16>}, {transform_indices = @transform_4, window_bounds = array<i64: 1, 16, 16, 16>}]} {
    %c0 = arith.constant 0 : index
    %c0_0 = arith.constant 0 : index
    %c0_1 = arith.constant 0 : index
    %c0_2 = arith.constant 0 : index
    %0 = vector.load %arg1[%c0, %c0_0, %c0_1, %c0_2] : memref<1x16x16x3xf32, #tpu.memory_space<vmem>>, vector<1x16x16x3xf32>
    %1 = vector.shape_cast %0 : vector<1x16x16x3xf32> to vector<16x16x3xf32>
    %c0_3 = arith.constant 0 : index
    %c0_4 = arith.constant 0 : index
    %2 = vector.load %arg2[%c0_3, %c0_4] : memref<1x3xf32, #tpu.memory_space<vmem>>, vector<1x3xf32>
    %3 = vector.shape_cast %2 : vector<1x3xf32> to vector<1x1x3xf32>
    %4 = vector.broadcast %3 : vector<1x1x3xf32> to vector<16x16x3xf32>
    %5 = arith.addf %1, %4 : vector<16x16x3xf32>
    %cst = arith.constant 0.000000e+00 : bf16
    %6 = vector.broadcast %cst : bf16 to vector<18x18x3xbf16>
    %c0_5 = arith.constant 0 : index
    %c0_6 = arith.constant 0 : index
    %c0_7 = arith.constant 0 : index
    %7 = vector.load %arg6[%c0_5, %c0_6, %c0_7] : memref<18x18x3xbf16, #tpu.memory_space<vmem>>, vector<18x18x3xbf16>
    tpu.vector_store %arg6[%c0_5, %c0_6, %c0_7], %6 {strides = array<i32>} : memref<18x18x3xbf16, #tpu.memory_space<vmem>>, vector<18x18x3xbf16>,
    %8 = arith.truncf %5 : vector<16x16x3xf32> to vector<16x16x3xbf16>
    %c1 = arith.constant 1 : index
    %c1_8 = arith.constant 1 : index
    %c0_9 = arith.constant 0 : index
    %9 = vector.load %arg6[%c1, %c1_8, %c0_9] : memref<18x18x3xbf16, #tpu.memory_space<vmem>>, vector<16x16x3xbf16>
    tpu.vector_store %arg6[%c1, %c1_8, %c0_9], %8 {strides = array<i32>} : memref<18x18x3xbf16, #tpu.memory_space<vmem>>, vector<16x16x3xbf16>,
    %c0_10 = arith.constant 0 : index
    %c0_11 = arith.constant 0 : index
    %c0_12 = arith.constant 0 : index
    %10 = vector.load %arg6[%c0_10, %c0_11, %c0_12] : memref<18x18x3xbf16, #tpu.memory_space<vmem>>, vector<16x16x3xbf16>
    %11 = vector.shape_cast %10 : vector<16x16x3xbf16> to vector<256x3xbf16>
    %c0_13 = arith.constant 0 : index
    %c0_14 = arith.constant 0 : index
    %12 = vector.load %arg7[%c0_13, %c0_14] : memref<256x27xbf16, #tpu.memory_space<vmem>>, vector<256x3xbf16>
    tpu.vector_store %arg7[%c0_13, %c0_14], %11 {strides = array<i32>} : memref<256x27xbf16, #tpu.memory_space<vmem>>, vector<256x3xbf16>,
    %c0_15 = arith.constant 0 : index
    %c1_16 = arith.constant 1 : index
    %c0_17 = arith.constant 0 : index
    %13 = vector.load %arg6[%c0_15, %c1_16, %c0_17] : memref<18x18x3xbf16, #tpu.memory_space<vmem>>, vector<16x16x3xbf16>
    %14 = vector.shape_cast %13 : vector<16x16x3xbf16> to vector<256x3xbf16>
    %c0_18 = arith.constant 0 : index
    %c3 = arith.constant 3 : index
    %15 = vector.load %arg7[%c0_18, %c3] : memref<256x27xbf16, #tpu.memory_space<vmem>>, vector<256x3xbf16>
    tpu.vector_store %arg7[%c0_18, %c3], %14 {strides = array<i32>} : memref<256x27xbf16, #tpu.memory_space<vmem>>, vector<256x3xbf16>,
    %c0_19 = arith.constant 0 : index
    %c2 = arith.constant 2 : index
    %c0_20 = arith.constant 0 : index
    %16 = vector.load %arg6[%c0_19, %c2, %c0_20] : memref<18x18x3xbf16, #tpu.memory_space<vmem>>, vector<16x16x3xbf16>
    %17 = vector.shape_cast %16 : vector<16x16x3xbf16> to vector<256x3xbf16>
    %c0_21 = arith.constant 0 : index
    %c6 = arith.constant 6 : index
    %18 = vector.load %arg7[%c0_21, %c6] : memref<256x27xbf16, #tpu.memory_space<vmem>>, vector<256x3xbf16>
    tpu.vector_store %arg7[%c0_21, %c6], %17 {strides = array<i32>} : memref<256x27xbf16, #tpu.memory_space<vmem>>, vector<256x3xbf16>,
    %c1_22 = arith.constant 1 : index
    %c0_23 = arith.constant 0 : index
    %c0_24 = arith.constant 0 : index
    %19 = vector.load %arg6[%c1_22, %c0_23, %c0_24] : memref<18x18x3xbf16, #tpu.memory_space<vmem>>, vector<16x16x3xbf16>
    %20 = vector.shape_cast %19 : vector<16x16x3xbf16> to vector<256x3xbf16>
    %c0_25 = arith.constant 0 : index
    %c9 = arith.constant 9 : index
    %21 = vector.load %arg7[%c0_25, %c9] : memref<256x27xbf16, #tpu.memory_space<vmem>>, vector<256x3xbf16>
    tpu.vector_store %arg7[%c0_25, %c9], %20 {strides = array<i32>} : memref<256x27xbf16, #tpu.memory_space<vmem>>, vector<256x3xbf16>,
    %c1_26 = arith.constant 1 : index
    %c1_27 = arith.constant 1 : index
    %c0_28 = arith.constant 0 : index
    %22 = vector.load %arg6[%c1_26, %c1_27, %c0_28] : memref<18x18x3xbf16, #tpu.memory_space<vmem>>, vector<16x16x3xbf16>
    %23 = vector.shape_cast %22 : vector<16x16x3xbf16> to vector<256x3xbf16>
    %c0_29 = arith.constant 0 : index
    %c12 = arith.constant 12 : index
    %24 = vector.load %arg7[%c0_29, %c12] : memref<256x27xbf16, #tpu.memory_space<vmem>>, vector<256x3xbf16>
    tpu.vector_store %arg7[%c0_29, %c12], %23 {strides = array<i32>} : memref<256x27xbf16, #tpu.memory_space<vmem>>, vector<256x3xbf16>,
    %c1_30 = arith.constant 1 : index
    %c2_31 = arith.constant 2 : index
    %c0_32 = arith.constant 0 : index
    %25 = vector.load %arg6[%c1_30, %c2_31, %c0_32] : memref<18x18x3xbf16, #tpu.memory_space<vmem>>, vector<16x16x3xbf16>
    %26 = vector.shape_cast %25 : vector<16x16x3xbf16> to vector<256x3xbf16>
    %c0_33 = arith.constant 0 : index
    %c15 = arith.constant 15 : index
    %27 = vector.load %arg7[%c0_33, %c15] : memref<256x27xbf16, #tpu.memory_space<vmem>>, vector<256x3xbf16>
    tpu.vector_store %arg7[%c0_33, %c15], %26 {strides = array<i32>} : memref<256x27xbf16, #tpu.memory_space<vmem>>, vector<256x3xbf16>,
    %c2_34 = arith.constant 2 : index
    %c0_35 = arith.constant 0 : index
    %c0_36 = arith.constant 0 : index
    %28 = vector.load %arg6[%c2_34, %c0_35, %c0_36] : memref<18x18x3xbf16, #tpu.memory_space<vmem>>, vector<16x16x3xbf16>
    %29 = vector.shape_cast %28 : vector<16x16x3xbf16> to vector<256x3xbf16>
    %c0_37 = arith.constant 0 : index
    %c18 = arith.constant 18 : index
    %30 = vector.load %arg7[%c0_37, %c18] : memref<256x27xbf16, #tpu.memory_space<vmem>>, vector<256x3xbf16>
    tpu.vector_store %arg7[%c0_37, %c18], %29 {strides = array<i32>} : memref<256x27xbf16, #tpu.memory_space<vmem>>, vector<256x3xbf16>,
    %c2_38 = arith.constant 2 : index
    %c1_39 = arith.constant 1 : index
    %c0_40 = arith.constant 0 : index
    %31 = vector.load %arg6[%c2_38, %c1_39, %c0_40] : memref<18x18x3xbf16, #tpu.memory_space<vmem>>, vector<16x16x3xbf16>
    %32 = vector.shape_cast %31 : vector<16x16x3xbf16> to vector<256x3xbf16>
    %c0_41 = arith.constant 0 : index
    %c21 = arith.constant 21 : index
    %33 = vector.load %arg7[%c0_41, %c21] : memref<256x27xbf16, #tpu.memory_space<vmem>>, vector<256x3xbf16>
    tpu.vector_store %arg7[%c0_41, %c21], %32 {strides = array<i32>} : memref<256x27xbf16, #tpu.memory_space<vmem>>, vector<256x3xbf16>,
    %c2_42 = arith.constant 2 : index
    %c2_43 = arith.constant 2 : index
    %c0_44 = arith.constant 0 : index
    %34 = vector.load %arg6[%c2_42, %c2_43, %c0_44] : memref<18x18x3xbf16, #tpu.memory_space<vmem>>, vector<16x16x3xbf16>
    %35 = vector.shape_cast %34 : vector<16x16x3xbf16> to vector<256x3xbf16>
    %c0_45 = arith.constant 0 : index
    %c24 = arith.constant 24 : index
    %36 = vector.load %arg7[%c0_45, %c24] : memref<256x27xbf16, #tpu.memory_space<vmem>>, vector<256x3xbf16>
    tpu.vector_store %arg7[%c0_45, %c24], %35 {strides = array<i32>} : memref<256x27xbf16, #tpu.memory_space<vmem>>, vector<256x3xbf16>,
    %c0_46 = arith.constant 0 : index
    %c0_47 = arith.constant 0 : index
    %37 = vector.load %arg7[%c0_46, %c0_47] : memref<256x27xbf16, #tpu.memory_space<vmem>>, vector<256x27xbf16>
    %c0_48 = arith.constant 0 : index
    %c0_49 = arith.constant 0 : index
    %38 = vector.load %arg3[%c0_48, %c0_49] : memref<27x16xbf16, #tpu.memory_space<vmem>>, vector<27x16xbf16>
    %cst_50 = arith.constant dense<0.000000e+00> : vector<256x16xf32>
    %39 = tpu.matmul %37, %38, %cst_50 {dimension_numbers = #tpu.dot_dimension_numbers<[1], [0], [0], [1], [0, 0, 1, 1], [], []>} : vector<256x27xbf16>, vector<27x16xbf16>, vector<256x16xf32> -> vector<256x16xf32>
    %c0_51 = arith.constant 0 : index
    %c0_52 = arith.constant 0 : index
    %40 = vector.load %arg4[%c0_51, %c0_52] : memref<1x16xf32, #tpu.memory_space<vmem>>, vector<1x16xf32>
    %41 = vector.broadcast %40 : vector<1x16xf32> to vector<256x16xf32>
    %42 = arith.addf %39, %41 : vector<256x16xf32>
    %43 = vector.shape_cast %42 : vector<256x16xf32> to vector<16x16x16xf32>
    %c0_53 = arith.constant 0 : index
    %c0_54 = arith.constant 0 : index
    %c0_55 = arith.constant 0 : index
    %c0_56 = arith.constant 0 : index
    %44 = vector.load %arg5[%c0_53, %c0_54, %c0_55, %c0_56] : memref<1x16x16x16xf32, #tpu.memory_space<vmem>>, vector<1x16x16x16xf32>
    %45 = vector.shape_cast %44 : vector<1x16x16x16xf32> to vector<16x16x16xf32>
    %46 = vector.shape_cast %43 : vector<16x16x16xf32> to vector<1x16x16x16xf32>
    tpu.vector_store %arg5[%c0_53, %c0_54, %c0_55, %c0_56], %46 {strides = array<i32>} : memref<1x16x16x16xf32, #tpu.memory_space<vmem>>, vector<1x16x16x16xf32>,
    return
  }
  func.func @transform_0(%arg0: i32) -> (i32, i32, i32, i32) {
    %c0_i32 = arith.constant 0 : i32
    %c0_i32_0 = arith.constant 0 : i32
    %c0_i32_1 = arith.constant 0 : i32
    %c0_i32_2 = arith.constant 0 : i32
    return %arg0, %c0_i32, %c0_i32_0, %c0_i32_1 : i32, i32, i32, i32
  }
  func.func @transform_1(%arg0: i32) -> (i32, i32) {
    %c0_i32 = arith.constant 0 : i32
    %c0_i32_0 = arith.constant 0 : i32
    %c0_i32_1 = arith.constant 0 : i32
    return %c0_i32, %c0_i32_0 : i32, i32
  }
  func.func @transform_2(%arg0: i32) -> (i32, i32) {
    %c0_i32 = arith.constant 0 : i32
    %c0_i32_0 = arith.constant 0 : i32
    %c0_i32_1 = arith.constant 0 : i32
    return %c0_i32, %c0_i32_0 : i32, i32
  }
  func.func @transform_3(%arg0: i32) -> (i32, i32) {
    %c0_i32 = arith.constant 0 : i32
    %c0_i32_0 = arith.constant 0 : i32
    %c0_i32_1 = arith.constant 0 : i32
    return %c0_i32, %c0_i32_0 : i32, i32
  }
  func.func @transform_4(%arg0: i32) -> (i32, i32, i32, i32) {
    %c0_i32 = arith.constant 0 : i32
    %c0_i32_0 = arith.constant 0 : i32
    %c0_i32_1 = arith.constant 0 : i32
    %c0_i32_2 = arith.constant 0 : i32
    return %arg0, %c0_i32, %c0_i32_0, %c0_i32_1 : i32, i32, i32, i32
  }
}

</mosaic_0001>

<bundles_post_ra>
// kernel: tpu_custom_call.1
= control target key start
LH: loop header
LB: loop body
LE: loop exit
PB: predicated region body
PF: predicated region fallthrough
CT: control target
= control target key end

     0   :  { %9 = vsyncpa [#allocation5], 0  ;;  %s6803_s0 = inlined_call_operand.vmem [shape: f32[2,16,16,3], index: 0, kind: input, shape index: {}]   ;;  %s6804_s1 = inlined_call_operand.vmem [shape: f32[1,3], index: 1, kind: input, shape index: {}]   ;;  %s6805_s2 = inlined_call_operand.vmem [shape: bf16[27,16], index: 2, kind: input, shape index: {}]   ;;  %s6806_s3 = inlined_call_operand.vmem [shape: f32[1,16], index: 3, kind: input, shape index: {}]   ;;  %s6807_s4 = inlined_call_operand.hbm [shape: f32[2,16,16,16], index: 4, kind: output, shape index: {}]  }
   0x1   :  { %11 = vsyncpa [#allocation5 + $0x1], 0  ;;  %s4662_s15 = smov 0   ;;  %s4664_s16 = smov 0  }
   0x2   :  { %s4666_s17 = smov 0   ;;  %s4668_s18 = smov 0  }
   0x3 LB: > { %s4683_s19 = sadd.s32 4294967295, %s4623_s18   ;;  %s4332_s20 = sadd.s32 4294967294, %s4623_s18   ;;  %s4623_s18 = sphi %s4668_s18, %s6823_s18   ;;  %s4619_s17 = sphi %s4666_s17, %s6822_s17   ;;  %s4615_s16 = sphi %s4664_s16, %s6821_s16   ;;  %s4611_s15 = sphi %s4662_s15, %s6820_s15  }
   0x4   : > { %s4687_s21 = sadd.s32 1, %s4623_s18   ;;  %s113_s22 = sadd.s32 1, %s4619_s17 }
   0x5   : > { %s110_s23 = ssub.s32 %s4623_s18, %s4687_s21  ;;  %p123_p0 = scmp.ne.s32.totalorder %s4619_s17, %s4615_s16 }
   0x6   : > { %p111_p1 = scmp.eq.s32.totalorder %s110_s23, 0  ;;  %p124_p2 = scmp.eq.s32.totalorder %s4683_s19, 1 }
   0x7   : > { %p129_p3 = scmp.ne.s32.totalorder %s4615_s16, %s4611_s15  ;;  %p130_p4 = scmp.eq.s32.totalorder %s4332_s20, 1 }
   0x8   : > { %s4698_s24 = scalar_select %p111_p1, %s4619_s17, %s113_s22  }
   0x9   : > { %p4700_p5 = por %p124_p2, %p123_p0  ;;  %p4704_p6 = por %p130_p4, %p129_p3 }
   0xa   : > { %p4335_p7 = scmp.ge.s32.totalorder %s4623_s18, 1  ;;  %p165_p8 = scmp.lt.s32.totalorder %s4623_s18, 3 }
   0xc   : > { %p166_p9 = pnand %p4335_p7, %p165_p8 }
   0xd   : > { %p191_p10 = scmp.lt.s32.totalorder (!%p166_p9), %s4683_s19, 1  ;;  %s4626_s8 = smov (!%p166_p9), 3  }
   0xe   : > { %169 = sbr.rel (%p166_p9) target bundleno = 1038 (0x40e), region = 36  ;;  %s4627_s11 = smov (!%p166_p9), 6  }
   0xf   : > { %s4628_s12 = smov (!%p166_p9), 9   ;;  %s4629_s20 = smov (!%p166_p9), 12  }
  0x10   : > { %s4630_s22 = smov (!%p166_p9), 15   ;;  %s4631_s23 = smov (!%p166_p9), 18  }
  0x11   : > { %s188_s9 = sand.u32 (!%p166_p9), 1, %s4615_s16   ;;  %s4499_s14 = sshll.u32 (!%p166_p9), %s4683_s19, 8 }
  0x12   : > { %s4336_s10 = sshll.u32 (!%p166_p9), %s188_s9, 8  ;;  %s4581_s7 = scalar_lea.hbm (!%p166_p9), %s6807_s4, 512 }
  0x13   : > { %vm265_vm0 = vcmask 19456   ;;  %v4625_v0 = vmov 0   ;;  %s192_s27 = scalar_select %p191_p10, %s4683_s19, 1  ;;  %vm906_vm1 = vsmask.f32 3328  ;;  %vm268_vm6 = vcmask 16384  }
  0x14   : > { %266 = vst.msk [vmem:[#allocation2] sm:$0xf] %vm265_vm0, %v4625_v0  ;;  %vm907_vm2 = vsmask.f32 7440  ;;  %v4749_v11 = vld [vmem:[%s6804_s1] ss:$0 sm:$0xff] }
  0x15   : > { %267 = vst.msk [vmem:[#allocation2 + $0x4] sm:$0xf] %vm265_vm0, %v4625_v0  ;;  %s4480_s28 = sshll.u32 %s192_s27, 8  ;;  %vm4751_vm3 = vmor %vm906_vm1, %vm907_vm2  ;;  %vm353_vm4 = vsmask.f32 256  ;;  %vm1518_vm11 = vcmask 1042432  }
  0x16   : > { %270 = vst.msk [vmem:[#allocation2 + $0xc] sm:$0xf] %vm265_vm0, %v4625_v0  ;;  %s4737_s5 = scalar_lea.vmem %s6803_s0, %s4480_s28  ;;  %vm354_vm5 = vsmask.f32 4368  ;;  %vm678_vm8 = vsmask.f32 7938  ;;  %vm4957_vm10 = vmand %vm268_vm6, %vm353_vm4 }
  0x17   : > { %271 = vst.msk [vmem:[#allocation2 + $0x10] sm:$0xf] %vm265_vm0, %v4625_v0  ;;  %v198_v8 = vld [vmem:[%s4737_s5 + $0x8] sm:$0xff]  ;;  %v197_v13 = vld [vmem:[%s4737_s5] sm:$0xff]  ;;  %v203_v24 = vld [vmem:[%s4737_s5 + $0x30] sm:$0xff]  ;;  %vm1519_vm12 = vcmask 1046532  }
  0x18   : > { %273 = vst.msk [vmem:[#allocation2 + $0x18] sm:$0xf] %vm265_vm0, %v4625_v0  ;;  %v234_v15 = vadd.f32 %v4749_v11, %v198_v8  ;;  %v233_v17 = vadd.f32 %v4749_v11, %v197_v13  ;;  %v201_v18 = vld [vmem:[%s4737_s5 + $0x20] sm:$0xff]  ;;  %v202_v21 = vld [vmem:[%s4737_s5 + $0x28] sm:$0xff]  ;;  %v204_v26 = vld [vmem:[%s4737_s5 + $0x38] sm:$0xff]  ;;  %v239_v30 = vadd.f32 %v4749_v11, %v203_v24  ;;  %vm1389_vm14 = vcmask 44056  }
  0x19   : > { %274 = vst.msk [vmem:[#allocation2 + $0x1c] sm:$0xf] %vm265_vm0, %v4625_v0  ;;  %v237_v22 = vadd.f32 %v4749_v11, %v201_v18  ;;  %v238_v27 = vadd.f32 %v4749_v11, %v202_v21  ;;  %v240_v32 = vadd.f32 %v4749_v11, %v204_v26  ;;  %v207_v39 = vld [vmem:[%s4737_s5 + $0x50] sm:$0xff]  ;;  %vm4824_vm7 = vmor %vm353_vm4, %vm354_vm5  ;;  %v208_v55 = vld [vmem:[%s4737_s5 + $0x58] sm:$0xff]  ;;  %vm1729_vm15 = vcmask 68656   ;;  %s4632_s27 = smov 21  }
  0x1a   : > { %276 = vst.msk [vmem:[#allocation2 + $0x24] sm:$0xf] %vm265_vm0, %v4625_v0  ;;  %v322_v19 = vpack.c.bf16 %v234_v15, %v234_v15  ;;  %v321_v20 = vpack.c.bf16 %v233_v17, %v233_v17  ;;  %v4806_v38 = vpack.c.bf16 %v239_v30, %v239_v30  ;;  %v199_v40 = vld [vmem:[%s4737_s5 + $0x10] sm:$0xff]  ;;  %v243_v43 = vadd.f32 %v4749_v11, %v207_v39  ;;  %v200_v56 = vld [vmem:[%s4737_s5 + $0x18] sm:$0xff]  ;;  %v209_v13 = vld [vmem:[%s4737_s5 + $0x60] sm:$0xff]  ;;  %s4633_s28 = smov 24  }
  0x1b   : > { %v858_v1 = vld [vmem:[#allocation2] sm:$0xf]  ;;  %277 = vst.msk [vmem:[#allocation2 + $0x28] sm:$0xf] %vm265_vm0, %v4625_v0  ;;  %v325_v29 = vpack.c.bf16 %v237_v22, %v237_v22  ;;  %v4802_v35 = vpack.c.bf16 %v238_v27, %v238_v27  ;;  %v4813_v42 = vpack.c.bf16 %v240_v32, %v240_v32  ;;  %v235_v44 = vadd.f32 %v4749_v11, %v199_v40  ;;  %v206_v26 = vld [vmem:[%s4737_s5 + $0x48] sm:$0xff]  ;;  %vm4919_vm9 = vmand %vm265_vm0, %vm678_vm8  ;;  %s6652_s13 = scalar_lea.vmem [#allocation4], %s4336_s10 }
  0x1c   : > { %v859_v2 = vld [vmem:[#allocation2 + $0x4] sm:$0xf]  ;;  %v910_v3 = vshrl.u32 %v858_v1, 16  ;;  %v913_v4 = vshll.u32 %v858_v1, 16  ;;  %279 = vst.msk [vmem:[#allocation2 + $0x30] sm:$0xf] %vm265_vm0, %v4625_v0  ;;  %v331_v51 = vpack.c.bf16 %v243_v43, %v243_v43  ;;  %v244_v59 = vadd.f32 %v4749_v11, %v208_v55  ;;  %vm5444_vm13 = vmor %vm1518_vm11, %vm1519_vm12 }
  0x1d   : > { %v919_v5 = vshll.u32 %v859_v2, 16  ;;  %280 = vst.msk [vmem:[#allocation2 + $0x34] sm:$0xf] %vm265_vm0, %v4625_v0  ;;  %v923_v23 = vshrl.u32 %v859_v2, 16  ;;  %v365_v25 = vshrl.u32 %v322_v19, 16  ;;  %v357_v28 = vshrl.u32 %v321_v20, 16 }
  0x1e   : > { %v912_v6 = vrot.slane %v910_v3, 4  ;;  %v915_v7 = vrot.slane %v913_v4, 5  ;;  %282 = vst.msk [vmem:[#allocation2 + $0x3c] sm:$0xf] %vm265_vm0, %v4625_v0  ;;  %v368_v34 = vshll.u32 %v322_v19, 16  ;;  %v391_v37 = vshrl.u32 %v325_v29, 16 }
  0x1f   : > { %283 = vst.msk [vmem:[#allocation2 + $0x40] sm:$0xf] %vm265_vm0, %v4625_v0  ;;  %v4742_v10 = vrot.slane %v919_v5, 5  ;;  %v925_v31 = vrot.slane %v923_v23, 4  ;;  %v4798_v33 = vrot.slane %v365_v25, 7  ;;  %v359_v36 = vrot.slane %v357_v28, 7 }
  0x20   : > { %v916_v9 = vor.u32 %v915_v7, %v912_v6  ;;  %285 = vst.msk [vmem:[#allocation2 + $0x48] sm:$0xf] %vm265_vm0, %v4625_v0  ;;  %v360_v45 = vshll.u32 %v321_v20, 16  ;;  %v394_v49 = vshll.u32 %v325_v29, 16  ;;  %v399_v50 = vshrl.u32 %v4802_v35, 16  ;;  %v205_v6 = vld [vmem:[%s4737_s5 + $0x40] sm:$0xff] }
  0x21   : > { %286 = vst.msk [vmem:[#allocation2 + $0x4c] sm:$0xf] %vm265_vm0, %v4625_v0  ;;  %v926_v41 = vor.u32 %v925_v31, %v4742_v10  ;;  %v363_v46 = vrot.slane %v359_v36, 4  ;;  %v370_v47 = vor.u32 %v368_v34, %v4798_v33  ;;  %v4829_v52 = vpack.c.bf16 %v235_v44, %v235_v44  ;;  %v4899_v32 = vld [vmem:[#allocation2 + $0xc] sm:$0xf] }
  0x22   : > { %v917_v14 = vrot.slane %v916_v9, 4  ;;  %288 = vst.msk [vmem:[#allocation2 + $0x54] sm:$0xf] %vm265_vm0, %v4625_v0  ;;  %v4833_v53 = vrot.slane %v391_v37, 7  ;;  %v408_v54 = vshrl.u32 %v4806_v38, 16  ;;  %v416_v58 = vshrl.u32 %v4813_v42, 16 }
  0x23   : > { %289 = vst.msk [vmem:[#allocation2 + $0x58] sm:$0xf] %vm265_vm0, %v4625_v0  ;;  %v4840_v57 = vrot.slane %v926_v41, 4  ;;  %v236_v60 = vadd.f32 %v4749_v11, %v200_v56  ;;  %v4847_v61 = vor.u32 %v360_v45, %v359_v36  ;;  %v4851_v62 = vsel %vm4824_vm7, %v363_v46, %v370_v47  ;;  %v4907_v39 = vld [vmem:[#allocation2 + $0x24] sm:$0xf] }
  0x24   : > { %v922_v16 = vsel %vm4751_vm3, %v917_v14, %v4742_v10  ;;  %291 = vst.msk [vmem:[#allocation2 + $0x60] sm:$0xf] %vm265_vm0, %v4625_v0  ;;  %v402_v63 = vshll.u32 %v4802_v35, 16  ;;  %v442_v1 = vshrl.u32 %v331_v51, 16  ;;  %v4856_v2 = vrot.slane %v399_v50, 7  ;;  %v210_v14 = vld [vmem:[%s4737_s5 + $0x68] sm:$0xff] }
  0x25   : > { %1293 = vrot.lane.b32.xlu0 %v922_v16, %s4626_s8  ;;  %292 = vst.msk [vmem:[#allocation2 + $0x64] sm:$0xf] %vm265_vm0, %v4625_v0  ;;  %v332_v3 = vpack.c.bf16 %v244_v59, %v244_v59  ;;  %v324_v4 = vpack.c.bf16 %v236_v60, %v236_v60  ;;  %v374_v5 = vshrl.u32 %v4829_v52, 16  ;;  %v4863_v7 = vor.u32 %v394_v49, %v4833_v53  ;;  %v4930_v50 = vld [vmem:[#allocation2 + $0x18] sm:$0xf] }
  0x26   : > { %294 = vst.msk [vmem:[#allocation2 + $0x6c] sm:$0xf] %vm265_vm0, %v4625_v0  ;;  %v397_v8 = vrot.slane %v4833_v53, 4  ;;  %v4866_v9 = vrot.slane %v408_v54, 7  ;;  %v241_v10 = vadd.f32 %v4749_v11, %v205_v6  ;;  %v4873_v15 = vrot.slane %v416_v58, 7 }
  0x27   : > { %295 = vst.msk [vmem:[#allocation2 + $0x70] sm:$0xf] %vm265_vm0, %v4625_v0  ;;  %v419_v16 = vshll.u32 %v4813_v42, 16  ;;  %v450_v17 = vshrl.u32 %v332_v3, 16  ;;  %v382_v18 = vshrl.u32 %v324_v4, 16  ;;  %v4878_v19 = vrot.slane %v442_v1, 7 }
  0x28   : > { %297 = vst.msk [vmem:[#allocation2 + $0x78] sm:$0xf] %vm265_vm0, %v4625_v0  ;;  %v445_v20 = vshll.u32 %v331_v51, 16  ;;  %v4880_v21 = vpack.c.bf16 %v241_v10, %v241_v10  ;;  %v245_v22 = vadd.f32 %v4749_v11, %v209_v13  ;;  %v404_v23 = vor.u32 %v402_v63, %v4856_v2  ;;  %v4925_v47 = vld [vmem:[#allocation2 + $0x48] sm:$0xf] }
  0x29   : > { %298 = vst.msk [vmem:[#allocation2 + $0x7c] sm:$0xf] %vm265_vm0, %v4625_v0  ;;  %v4886_v24 = vrot.slane %v374_v5, 7  ;;  %v377_v25 = vshll.u32 %v4829_v52, 16  ;;  %v246_v27 = vadd.f32 %v4749_v11, %v210_v14  ;;  %v414_v28 = vrot.slane %v4866_v9, 4 }
  0x2a   : > { %300 = vst.msk [vmem:[#allocation2 + $0x84] sm:$0xf] %vm265_vm0, %v4625_v0  ;;  %v4894_v29 = vrot.slane %v450_v17, 7  ;;  %v453_v30 = vshll.u32 %v332_v3, 16  ;;  %v242_v31 = vadd.f32 %v4749_v11, %v206_v26  ;;  %v421_v34 = vor.u32 %v419_v16, %v4873_v15 }
  0x2b   : > { %301 = vst.msk [vmem:[#allocation2 + $0x88] sm:$0xf] %vm265_vm0, %v4625_v0  ;;  %v4902_v35 = vrot.slane %v382_v18, 7  ;;  %v385_v36 = vshll.u32 %v324_v4, 16  ;;  %v425_v37 = vshrl.u32 %v4880_v21, 16  ;;  %v372_v40 = vrot.slane %v4798_v33, 4 }
  0x2c   : > { %303 = vst.msk [vmem:[#allocation2 + $0x90] sm:$0xf] %vm265_vm0, %v4625_v0  ;;  %v4911_v41 = vor.u32 %v445_v20, %v4878_v19  ;;  %v330_v42 = vpack.c.bf16 %v242_v31, %v242_v31  ;;  %v4913_v43 = vpack.c.bf16 %v245_v22, %v245_v22  ;;  %v406_v46 = vrot.slane %v4856_v2, 4  ;;  %v213_v18 = vld [vmem:[%s4737_s5 + $0x80] sm:$0xff] }
  0x2d   : > { %304 = vst.msk [vmem:[#allocation2 + $0x94] sm:$0xf] %vm265_vm0, %v4625_v0  ;;  %v448_v33 = vrot.slane %v4878_v19, 4  ;;  %v4928_v49 = vor.u32 %v377_v25, %v4886_v24  ;;  %v4932_v51 = vpack.c.bf16 %v246_v27, %v246_v27  ;;  %v455_v54 = vor.u32 %v453_v30, %v4894_v29  ;;  %v214_v19 = vld [vmem:[%s4737_s5 + $0x88] sm:$0xff] }
  0x2e   : > { %306 = vst.msk [vmem:[#allocation2 + $0x9c] sm:$0xf] %vm265_vm0, %v4625_v0  ;;  %v380_v55 = vrot.slane %v4886_v24, 4  ;;  %v433_v56 = vshrl.u32 %v330_v42, 16  ;;  %v387_v58 = vor.u32 %v385_v36, %v4902_v35  ;;  %v4941_v59 = vrot.slane %v425_v37, 7 }
  0x2f   : > { %307 = vst.msk [vmem:[#allocation2 + $0xa0] sm:$0xf] %vm265_vm0, %v4625_v0  ;;  %v428_v60 = vshll.u32 %v4880_v21, 16  ;;  %v459_v63 = vshrl.u32 %v4913_v43, 16  ;;  %v681_v2 = vsel %vm4919_vm9, %v4847_v61, %v4899_v32  ;;  %v697_v3 = vsel %vm4919_vm9, %v4863_v7, %v4907_v39  ;;  %v211_v32 = vld [vmem:[%s4737_s5 + $0x70] sm:$0xff] }
  0x30   : > { %309 = vst.msk [vmem:[#allocation2 + $0xa8] sm:$0xf] %vm265_vm0, %v4625_v0  ;;  %v467_v6 = vshrl.u32 %v4932_v51, 16  ;;  %v405_v61 = vsel %vm4824_vm7, %v397_v8, %v404_v23  ;;  %v4970_v7 = vsel %vm4824_vm7, %v414_v28, %v421_v34  ;;  %v4972_v13 = vrot.slane %v433_v56, 7 }
  0x31   : > { %310 = vst.msk [vmem:[#allocation2 + $0xac] sm:$0xf] %vm265_vm0, %v4625_v0  ;;  %v436_v14 = vshll.u32 %v330_v42, 16  ;;  %v718_v53 = vsel %vm4919_vm9, %v4911_v41, %v4925_v47  ;;  %v690_v8 = vsel %vm4919_vm9, %v4928_v49, %v4930_v50  ;;  %v4987_v17 = vrot.slane %v459_v63, 7  ;;  %v216_v42 = vld [vmem:[%s4737_s5 + $0x98] sm:$0xff] }
  0x32   : > { %312 = vst.msk [vmem:[#allocation2 + $0xb4] sm:$0xf] %vm265_vm0, %v4625_v0  ;;  %v423_v20 = vrot.slane %v4873_v15, 4  ;;  %v4999_v21 = vsel %vm4824_vm7, %v448_v33, %v455_v54  ;;  %v5003_v22 = vsel %vm4824_vm7, %v380_v55, %v387_v58  ;;  %v5012_v24 = vor.u32 %v428_v60, %v4941_v59  ;;  %v5014_v15 = vld [vmem:[#allocation2 + $0x3c] sm:$0xf] }
  0x33   : > { %313 = vst.msk [vmem:[#allocation2 + $0xb8] sm:$0xf] %vm265_vm0, %v4625_v0  ;;  %v249_v25 = vadd.f32 %v4749_v11, %v213_v18  ;;  %v250_v26 = vadd.f32 %v4749_v11, %v214_v19  ;;  %v431_v27 = vrot.slane %v4941_v59, 4  ;;  %v438_v28 = vor.u32 %v436_v14, %v4972_v13  ;;  %v212_v60 = vld [vmem:[%s4737_s5 + $0x78] sm:$0xff]  ;;  %v5145_v49 = vld [vmem:[#allocation2 + $0x60] sm:$0xf] }
  0x34   : > { %315 = vst.msk [vmem:[#allocation2 + $0xc0] sm:$0xf] %vm265_vm0, %v4625_v0  ;;  %v469_v30 = vrot.slane %v467_v6, 7  ;;  %v470_v31 = vshll.u32 %v4932_v51, 16  ;;  %v465_v34 = vrot.slane %v4987_v17, 4  ;;  %v389_v36 = vrot.slane %v4902_v35, 4 }
  0x35   : > { %316 = vst.msk [vmem:[#allocation2 + $0xc4] sm:$0xf] %vm265_vm0, %v4625_v0  ;;  %v337_v37 = vpack.c.bf16 %v249_v25, %v249_v25  ;;  %v338_v39 = vpack.c.bf16 %v250_v26, %v250_v26  ;;  %v411_v33 = vshll.u32 %v4806_v38, 16  ;;  %v247_v51 = vadd.f32 %v4749_v11, %v211_v32 }
  0x36   : > { %318 = vst.msk [vmem:[#allocation2 + $0xcc] sm:$0xf] %vm265_vm0, %v4625_v0  ;;  %v252_v56 = vadd.f32 %v4749_v11, %v216_v42  ;;  %v472_v58 = vor.u32 %v470_v31, %v469_v30  ;;  %v248_v6 = vadd.f32 %v4749_v11, %v212_v60  ;;  %v457_v14 = vrot.slane %v4894_v29, 4  ;;  %v5072_v29 = vld [vmem:[#allocation2 + $0x6c] sm:$0xf] }
  0x37   : > { %319 = vst.msk [vmem:[#allocation2 + $0xd0] sm:$0xf] %vm265_vm0, %v4625_v0  ;;  %v493_v54 = vshrl.u32 %v337_v37, 16  ;;  %v496_v55 = vshll.u32 %v337_v37, 16  ;;  %v501_v35 = vshrl.u32 %v338_v39, 16  ;;  %v504_v59 = vshll.u32 %v338_v39, 16 }
  0x38   : > { %269 = vst.msk [vmem:[#allocation2 + $0x8] sm:$0x1] %vm268_vm6, %v4625_v0  ;;  %v335_v63 = vpack.c.bf16 %v247_v51, %v247_v51  ;;  %v5053_v18 = vor.u32 %v411_v33, %v4866_v9  ;;  %v5059_v19 = vsel %vm4824_vm7, %v431_v27, %v438_v28  ;;  %v219_v37 = vld [vmem:[%s4737_s5 + $0xb0] sm:$0xff]  ;;  %vm2483_vm1 = vcmask 117856  }
  0x39   : > { %272 = vst.msk [vmem:[#allocation2 + $0x14] sm:$0x1] %vm268_vm6, %v4625_v0  ;;  %v255_v41 = vadd.f32 %v4749_v11, %v219_v37  ;;  %vm2820_vm2 = vcmask 142456   ;;  %vm3014_vm4 = vcmask 167056   ;;  %vm4125_vm5 = vcmask 1044480  }
  0x3a   : > { %275 = vst.msk [vmem:[#allocation2 + $0x20] sm:$0x1] %vm268_vm6, %v4625_v0  ;;  %v476_v27 = vshrl.u32 %v335_v63, 16  ;;  %v479_v28 = vshll.u32 %v335_v63, 16  ;;  %vm3912_vm8 = vcmask 216256  }
  0x3b   : > { %278 = vst.msk [vmem:[#allocation2 + $0x2c] sm:$0x1] %vm268_vm6, %v4625_v0  ;;  %v5118_v37 = vpack.c.bf16 %v255_v41, %v255_v41 }
  0x3c   : > { %281 = vst.msk [vmem:[#allocation2 + $0x38] sm:$0x1] %vm268_vm6, %v4625_v0  ;;  %v5096_v42 = vrot.slane %v476_v27, 7 }
  0x3d   : > { %284 = vst.msk [vmem:[#allocation2 + $0x44] sm:$0x1] %vm268_vm6, %v4625_v0 }
  0x3e   : > { %287 = vst.msk [vmem:[#allocation2 + $0x50] sm:$0x1] %vm268_vm6, %v4625_v0 }
  0x3f   : > { %v860_v44 = vld [vmem:[#allocation2 + $0x8] sm:$0x1]  ;;  %290 = vst.msk [vmem:[#allocation2 + $0x5c] sm:$0x1] %vm268_vm6, %v4625_v0 }
  0x40   : > { %v929_v52 = vshll.u32 %v860_v44, 16  ;;  %293 = vst.msk [vmem:[#allocation2 + $0x68] sm:$0x1] %vm268_vm6, %v4625_v0  ;;  %v686_v5 = vld [vmem:[#allocation2 + $0x14] sm:$0x1] }
  0x41   : > { %296 = vst.msk [vmem:[#allocation2 + $0x74] sm:$0x1] %vm268_vm6, %v4625_v0 }
  0x42   : > { %v931_v1 = vrot.slane %v929_v52, 5  ;;  %299 = vst.msk [vmem:[#allocation2 + $0x80] sm:$0x1] %vm268_vm6, %v4625_v0  ;;  %v700_v10 = vld [vmem:[#allocation2 + $0x2c] sm:$0x1] }
  0x43   : > { %302 = vst.msk [vmem:[#allocation2 + $0x8c] sm:$0x1] %vm268_vm6, %v4625_v0  ;;  %v5009_v23 = vsel %vm4957_vm10, %v406_v46, %v700_v10  ;;  %v707_v44 = vld [vmem:[#allocation2 + $0x38] sm:$0x1]  ;;  %v474_v46 = vrot.slane %v469_v30, 4  ;;  %v5078_v30 = vsel %vm4824_vm7, %v465_v34, %v472_v58 }
  0x44   : > { %v932_v16 = vsel %vm4751_vm3, %v4840_v57, %v931_v1  ;;  %305 = vst.msk [vmem:[#allocation2 + $0x98] sm:$0x1] %vm268_vm6, %v4625_v0  ;;  %v687_v57 = vsel %vm4957_vm10, %v372_v40, %v686_v5  ;;  %v215_v40 = vld [vmem:[%s4737_s5 + $0x90] sm:$0xff]  ;;  %v693_v1 = vld [vmem:[#allocation2 + $0x20] sm:$0x1]  ;;  %v5043_v5 = vrot.slane %v501_v35, 7  ;;  %v5115_v35 = vor.u32 %v479_v28, %v5096_v42 }
  0x45   : > { %1295 = vrot.lane.b32.xlu0 %v932_v16, %s4626_s8  ;;  %308 = vst.msk [vmem:[#allocation2 + $0xa4] sm:$0x1] %vm268_vm6, %v4625_v0  ;;  %v251_v52 = vadd.f32 %v4749_v11, %v215_v40  ;;  %v721_v16 = vld [vmem:[#allocation2 + $0x50] sm:$0x1]  ;;  %v5082_v31 = vsel %vm4957_vm10, %v389_v36, %v693_v1 }
  0x46   : > { %311 = vst.msk [vmem:[#allocation2 + $0xb0] sm:$0x1] %vm268_vm6, %v4625_v0  ;;  %v728_v38 = vld [vmem:[#allocation2 + $0x5c] sm:$0x1]  ;;  %v506_v26 = vor.u32 %v504_v59, %v5043_v5  ;;  %v5090_v40 = vsel %vm4957_vm10, %v457_v14, %v721_v16 }
  0x47   : > { %314 = vst.msk [vmem:[#allocation2 + $0xbc] sm:$0x1] %vm268_vm6, %v4625_v0  ;;  %v5046_v10 = vpack.c.bf16 %v251_v52, %v251_v52  ;;  %v5070_v9 = vsel %vm4957_vm10, %v474_v46, %v728_v38 }
  0x48   : > { %317 = vst.msk [vmem:[#allocation2 + $0xc8] sm:$0x1] %vm268_vm6, %v4625_v0 }
  0x49   : > { %320 = vst.msk [vmem:[#allocation2 + $0xd4] sm:$0x1] %vm268_vm6, %v4625_v0  ;;  %v711_v0 = vsel %vm4919_vm9, %v5012_v24, %v5014_v15  ;;  %v482_v15 = vrot.slane %v5096_v42, 4  ;;  %vm4126_vm6 = vcmask 1045504  }
  0x4a   : > { %682 = vst [vmem:[#allocation2 + $0xc] sm:$0xf] %v681_v2  ;;  %v495_v2 = vrot.slane %v493_v54, 7 }
  0x4b   : > { %683 = vst.msk [vmem:[#allocation2 + $0x10] sm:$0xf] %vm265_vm0, %v4851_v62  ;;  %v708_v62 = vsel %vm4957_vm10, %v423_v20, %v707_v44  ;;  %v5064_v20 = vld [vmem:[#allocation2 + $0x30] sm:$0xf] }
  0x4c   : > { %698 = vst [vmem:[#allocation2 + $0x24] sm:$0xf] %v697_v3  ;;  %v5055_v3 = vpack.c.bf16 %v252_v56, %v252_v56  ;;  %v5061_v25 = vor.u32 %v496_v55, %v495_v2  ;;  %v704_v34 = vsel %vm4919_vm9, %v5053_v18, %v5064_v20 }
  0x4d   : > { %699 = vst.msk [vmem:[#allocation2 + $0x28] sm:$0xf] %vm265_vm0, %v405_v61  ;;  %v499_v61 = vrot.slane %v495_v2, 4 }
  0x4e   : > { %688 = vst [vmem:[#allocation2 + $0x14] sm:$0x1] %v687_v57  ;;  %v5074_v57 = vpack.c.bf16 %v248_v6, %v248_v6  ;;  %v518_v32 = vshrl.u32 %v5055_v3, 16  ;;  %v739_v51 = vsel %vm4919_vm9, %v5061_v25, %v5072_v29 }
  0x4f   : > { %706 = vst.msk [vmem:[#allocation2 + $0x34] sm:$0xf] %vm265_vm0, %v4970_v7  ;;  %v510_v7 = vshrl.u32 %v5046_v10, 16 }
  0x50   : > { %709 = vst [vmem:[#allocation2 + $0x38] sm:$0x1] %v708_v62  ;;  %v484_v36 = vshrl.u32 %v5074_v57, 16 }
  0x51   : > { %v861_v39 = vld [vmem:[#allocation2 + $0xc] sm:$0xf]  ;;  %702 = vst [vmem:[#allocation2 + $0x2c] sm:$0x1] %v5009_v23  ;;  %v5106_v23 = vsel %vm4824_vm7, %v499_v61, %v506_v26 }
  0x52   : > { %v862_v44 = vld [vmem:[#allocation2 + $0x10] sm:$0xf]  ;;  %v934_v46 = vshrl.u32 %v861_v39, 16  ;;  %v937_v33 = vshll.u32 %v861_v39, 16  ;;  %719 = vst [vmem:[#allocation2 + $0x48] sm:$0xf] %v718_v53 }
  0x53   : > { %v943_v52 = vshll.u32 %v862_v44, 16  ;;  %v947_v54 = vshrl.u32 %v862_v44, 16  ;;  %v867_v55 = vld [vmem:[#allocation2 + $0x24] sm:$0xf]  ;;  %720 = vst.msk [vmem:[#allocation2 + $0x4c] sm:$0xf] %vm265_vm0, %v4999_v21 }
  0x54   : > { %v936_v47 = vrot.slane %v934_v46, 4  ;;  %v939_v53 = vrot.slane %v937_v33, 5  ;;  %v868_v56 = vld [vmem:[#allocation2 + $0x28] sm:$0xf]  ;;  %v982_v58 = vshrl.u32 %v867_v55, 16  ;;  %v985_v38 = vshll.u32 %v867_v55, 16 }
  0x55   : > { %v945_v59 = vrot.slane %v943_v52, 5  ;;  %v949_v60 = vrot.slane %v947_v54, 4  ;;  %v991_v63 = vshll.u32 %v868_v56, 16  ;;  %v995_v1 = vshrl.u32 %v868_v56, 16  ;;  %v863_v2 = vld [vmem:[#allocation2 + $0x14] sm:$0x1] }
  0x56   : > { %v940_v6 = vor.u32 %v939_v53, %v936_v47  ;;  %v984_v62 = vrot.slane %v982_v58, 4  ;;  %v987_v14 = vrot.slane %v985_v38, 5  ;;  %v953_v16 = vshll.u32 %v863_v2, 16  ;;  %v871_v21 = vld [vmem:[#allocation2 + $0x34] sm:$0xf] }
  0x57   : > { %v950_v61 = vor.u32 %v949_v60, %v945_v59  ;;  %v872_v26 = vld [vmem:[#allocation2 + $0x38] sm:$0x1]  ;;  %v1015_v27 = vshll.u32 %v871_v21, 16  ;;  %v1019_v28 = vshrl.u32 %v871_v21, 16  ;;  %v993_v46 = vrot.slane %v991_v63, 5 }
  0x58   : > { %v941_v39 = vrot.slane %v940_v6, 4  ;;  %v988_v44 = vor.u32 %v987_v14, %v984_v62  ;;  %v1025_v33 = vshll.u32 %v872_v26, 16  ;;  %v869_v52 = vld [vmem:[#allocation2 + $0x2c] sm:$0x1]  ;;  %v955_v54 = vrot.slane %v953_v16, 5 }
  0x59   : > { %v5120_v55 = vrot.slane %v1015_v27, 5  ;;  %v1021_v56 = vrot.slane %v1019_v28, 4  ;;  %v997_v47 = vrot.slane %v995_v1, 4  ;;  %v876_v53 = vld [vmem:[#allocation2 + $0x48] sm:$0xf]  ;;  %v951_v60 = vrot.slane %v950_v61, 4 }
  0x5a   : > { %v946_v58 = vsel %vm4751_vm3, %v941_v39, %v945_v59  ;;  %v989_v38 = vrot.slane %v988_v44, 4  ;;  %v1001_v2 = vshll.u32 %v869_v52, 16  ;;  %v877_v21 = vld [vmem:[#allocation2 + $0x4c] sm:$0xf]  ;;  %v1027_v63 = vrot.slane %v1025_v33, 5 }
  0x5b   : > { %1297 = vrot.lane.b32.xlu1 %v946_v58, %s4626_s8  ;;  %v1022_v41 = vor.u32 %v1021_v56, %v5120_v55  ;;  %v998_v6 = vor.u32 %v997_v47, %v993_v46  ;;  %v1054_v62 = vshrl.u32 %v876_v53, 16  ;;  %691 = vst [vmem:[#allocation2 + $0x18] sm:$0xf] %v690_v8  ;;  %v1057_v14 = vshll.u32 %v876_v53, 16 }
  0x5c   : > { %v994_v59 = vsel %vm4751_vm3, %v989_v38, %v993_v46  ;;  %v5133_v1 = vrot.slane %v1001_v2, 5  ;;  %v1063_v16 = vshll.u32 %v877_v21, 16  ;;  %692 = vst.msk [vmem:[#allocation2 + $0x1c] sm:$0xf] %vm265_vm0, %v5003_v22  ;;  %v1067_v28 = vshrl.u32 %v877_v21, 16  ;;  %v220_v46 = vld [vmem:[%s4737_s5 + $0xb8] sm:$0xff] }
  0x5d   : > { %1305 = vrot.lane.b32.xlu0 %v994_v59, %s4626_s8  ;;  %v1023_v61 = vrot.slane %v1022_v41, 4  ;;  %v5138_v26 = vrot.slane %v998_v6, 4  ;;  %v1056_v27 = vrot.slane %v1054_v62, 4  ;;  %712 = vst [vmem:[#allocation2 + $0x3c] sm:$0xf] %v711_v0  ;;  %v956_v50 = vsel %vm4751_vm3, %v951_v60, %v955_v54 }
  0x5e   : > { %v1059_v8 = vrot.slane %v1057_v14, 5  ;;  %v5149_v22 = vrot.slane %v1063_v16, 5  ;;  %713 = vst.msk [vmem:[#allocation2 + $0x40] sm:$0xf] %vm265_vm0, %v5059_v19  ;;  %v5155_v39 = vrot.slane %v484_v36, 7  ;;  %v1069_v24 = vrot.slane %v1067_v28, 4 }
  0x5f   : > { %v1028_v44 = vsel %vm4751_vm3, %v1023_v61, %v1027_v63  ;;  %727 = vst.msk [vmem:[#allocation2 + $0x58] sm:$0xf] %vm265_vm0, %v5078_v30  ;;  %v487_v0 = vshll.u32 %v5074_v57, 16  ;;  %v1004_v19 = vsel %vm4751_vm3, %v5138_v26, %v5133_v1  ;;  %v5171_v36 = vrot.slane %v510_v7, 7 }
  0x60   : > { %v1060_v33 = vor.u32 %v1059_v8, %v1056_v27  ;;  %730 = vst [vmem:[#allocation2 + $0x5c] sm:$0x1] %v5070_v9  ;;  %v5175_v30 = vrot.slane %v518_v32, 7  ;;  %v1070_v57 = vor.u32 %v1069_v24, %v5149_v22  ;;  %v521_v52 = vshll.u32 %v5055_v3, 16  ;;  %v714_v24 = vld [vmem:[#allocation2 + $0x44] sm:$0x1] }
  0x61   : > { %695 = vst [vmem:[#allocation2 + $0x20] sm:$0x1] %v5082_v31  ;;  %v489_v42 = vor.u32 %v487_v0, %v5155_v39  ;;  %v440_v54 = vrot.slane %v4972_v13, 4  ;;  %v732_v7 = vsel %vm4919_vm9, %v5115_v35, %v5145_v49  ;;  %v516_v31 = vrot.slane %v5171_v36, 4 }
  0x62   : > { %v5182_v56 = vrot.slane %v1060_v33, 4  ;;  %v864_v9 = vld [vmem:[#allocation2 + $0x18] sm:$0xf]  ;;  %723 = vst [vmem:[#allocation2 + $0x50] sm:$0x1] %v5090_v40  ;;  %v5191_v32 = vadd.f32 %v4749_v11, %v220_v46  ;;  %v5194_v58 = vrot.slane %v1070_v57, 4  ;;  %v523_v21 = vor.u32 %v521_v52, %v5175_v30 }
  0x63   : > { %1299 = vrot.lane.b32.xlu1 %v956_v50, %s4626_s8  ;;  %v865_v3 = vld [vmem:[#allocation2 + $0x1c] sm:$0xf]  ;;  %v958_v47 = vshrl.u32 %v864_v9, 16  ;;  %v961_v53 = vshll.u32 %v864_v9, 16  ;;  %v490_v40 = vsel %vm4824_vm7, %v482_v15, %v489_v42  ;;  %740 = vst [vmem:[#allocation2 + $0x6c] sm:$0xf] %v739_v51  ;;  %v715_v20 = vsel %vm4957_vm10, %v440_v54, %v714_v24 }
  0x64   : > { %v1066_v35 = vsel %vm4751_vm3, %v5182_v56, %v5149_v22  ;;  %v967_v38 = vshll.u32 %v865_v3, 16  ;;  %v971_v60 = vshrl.u32 %v865_v3, 16  ;;  %v873_v2 = vld [vmem:[#allocation2 + $0x3c] sm:$0xf]  ;;  %v217_v42 = vld [vmem:[%s4737_s5 + $0xa0] sm:$0xff]  ;;  %v525_v18 = vrot.slane %v5175_v30, 4 }
  0x65   : > { %1311 = vrot.lane.b32.xlu0 %v1028_v44, %s4626_s8  ;;  %v960_v41 = vrot.slane %v958_v47, 4  ;;  %v963_v63 = vrot.slane %v961_v53, 5  ;;  %v874_v6 = vld [vmem:[#allocation2 + $0x40] sm:$0xf]  ;;  %v1030_v62 = vshrl.u32 %v873_v2, 16  ;;  %v1033_v59 = vshll.u32 %v873_v2, 16 }
  0x66   : > { %v969_v1 = vrot.slane %v967_v38, 5  ;;  %v973_v14 = vrot.slane %v971_v60, 4  ;;  %v1039_v16 = vshll.u32 %v874_v6, 16  ;;  %v1043_v61 = vshrl.u32 %v874_v6, 16  ;;  %v880_v26 = vld [vmem:[#allocation2 + $0x58] sm:$0xf] }
  0x67   : > { %v964_v27 = vor.u32 %v963_v63, %v960_v41  ;;  %v1032_v28 = vrot.slane %v1030_v62, 4  ;;  %v1035_v49 = vrot.slane %v1033_v59, 5  ;;  %v881_v25 = vld [vmem:[#allocation2 + $0x5c] sm:$0x1]  ;;  %v1087_v29 = vshll.u32 %v880_v26, 16 }
  0x68   : > { %v5209_v51 = vrot.slane %v1039_v16, 5  ;;  %v1091_v50 = vshrl.u32 %v880_v26, 16  ;;  %v1097_v8 = vshll.u32 %v881_v25, 16  ;;  %v866_v22 = vld [vmem:[#allocation2 + $0x20] sm:$0x1]  ;;  %v974_v44 = vor.u32 %v973_v14, %v969_v1 }
  0x69   : > { %v965_v15 = vrot.slane %v964_v27, 4  ;;  %v1036_v0 = vor.u32 %v1035_v49, %v1032_v28  ;;  %v5211_v46 = vrot.slane %v1087_v29, 5  ;;  %v977_v33 = vshll.u32 %v866_v22, 16  ;;  %v878_v57 = vld [vmem:[#allocation2 + $0x50] sm:$0x1] }
  0x6a   : > { %v1093_v52 = vrot.slane %v1091_v50, 4  ;;  %v1099_v56 = vrot.slane %v1097_v8, 5  ;;  %v975_v9 = vrot.slane %v974_v44, 4  ;;  %v1073_v3 = vshll.u32 %v878_v57, 16  ;;  %741 = vst.msk [vmem:[#allocation2 + $0x70] sm:$0xf] %vm265_vm0, %v5106_v23 }
  0x6b   : > { %v749_v47 = vld [vmem:[#allocation2 + $0x80] sm:$0x1]  ;;  %1307 = vrot.lane.b32.xlu1 %v1004_v19, %s4626_s8  ;;  %v970_v53 = vsel %vm4751_vm3, %v965_v15, %v969_v1  ;;  %v1037_v38 = vrot.slane %v1036_v0, 4  ;;  %v979_v60 = vrot.slane %v977_v33, 5  ;;  %v885_v2 = vld [vmem:[#allocation2 + $0x6c] sm:$0xf]  ;;  %v524_v41 = vsel %vm4824_vm7, %v516_v31, %v523_v21 }
  0x6c   : > { %705 = vst [vmem:[#allocation2 + $0x30] sm:$0xf] %v704_v34  ;;  %1301 = vrot.lane.b32.xlu2 %v970_v53, %s4626_s8  ;;  %v1094_v23 = vor.u32 %v1093_v52, %v5211_v46  ;;  %v5228_v19 = vrot.slane %v1073_v3, 5  ;;  %v1126_v63 = vshrl.u32 %v885_v2, 16  ;;  %v1129_v6 = vshll.u32 %v885_v2, 16 }
  0x6d   : > { %733 = vst [vmem:[#allocation2 + $0x60] sm:$0xf] %v732_v7  ;;  %1317 = vrot.lane.b32.xlu0 %v1066_v35, %s4626_s8  ;;  %v1042_v62 = vsel %vm4751_vm3, %v1037_v38, %v5209_v51  ;;  %v742_v34 = vld [vmem:[#allocation2 + $0x74] sm:$0x1]  ;;  %v5241_v31 = vadd.f32 %v4749_v11, %v217_v42  ;;  %v980_v35 = vsel %vm4751_vm3, %v975_v9, %v979_v60  ;;  %v1045_v13 = vrot.slane %v1043_v61, 4 }
  0x6e   : > { %734 = vst.msk [vmem:[#allocation2 + $0x64] sm:$0xf] %vm265_vm0, %v490_v40  ;;  %v1095_v7 = vrot.slane %v1094_v23, 4  ;;  %v1128_v21 = vrot.slane %v1126_v63, 4  ;;  %v1131_v59 = vrot.slane %v1129_v6, 5  ;;  %v750_v30 = vsel %vm4957_vm10, %v525_v18, %v749_v47 }
  0x6f   : > { %748 = vst.msk [vmem:[#allocation2 + $0x7c] sm:$0xf] %vm265_vm0, %v524_v41  ;;  %v508_v40 = vrot.slane %v5043_v5, 4  ;;  %v5251_v54 = vpack.c.bf16 %v5191_v32, %v5191_v32  ;;  %v1076_v14 = vsel %vm4751_vm3, %v5194_v58, %v5228_v19  ;;  %v544_v26 = vshrl.u32 %v5118_v37, 16  ;;  %v1775_v45 = vld [vmem:[#allocation2 + $0x58] sm:$0xf] }
  0x70   : > { %716 = vst [vmem:[#allocation2 + $0x44] sm:$0x1] %v715_v20  ;;  %v1100_v1 = vsel %vm4751_vm3, %v1095_v7, %v1099_v56  ;;  %v1132_v16 = vor.u32 %v1131_v59, %v1128_v21  ;;  %v1046_v61 = vor.u32 %v1045_v13, %v5209_v51  ;;  %v547_v32 = vshll.u32 %v5118_v37, 16  ;;  %v218_v13 = vld [vmem:[%s4737_s5 + $0xa8] sm:$0xff] }
  0x71   : > { %751 = vst [vmem:[#allocation2 + $0x80] sm:$0x1] %v750_v30  ;;  %v886_v27 = vld [vmem:[#allocation2 + $0x70] sm:$0xf]  ;;  %v743_v5 = vsel %vm4957_vm10, %v508_v40, %v742_v34  ;;  %v552_v28 = vshrl.u32 %v5251_v54, 16  ;;  %v555_v58 = vshll.u32 %v5251_v54, 16 }
  0x72   : > { %v1133_v49 = vrot.slane %v1132_v16, 4  ;;  %v1135_v25 = vshll.u32 %v886_v27, 16  ;;  %v1139_v29 = vshrl.u32 %v886_v27, 16  ;;  %v5267_v24 = vrot.slane %v1046_v61, 4  ;;  %744 = vst [vmem:[#allocation2 + $0x74] sm:$0x1] %v743_v5 }
  0x73   : > { %v870_v50 = vld [vmem:[#allocation2 + $0x30] sm:$0xf]  ;;  %1313 = vrot.lane.b32.xlu1 %v1042_v62, %s4626_s8  ;;  %v546_v51 = vrot.slane %v544_v26, 7  ;;  %v5274_v3 = vrot.slane %v552_v28, 7  ;;  %v221_v26 = vld [vmem:[%s4737_s5 + $0xc0] sm:$0xff]  ;;  %v222_v28 = vld [vmem:[%s4737_s5 + $0xc8] sm:$0xff] }
  0x74   : > { %v1006_v8 = vshrl.u32 %v870_v50, 16  ;;  %v1009_v22 = vshll.u32 %v870_v50, 16  ;;  %v882_v44 = vld [vmem:[#allocation2 + $0x60] sm:$0xf]  ;;  %1303 = vrot.lane.b32.xlu2 %v980_v35, %s4626_s8  ;;  %v1137_v15 = vrot.slane %v1135_v25, 5  ;;  %v1141_v57 = vrot.slane %v1139_v29, 4 }
  0x75   : > { %v5270_v37 = vld [vmem:[#allocation2 + $0x64] sm:$0xf]  ;;  %v1102_v0 = vshrl.u32 %v882_v44, 16  ;;  %v1105_v33 = vshll.u32 %v882_v44, 16  ;;  %1323 = vrot.lane.b32.xlu0 %v1100_v1, %s4626_s8  ;;  %v549_v59 = vor.u32 %v547_v32, %v546_v51  ;;  %v759_v30 = vld [vmem:[#allocation2 + $0x90] sm:$0xf]  ;;  %v557_v32 = vor.u32 %v555_v58, %v5274_v3 }
  0x76   : > { %v1008_v42 = vrot.slane %v1006_v8, 4  ;;  %v1011_v52 = vrot.slane %v1009_v22, 5  ;;  %v1111_v56 = vshll.u32 %v5270_v37, 16  ;;  %v889_v9 = vld [vmem:[#allocation2 + $0x7c] sm:$0xf]  ;;  %v1115_v38 = vshrl.u32 %v5270_v37, 16 }
  0x77   : > { %v1104_v47 = vrot.slane %v1102_v0, 4  ;;  %v1107_v53 = vrot.slane %v1105_v33, 5  ;;  %v1159_v60 = vshll.u32 %v889_v9, 16  ;;  %v875_v2 = vld [vmem:[#allocation2 + $0x44] sm:$0x1]  ;;  %v1138_v41 = vsel %vm4751_vm3, %v1133_v49, %v1137_v15 }
  0x78   : > { %v1012_v23 = vor.u32 %v1011_v52, %v1008_v42  ;;  %v890_v19 = vld [vmem:[#allocation2 + $0x80] sm:$0x1]  ;;  %v1163_v63 = vshrl.u32 %v889_v9, 16  ;;  %v1049_v6 = vshll.u32 %v875_v2, 16  ;;  %v1142_v34 = vor.u32 %v1141_v57, %v1137_v15  ;;  %v724_v58 = vld [vmem:[#allocation2 + $0x54] sm:$0xf] }
  0x79   : > { %v1108_v62 = vor.u32 %v1107_v53, %v1104_v47  ;;  %v5279_v18 = vrot.slane %v1159_v60, 5  ;;  %v1169_v20 = vshll.u32 %v890_v19, 16  ;;  %v5282_v54 = vrot.slane %v1111_v56, 5  ;;  %v735_v15 = vld [vmem:[#allocation2 + $0x68] sm:$0x1] }
  0x7a   : > { %v1013_v7 = vrot.slane %v1012_v23, 4  ;;  %v1165_v35 = vrot.slane %v1163_v63, 4  ;;  %v1051_v21 = vrot.slane %v1049_v6, 5  ;;  %v550_v16 = vrot.slane %v546_v51, 4  ;;  %v887_v33 = vld [vmem:[#allocation2 + $0x74] sm:$0x1] }
  0x7b   : > { %v1109_v40 = vrot.slane %v1108_v62, 4  ;;  %v1171_v1 = vrot.slane %v1169_v20, 5  ;;  %1319 = vrot.lane.b32.xlu1 %v1076_v14, %s4626_s8  ;;  %v5290_v5 = vrot.slane %v1142_v34, 4  ;;  %v760_v14 = vsel %vm4919_vm9, %v549_v59, %v759_v30  ;;  %v752_v47 = vld [vmem:[#allocation2 + $0x84] sm:$0xf] }
  0x7c   : > { %v1018_v27 = vsel %vm4751_vm3, %v1013_v7, %v5120_v55  ;;  %v1166_v61 = vor.u32 %v1165_v35, %v5279_v18  ;;  %v1052_v49 = vsel %vm4751_vm3, %v5267_v24, %v1051_v21  ;;  %v462_v25 = vshll.u32 %v4913_v43, 16  ;;  %761 = vst [vmem:[#allocation2 + $0x90] sm:$0xf] %v760_v14  ;;  %v763_v59 = vld [vmem:[#allocation2 + $0x98] sm:$0x1] }
  0x7d   : > { %1309 = vrot.lane.b32.xlu2 %v1018_v27, %s4626_s8  ;;  %v254_v55 = vadd.f32 %v4749_v11, %v218_v13  ;;  %1329 = vrot.lane.b32.xlu0 %v1138_v41, %s4626_s8  ;;  %v558_v50 = vsel %vm4824_vm7, %v550_v16, %v557_v32  ;;  %v341_v8 = vpack.c.bf16 %v5241_v31, %v5241_v31  ;;  %v491_v51 = vrot.slane %v5155_v39, 4  ;;  %v225_v16 = vld [vmem:[%s4737_s5 + $0xe0] sm:$0xff]  ;;  %v1781_v48 = vld [vmem:[#allocation2 + $0x7c] sm:$0xf] }
  0x7e   : > { %v1167_v29 = vrot.slane %v1166_v61, 4  ;;  %v257_v22 = vadd.f32 %v4749_v11, %v221_v26  ;;  %762 = vst.msk [vmem:[#allocation2 + $0x94] sm:$0xf] %vm265_vm0, %v558_v50  ;;  %v464_v44 = vor.u32 %v462_v25, %v4987_v17  ;;  %v258_v24 = vadd.f32 %v4749_v11, %v222_v28  ;;  %v770_v14 = vld [vmem:[#allocation2 + $0xa4] sm:$0x1] }
  0x7f   : > { %v342_v43 = vpack.c.bf16 %v254_v55, %v254_v55  ;;  %v1114_v0 = vsel %vm4751_vm3, %v1109_v40, %v5282_v54  ;;  %v527_v57 = vshrl.u32 %v341_v8, 16  ;;  %v530_v42 = vshll.u32 %v341_v8, 16  ;;  %v5352_v8 = vld [vmem:[%s6804_s1] ss:$0 sm:$0xff] }
  0x80   : > { %v5315_v31 = vpack.c.bf16 %v257_v22, %v257_v22  ;;  %v1145_v52 = vshll.u32 %v887_v33, 16  ;;  %v725_v56 = vsel %vm4919_vm9, %v464_v44, %v724_v58  ;;  %v346_v39 = vpack.c.bf16 %v258_v24, %v258_v24 }
  0x81   : > { %v535_v17 = vshrl.u32 %v342_v43, 16  ;;  %v538_v9 = vshll.u32 %v342_v43, 16  ;;  %726 = vst [vmem:[#allocation2 + $0x54] sm:$0xf] %v725_v56  ;;  %v529_v11 = vrot.slane %v527_v57, 7  ;;  %v736_v60 = vsel %vm4957_vm10, %v491_v51, %v735_v15 }
  0x82   : > { %v561_v53 = vshrl.u32 %v5315_v31, 16  ;;  %v1172_v2 = vsel %vm4751_vm3, %v1167_v29, %v1171_v1  ;;  %v1147_v41 = vrot.slane %v1145_v52, 5  ;;  %737 = vst [vmem:[#allocation2 + $0x68] sm:$0x1] %v736_v60  ;;  %v559_v19 = vrot.slane %v5274_v3, 4 }
  0x83   : > { %v5324_v23 = vrot.slane %v535_v17, 7  ;;  %1325 = vrot.lane.b32.xlu1 %v1114_v0, %s4626_s8  ;;  %v532_v63 = vor.u32 %v530_v42, %v529_v11  ;;  %v533_v6 = vrot.slane %v529_v11, 4  ;;  %v569_v20 = vshrl.u32 %v346_v39, 16  ;;  %v894_v34 = vld [vmem:[#allocation2 + $0x90] sm:$0xf] }
  0x84   : > { %v5328_v62 = vrot.slane %v561_v53, 7  ;;  %v572_v35 = vshll.u32 %v346_v39, 16  ;;  %v1117_v21 = vrot.slane %v1115_v38, 4  ;;  %v1198_v30 = vshrl.u32 %v894_v34, 16  ;;  %v226_v38 = vld [vmem:[%s4737_s5 + $0xe8] sm:$0xff] }
  0x85   : > { %1315 = vrot.lane.b32.xlu2 %v1052_v49, %s4626_s8  ;;  %v540_v7 = vor.u32 %v538_v9, %v5324_v23  ;;  %1335 = vrot.lane.b32.xlu0 %v1172_v2, %s4626_s8  ;;  %v895_v3 = vld [vmem:[#allocation2 + $0x94] sm:$0xf]  ;;  %v1201_v13 = vshll.u32 %v894_v34, 16  ;;  %v753_v40 = vsel %vm4919_vm9, %v532_v63, %v752_v47  ;;  %v571_v37 = vrot.slane %v569_v20, 7 }
  0x86   : > { %v567_v1 = vrot.slane %v5328_v62, 4  ;;  %v1207_v26 = vshll.u32 %v895_v3, 16  ;;  %v1211_v27 = vshrl.u32 %v895_v3, 16  ;;  %754 = vst [vmem:[#allocation2 + $0x84] sm:$0xf] %v753_v40  ;;  %v1148_v32 = vsel %vm4751_vm3, %v5290_v5, %v1147_v41 }
  0x87   : > { %v541_v61 = vsel %vm4824_vm7, %v533_v6, %v540_v7  ;;  %v1200_v28 = vrot.slane %v1198_v30, 4  ;;  %v1203_v49 = vrot.slane %v1201_v13, 5  ;;  %v764_v25 = vsel %vm4957_vm10, %v559_v19, %v763_v59  ;;  %v223_v6 = vld [vmem:[%s4737_s5 + $0xd0] sm:$0xff] }
  0x88   : > { %755 = vst.msk [vmem:[#allocation2 + $0x88] sm:$0xf] %vm265_vm0, %v541_v61  ;;  %v879_v55 = vld [vmem:[#allocation2 + $0x54] sm:$0xf]  ;;  %v574_v29 = vor.u32 %v572_v35, %v571_v37  ;;  %v576_v50 = vrot.slane %v571_v37, 4  ;;  %v1118_v58 = vor.u32 %v1117_v21, %v5282_v54  ;;  %v261_v5 = vadd.f32 %v5352_v8, %v225_v16 }
  0x89   : > { %765 = vst [vmem:[#allocation2 + $0x98] sm:$0x1] %v764_v25  ;;  %v1204_v22 = vor.u32 %v1203_v49, %v1200_v28  ;;  %v5355_v44 = vrot.slane %v1207_v26, 5  ;;  %v1078_v43 = vshrl.u32 %v879_v55, 16  ;;  %v1081_v24 = vshll.u32 %v879_v55, 16 }
  0x8a   : > { %v884_v51 = vld [vmem:[#allocation2 + $0x68] sm:$0x1]  ;;  %v575_v15 = vsel %vm4824_vm7, %v567_v1, %v574_v29  ;;  %v771_v54 = vsel %vm4957_vm10, %v576_v50, %v770_v14  ;;  %v1213_v0 = vrot.slane %v1211_v27, 4  ;;  %v262_v33 = vadd.f32 %v5352_v8, %v226_v38  ;;  %v780_v26 = vld [vmem:[#allocation2 + $0xb4] sm:$0xf]  ;;  %v224_v29 = vld [vmem:[%s4737_s5 + $0xd8] sm:$0xff] }
  0x8b   : > { %1331 = vrot.lane.b32.xlu1 %v1148_v32, %s4626_s8  ;;  %v1205_v57 = vrot.slane %v1204_v22, 4  ;;  %v1080_v42 = vrot.slane %v1078_v43, 4  ;;  %v1083_v52 = vrot.slane %v1081_v24, 5  ;;  %769 = vst.msk [vmem:[#allocation2 + $0xa0] sm:$0xf] %vm265_vm0, %v575_v15  ;;  %v1121_v56 = vshll.u32 %v884_v51, 16 }
  0x8c   : > { %772 = vst [vmem:[#allocation2 + $0xa4] sm:$0x1] %v771_v54  ;;  %v349_v17 = vpack.c.bf16 %v261_v5, %v261_v5  ;;  %v5367_v39 = vrot.slane %v1118_v58, 4  ;;  %v350_v53 = vpack.c.bf16 %v262_v33, %v262_v33  ;;  %v1214_v19 = vor.u32 %v1213_v0, %v5355_v44  ;;  %v745_v28 = vld [vmem:[#allocation2 + $0x78] sm:$0xf] }
  0x8d   : > { %v1210_v9 = vsel %vm4751_vm3, %v1205_v57, %v5355_v44  ;;  %v1084_v11 = vor.u32 %v1083_v52, %v1080_v42  ;;  %v891_v47 = vld [vmem:[#allocation2 + $0x84] sm:$0xf]  ;;  %v513_v35 = vshll.u32 %v5046_v10, 16  ;;  %v1123_v3 = vrot.slane %v1121_v56, 5  ;;  %v756_v56 = vld [vmem:[#allocation2 + $0x8c] sm:$0x1] }
  0x8e   : > { %1341 = vrot.lane.b32.xlu0 %v1210_v9, %s4626_s8  ;;  %v1174_v2 = vshrl.u32 %v891_v47, 16  ;;  %v1177_v41 = vshll.u32 %v891_v47, 16  ;;  %v595_v63 = vshrl.u32 %v349_v17, 16  ;;  %v598_v7 = vshll.u32 %v349_v17, 16 }
  0x8f   : > { %v5370_v60 = vld [vmem:[#allocation2 + $0x88] sm:$0xf]  ;;  %v1085_v20 = vrot.slane %v1084_v11, 4  ;;  %v603_v1 = vshrl.u32 %v350_v53, 16  ;;  %v606_v16 = vshll.u32 %v350_v53, 16  ;;  %v259_v27 = vadd.f32 %v5352_v8, %v223_v6 }
  0x90   : > { %v1183_v34 = vshll.u32 %v5370_v60, 16  ;;  %v1176_v21 = vrot.slane %v1174_v2, 4  ;;  %v1179_v59 = vrot.slane %v1177_v41, 5  ;;  %v597_v30 = vrot.slane %v595_v63, 7  ;;  %v896_v40 = vld [vmem:[#allocation2 + $0x98] sm:$0x1] }
  0x91   : > { %v1090_v13 = vsel %vm4751_vm3, %v1085_v20, %v5211_v46  ;;  %v605_v46 = vrot.slane %v603_v1, 7  ;;  %v515_v55 = vor.u32 %v513_v35, %v5171_v36  ;;  %v1217_v5 = vshll.u32 %v896_v40, 16  ;;  %v784_v63 = vld [vmem:[#allocation2 + $0xbc] sm:$0x1]  ;;  %v773_v6 = vld [vmem:[#allocation2 + $0xa8] sm:$0xf] }
  0x92   : > { %1321 = vrot.lane.b32.xlu2 %v1090_v13, %s4626_s8  ;;  %v1180_v61 = vor.u32 %v1179_v59, %v1176_v21  ;;  %v5381_v37 = vrot.slane %v1183_v34, 5  ;;  %v898_v10 = vld [vmem:[#allocation2 + $0xa0] sm:$0xf]  ;;  %v600_v38 = vor.u32 %v598_v7, %v597_v30  ;;  %v601_v32 = vrot.slane %v597_v30, 4 }
  0x93   : > { %v899_v49 = vld [vmem:[#allocation2 + $0xa4] sm:$0x1]  ;;  %v1231_v14 = vshll.u32 %v898_v10, 16  ;;  %v1235_v25 = vshrl.u32 %v898_v10, 16  ;;  %v608_v24 = vor.u32 %v606_v16, %v605_v46  ;;  %v746_v51 = vsel %vm4919_vm9, %v515_v55, %v745_v28 }
  0x94   : > { %v1181_v50 = vrot.slane %v1180_v61, 4  ;;  %v1241_v58 = vshll.u32 %v899_v49, 16  ;;  %v781_v22 = vsel %vm4919_vm9, %v600_v38, %v780_v26  ;;  %v1215_v36 = vrot.slane %v1214_v19, 4  ;;  %747 = vst [vmem:[#allocation2 + $0x78] sm:$0xf] %v746_v51 }
  0x95   : > { %v5387_v44 = vrot.slane %v1231_v14, 5  ;;  %v1237_v43 = vrot.slane %v1235_v25, 4  ;;  %782 = vst [vmem:[#allocation2 + $0xb4] sm:$0xf] %v781_v22  ;;  %v260_v54 = vadd.f32 %v5352_v8, %v224_v29  ;;  %v347_v0 = vpack.c.bf16 %v259_v27, %v259_v27  ;;  %v5421_v14 = vld [vmem:[#allocation2 + $0x4] sm:$0xf] }
  0x96   : > { %v1186_v15 = vsel %vm4751_vm3, %v1181_v50, %v5381_v37  ;;  %v1243_v57 = vrot.slane %v1241_v58, 5  ;;  %v1124_v42 = vsel %vm4751_vm3, %v5367_v39, %v1123_v3  ;;  %v609_v52 = vsel %vm4824_vm7, %v601_v32, %v608_v24  ;;  %v1424_v22 = vld [vmem:[#allocation2 + $0x8] sm:$0x1] }
  0x97   : > { %1337 = vrot.lane.b32.xlu1 %v1186_v15, %s4626_s8  ;;  %v1238_v33 = vor.u32 %v1237_v43, %v5387_v44  ;;  %v1219_v17 = vrot.slane %v1217_v5, 5  ;;  %783 = vst.msk [vmem:[#allocation2 + $0xb8] sm:$0xf] %vm265_vm0, %v609_v52  ;;  %v348_v9 = vpack.c.bf16 %v260_v54, %v260_v54  ;;  %v578_v11 = vshrl.u32 %v347_v0, 16 }
  0x98   : > { %v581_v8 = vshll.u32 %v347_v0, 16  ;;  %v542_v53 = vrot.slane %v5324_v23, 4  ;;  %v610_v34 = vrot.slane %v605_v46, 4  ;;  %v1187_v7 = vshrl.u32 %v5370_v60, 16  ;;  %v766_v0 = vld [vmem:[#allocation2 + $0x9c] sm:$0xf] }
  0x99   : > { %v1239_v47 = vrot.slane %v1238_v33, 4  ;;  %v580_v2 = vrot.slane %v578_v11, 7  ;;  %v586_v41 = vshrl.u32 %v348_v9, 16  ;;  %v589_v19 = vshll.u32 %v348_v9, 16  ;;  %v777_v9 = vld [vmem:[#allocation2 + $0xb0] sm:$0x1] }
  0x9a   : > { %1327 = vrot.lane.b32.xlu2 %v1124_v42, %s4626_s8  ;;  %v757_v20 = vsel %vm4957_vm10, %v542_v53, %v756_v56  ;;  %v1220_v23 = vsel %vm4751_vm3, %v1215_v36, %v1219_v17  ;;  %v785_v1 = vsel %vm4957_vm10, %v610_v34, %v784_v63  ;;  %v1189_v25 = vrot.slane %v1187_v7, 4 }
  0x9b   : > { %v1244_v39 = vsel %vm4751_vm3, %v1239_v47, %v1243_v57  ;;  %v583_v21 = vor.u32 %v581_v8, %v580_v2  ;;  %v5413_v59 = vrot.slane %v586_v41, 7  ;;  %758 = vst [vmem:[#allocation2 + $0x8c] sm:$0x1] %v757_v20  ;;  %v888_v13 = vld [vmem:[#allocation2 + $0x78] sm:$0xf]  ;;  %v584_v40 = vrot.slane %v580_v2, 4 }
  0x9c   : > { %1347 = vrot.lane.b32.xlu0 %v1244_v39, %s4626_s8  ;;  %v903_v35 = vld [vmem:[#allocation2 + $0xb4] sm:$0xf]  ;;  %v1150_v16 = vshrl.u32 %v888_v13, 16  ;;  %v1153_v26 = vshll.u32 %v888_v13, 16  ;;  %786 = vst [vmem:[#allocation2 + $0xbc] sm:$0x1] %v785_v1  ;;  %v1190_v15 = vor.u32 %v1189_v25, %v5381_v37 }
  0x9d   : > { %v1270_v3 = vshrl.u32 %v903_v35, 16  ;;  %v1273_v30 = vshll.u32 %v903_v35, 16  ;;  %v591_v60 = vor.u32 %v589_v19, %v5413_v59  ;;  %v774_v27 = vsel %vm4919_vm9, %v583_v21, %v773_v6  ;;  %v794_v20 = vld [vmem:[#allocation2] sm:$0xf]  ;;  %v798_v25 = vld [vmem:[#allocation2 + $0x18] sm:$0xf] }
  0x9e   : > { %v904_v61 = vld [vmem:[#allocation2 + $0xb8] sm:$0xf]  ;;  %775 = vst [vmem:[#allocation2 + $0xa8] sm:$0xf] %v774_v27  ;;  %v1152_v28 = vrot.slane %v1150_v16, 4  ;;  %v1155_v49 = vrot.slane %v1153_v26, 5 }
  0x9f   : > { %1343 = vrot.lane.b32.xlu1 %v1220_v23, %s4626_s8  ;;  %v1272_v10 = vrot.slane %v1270_v3, 4  ;;  %v1275_v38 = vrot.slane %v1273_v30, 5  ;;  %v1279_v32 = vshll.u32 %v904_v61, 16  ;;  %v592_v55 = vsel %vm4824_vm7, %v584_v40, %v591_v60  ;;  %v1428_v23 = vld [vmem:[#allocation2 + $0x18] sm:$0xe]  ;;  %v1294_v3 = vpop.permute.xlu0 %1293 }
  0xa0   : > { %v1156_v50 = vor.u32 %v1155_v49, %v1152_v28  ;;  %776 = vst.msk [vmem:[#allocation2 + $0xac] sm:$0xf] %vm265_vm0, %v592_v55  ;;  %v564_v58 = vshll.u32 %v5315_v31, 16  ;;  %v1523_v43 = vrot.slane %v5421_v14, 5  ;;  %v1283_v57 = vshrl.u32 %v904_v61, 16 }
  0xa1   : > { %v1276_v46 = vor.u32 %v1275_v38, %v1272_v10  ;;  %v5425_v29 = vrot.slane %v1279_v32, 5  ;;  %v1526_v52 = vrot.slane %v1424_v22, 5  ;;  %v1191_v8 = vrot.slane %v1190_v15, 4  ;;  %826 = vst.msk [vmem:[#allocation3] sm:$0xf] %vm265_vm0, %v794_v20 }
  0xa2   : > { %v893_v24 = vld [vmem:[#allocation2 + $0x8c] sm:$0x1]  ;;  %v1157_v51 = vrot.slane %v1156_v50, 4  ;;  %v566_v54 = vor.u32 %v564_v58, %v5328_v62  ;;  %v1525_v56 = vrot.slane %v1523_v43, 4  ;;  %v1285_v19 = vrot.slane %v1283_v57, 4 }
  0xa3   : > { %v1277_v5 = vrot.slane %v1276_v46, 4  ;;  %v1193_v36 = vshll.u32 %v893_v24, 16  ;;  %v905_v39 = vld [vmem:[#allocation2 + $0xbc] sm:$0x1]  ;;  %1390 = vst.msk [vmem:[#allocation3] sm:$0xf] %vm1389_vm14, %v1294_v3 }
  0xa4   : > { %v1162_v31 = vsel %vm4751_vm3, %v1157_v51, %v5279_v18  ;;  %v767_v17 = vsel %vm4919_vm9, %v566_v54, %v766_v0  ;;  %v593_v18 = vrot.slane %v5413_v59, 4  ;;  %v1527_v7 = vsel %vm5444_vm13, %v1525_v56, %v1526_v52  ;;  %v5455_v59 = vld [vmem:[#allocation2 + $0x1c] sm:$0xf]  ;;  %v5466_v38 = vld [vmem:[#allocation2 + $0x28] sm:$0xf] }
  0xa5   : > { %v1282_v33 = vsel %vm4751_vm3, %v1277_v5, %v5425_v29  ;;  %v900_v42 = vld [vmem:[#allocation2 + $0xa8] sm:$0xf]  ;;  %1333 = vrot.lane.b32.xlu2 %v1162_v31, %s4626_s8  ;;  %v1195_v47 = vrot.slane %v1193_v36, 5  ;;  %768 = vst [vmem:[#allocation2 + $0x9c] sm:$0xf] %v767_v17  ;;  %v1286_v13 = vor.u32 %v1285_v19, %v5425_v29  ;;  %v1289_v40 = vshll.u32 %v905_v39, 16 }
  0xa6   : > { %1353 = vrot.lane.b32.xlu0 %v1282_v33, %s4626_s8  ;;  %v1246_v37 = vshrl.u32 %v900_v42, 16  ;;  %v1249_v62 = vshll.u32 %v900_v42, 16  ;;  %v778_v6 = vsel %vm4957_vm10, %v593_v18, %v777_v9  ;;  %v4341_v26 = vrot.slane %v1428_v23, 9  ;;  %v795_v49 = vld [vmem:[#allocation2 + $0x4] sm:$0xf] }
  0xa7   : > { %v901_v53 = vld [vmem:[#allocation2 + $0xac] sm:$0xf]  ;;  %779 = vst [vmem:[#allocation2 + $0xb0] sm:$0x1] %v778_v6  ;;  %v1196_v21 = vsel %vm4751_vm3, %v1191_v8, %v1195_v47  ;;  %v1537_v60 = vrot.slane %v5455_v59, 5  ;;  %v1287_v32 = vrot.slane %v1286_v13, 4 }
  0xa8   : > { %v1248_v2 = vrot.slane %v1246_v37, 4  ;;  %v1251_v41 = vrot.slane %v1249_v62, 5  ;;  %v1255_v63 = vshll.u32 %v901_v53, 16  ;;  %v1259_v1 = vshrl.u32 %v901_v53, 16  ;;  %827 = vst.msk [vmem:[#allocation3 + $0x4] sm:$0xf] %vm265_vm0, %v795_v49 }
  0xa9   : > { %v1291_v28 = vrot.slane %v1289_v40, 5  ;;  %v1538_v50 = vsel %vm5444_vm13, %v4341_v26, %v1537_v60  ;;  %v1544_v58 = vrot.slane %v5466_v38, 5  ;;  %830 = vst.msk [vmem:[#allocation3 + $0x10] sm:$0xf] %vm265_vm0, %v798_v25  ;;  %v1433_v24 = vld [vmem:[#allocation2 + $0x2c] sm:$0x1] }
  0xaa   : > { %v1252_v34 = vor.u32 %v1251_v41, %v1248_v2  ;;  %v1257_v35 = vrot.slane %v1255_v63, 5  ;;  %v1261_v29 = vrot.slane %v1259_v1, 4  ;;  %v1425_v15 = vld [vmem:[#allocation2 + $0xc] sm:$0xe]  ;;  %v5475_v36 = vld [vmem:[#allocation2 + $0x10] sm:$0xf] }
  0xab   : > { %v1292_v51 = vsel %vm4751_vm3, %v1287_v32, %v1291_v28  ;;  %v1546_v57 = vrot.slane %v1544_v58, 4  ;;  %v1547_v31 = vrot.slane %v1433_v24, 5  ;;  %v4340_v37 = vrot.slane %v1425_v15, 9  ;;  %v796_v56 = vld [vmem:[#allocation2 + $0xc] sm:$0xf] }
  0xac   : > { %v1253_v30 = vrot.slane %v1252_v34, 4  ;;  %v897_v27 = vld [vmem:[#allocation2 + $0x9c] sm:$0xf]  ;;  %v1262_v0 = vor.u32 %v1261_v29, %v1257_v35  ;;  %v1530_v62 = vrot.slane %v5475_v36, 5  ;;  %v800_v17 = vld [vmem:[#allocation2 + $0x24] sm:$0xf] }
  0xad   : > { %1339 = vrot.lane.b32.xlu2 %v1196_v21, %s4626_s8  ;;  %v1222_v61 = vshrl.u32 %v897_v27, 16  ;;  %v1225_v10 = vshll.u32 %v897_v27, 16  ;;  %v799_v9 = vld [vmem:[#allocation2 + $0x1c] sm:$0xf]  ;;  %828 = vst.msk [vmem:[#allocation3 + $0x8] sm:$0xf] %vm265_vm0, %v796_v56  ;;  %v1548_v18 = vsel %vm5444_vm13, %v1546_v57, %v1547_v31 }
  0xae   : > { %1635 = vrot.lane.b32.xlu0 %v1527_v7, %s4627_s11  ;;  %v1258_v16 = vsel %vm4751_vm3, %v1253_v30, %v1257_v35  ;;  %v902_v5 = vld [vmem:[#allocation2 + $0xb0] sm:$0x1]  ;;  %v1263_v8 = vrot.slane %v1262_v0, 4  ;;  %832 = vst.msk [vmem:[#allocation3 + $0x18] sm:$0xf] %vm265_vm0, %v800_v17  ;;  %v1531_v2 = vsel %vm5444_vm13, %v4340_v37, %v1530_v62  ;;  %v1539_v20 = vrot.slane %v1537_v60, 4 }
  0xaf   : > { %1349 = vrot.lane.b32.xlu1 %v1258_v16, %s4626_s8  ;;  %v1224_v46 = vrot.slane %v1222_v61, 4  ;;  %v1227_v55 = vrot.slane %v1225_v10, 5  ;;  %v1265_v33 = vshll.u32 %v902_v5, 16  ;;  %v1438_v53 = vld [vmem:[#allocation2 + $0x40] sm:$0xf] }
  0xb0   : > { %831 = vst.msk [vmem:[#allocation3 + $0x14] sm:$0xf] %vm265_vm0, %v799_v9  ;;  %v1430_v41 = vld [vmem:[#allocation2 + $0x20] sm:$0x1]  ;;  %v1558_v39 = vrot.slane %v1438_v53, 5 }
  0xb1   : > { %v1228_v22 = vor.u32 %v1227_v55, %v1224_v46  ;;  %v1267_v47 = vrot.slane %v1265_v33, 5  ;;  %v1422_v6 = vld [vmem:[#allocation2] sm:$0xe]  ;;  %v1540_v34 = vrot.slane %v1430_v41, 5  ;;  %v5498_v7 = vld [vmem:[#allocation2 + $0x4c] sm:$0xf] }
  0xb2   : > { %v797_v23 = vld [vmem:[#allocation2 + $0x10] sm:$0xf]  ;;  %v803_v35 = vld [vmem:[#allocation2 + $0x34] sm:$0xf]  ;;  %v4339_v59 = vrot.slane %v1422_v6, 9  ;;  %v1565_v30 = vrot.slane %v5498_v7, 5 }
  0xb3   : > { %v1229_v54 = vrot.slane %v1228_v22, 4  ;;  %v1268_v19 = vsel %vm4751_vm3, %v1263_v8, %v1267_v47  ;;  %v802_v21 = vld [vmem:[#allocation2 + $0x30] sm:$0xf]  ;;  %829 = vst.msk [vmem:[#allocation3 + $0xc] sm:$0xf] %vm265_vm0, %v797_v23  ;;  %v1541_v40 = vsel %vm5444_vm13, %v1539_v20, %v1540_v34  ;;  %v1532_v46 = vrot.slane %v1530_v62, 4 }
  0xb4   : > { %835 = vst.msk [vmem:[#allocation3 + $0x24] sm:$0xf] %vm265_vm0, %v803_v35  ;;  %v1442_v13 = vld [vmem:[#allocation2 + $0x50] sm:$0x1]  ;;  %v1434_v1 = vld [vmem:[#allocation2 + $0x30] sm:$0xe]  ;;  %v1524_v26 = vsel %vm5444_vm13, %v4339_v59, %v1523_v43 }
  0xb5   : > { %v1234_v52 = vsel %vm4751_vm3, %v1229_v54, %v5387_v44  ;;  %v1437_v44 = vld [vmem:[#allocation2 + $0x3c] sm:$0xe]  ;;  %834 = vst.msk [vmem:[#allocation3 + $0x20] sm:$0xf] %vm265_vm0, %v802_v21  ;;  %v5509_v16 = vld [vmem:[#allocation2 + $0x34] sm:$0xf] }
  0xb6   : > { %1641 = vrot.lane.b32.xlu0 %v1538_v50, %s4627_s11  ;;  %1345 = vrot.lane.b32.xlu2 %v1234_v52, %s4626_s8  ;;  %v4344_v63 = vrot.slane %v1437_v44, 9  ;;  %v1567_v27 = vrot.slane %v1565_v30, 4  ;;  %v1568_v61 = vrot.slane %v1442_v13, 5  ;;  %v1427_v10 = vld [vmem:[#allocation2 + $0x14] sm:$0x1]  ;;  %v4343_v32 = vrot.slane %v1434_v1, 9 }
  0xb7   : > { %v1296_v42 = vpop.permute.xlu0 %1295  ;;  %1355 = vrot.lane.b32.xlu1 %v1292_v51, %s4626_s8  ;;  %v1551_v28 = vrot.slane %v5509_v16, 5  ;;  %v801_v49 = vld [vmem:[#allocation2 + $0x28] sm:$0xf]  ;;  %v805_v25 = vld [vmem:[#allocation2 + $0x40] sm:$0xf]  ;;  %v1533_v43 = vrot.slane %v1427_v10, 5 }
  0xb8   : > { %1391 = vst.msk [vmem:[#allocation3 + $0x4] sm:$0xf] %vm1389_vm14, %v1296_v42  ;;  %v1559_v3 = vsel %vm5444_vm13, %v4344_v63, %v1558_v39  ;;  %v806_v14 = vld [vmem:[#allocation2 + $0x48] sm:$0xf]  ;;  %v1569_v55 = vsel %vm5444_vm13, %v1567_v27, %v1568_v61  ;;  %v1446_v29 = vld [vmem:[#allocation2 + $0x60] sm:$0xe] }
  0xb9   : > { %833 = vst.msk [vmem:[#allocation3 + $0x1c] sm:$0xf] %vm265_vm0, %v801_v49  ;;  %v5526_v50 = vld [vmem:[#allocation2 + $0x64] sm:$0xf]  ;;  %v1552_v5 = vsel %vm5444_vm13, %v4343_v32, %v1551_v28  ;;  %v1534_v51 = vsel %vm5444_vm13, %v1532_v46, %v1533_v43  ;;  %v4347_v36 = vrot.slane %v1446_v29, 9  ;;  %v1560_v57 = vrot.slane %v1558_v39, 4 }
  0xba   : > { %838 = vst.msk [vmem:[#allocation3 + $0x30] sm:$0xf] %vm265_vm0, %v806_v14  ;;  %v1439_v22 = vld [vmem:[#allocation2 + $0x44] sm:$0x1]  ;;  %v1579_v54 = vrot.slane %v5526_v50, 5  ;;  %v1553_v35 = vrot.slane %v1551_v28, 4 }
  0xbb   : > { %837 = vst.msk [vmem:[#allocation3 + $0x2c] sm:$0xf] %vm265_vm0, %v805_v25  ;;  %v1431_v0 = vld [vmem:[#allocation2 + $0x24] sm:$0xe]  ;;  %v1561_v31 = vrot.slane %v1439_v22, 5 }
  0xbc   : > { %v5539_v42 = vld [vmem:[#allocation2 + $0x70] sm:$0xf]  ;;  %v804_v52 = vld [vmem:[#allocation2 + $0x3c] sm:$0xf]  ;;  %v809_v37 = vld [vmem:[#allocation2 + $0x58] sm:$0xf]  ;;  %v1580_v17 = vsel %vm5444_vm13, %v4347_v36, %v1579_v54 }
  0xbd   : > { %v808_v62 = vld [vmem:[#allocation2 + $0x54] sm:$0xf]  ;;  %v4342_v56 = vrot.slane %v1431_v0, 9  ;;  %836 = vst.msk [vmem:[#allocation3 + $0x28] sm:$0xf] %vm265_vm0, %v804_v52  ;;  %v1586_v9 = vrot.slane %v5539_v42, 5  ;;  %v1562_v47 = vsel %vm5444_vm13, %v1560_v57, %v1561_v31 }
  0xbe   : > { %1647 = vrot.lane.b32.xlu0 %v1548_v18, %s4627_s11  ;;  %1351 = vrot.lane.b32.xlu2 %v1268_v19, %s4626_s8  ;;  %841 = vst.msk [vmem:[#allocation3 + $0x3c] sm:$0xf] %vm265_vm0, %v809_v37  ;;  %v1451_v8 = vld [vmem:[#allocation2 + $0x74] sm:$0x1]  ;;  %v1443_v18 = vld [vmem:[#allocation2 + $0x54] sm:$0xe] }
  0xbf   : > { %1637 = vrot.lane.b32.xlu1 %v1531_v2, %s4627_s11  ;;  %840 = vst.msk [vmem:[#allocation3 + $0x38] sm:$0xf] %vm265_vm0, %v808_v62  ;;  %v5550_v44 = vld [vmem:[#allocation2 + $0x58] sm:$0xf]  ;;  %v1545_v2 = vsel %vm5444_vm13, %v4342_v56, %v1544_v58  ;;  %v1588_v19 = vrot.slane %v1586_v9, 4  ;;  %v1589_v63 = vrot.slane %v1451_v8, 5 }
  0xc0   : > { %v1436_v39 = vld [vmem:[#allocation2 + $0x38] sm:$0x1]  ;;  %v4346_v20 = vrot.slane %v1443_v18, 9  ;;  %v1572_v34 = vrot.slane %v5550_v44, 5  ;;  %v807_v38 = vld [vmem:[#allocation2 + $0x4c] sm:$0xf] }
  0xc1   : > { %v812_v58 = vld [vmem:[#allocation2 + $0x6c] sm:$0xf]  ;;  %v811_v23 = vld [vmem:[#allocation2 + $0x64] sm:$0xf]  ;;  %v1554_v21 = vrot.slane %v1436_v39, 5  ;;  %v1590_v59 = vsel %vm5444_vm13, %v1588_v19, %v1589_v63  ;;  %v1581_v28 = vrot.slane %v1579_v54, 4 }
  0xc2   : > { %839 = vst.msk [vmem:[#allocation3 + $0x34] sm:$0xf] %vm265_vm0, %v807_v38  ;;  %v5569_v13 = vld [vmem:[#allocation2 + $0x88] sm:$0xf]  ;;  %v5582_v14 = vld [vmem:[#allocation2 + $0x94] sm:$0xf] }
  0xc3   : > { %844 = vst.msk [vmem:[#allocation3 + $0x48] sm:$0xf] %vm265_vm0, %v812_v58  ;;  %v1448_v1 = vld [vmem:[#allocation2 + $0x68] sm:$0x1]  ;;  %v1600_v61 = vrot.slane %v5569_v13, 5  ;;  %v1607_v50 = vrot.slane %v5582_v14, 5 }
  0xc4   : > { %843 = vst.msk [vmem:[#allocation3 + $0x44] sm:$0xf] %vm265_vm0, %v811_v23  ;;  %v1440_v10 = vld [vmem:[#allocation2 + $0x48] sm:$0xe]  ;;  %v1582_v49 = vrot.slane %v1448_v1, 5  ;;  %v1574_v62 = vrot.slane %v1572_v34, 4 }
  0xc5   : > { %v810_v25 = vld [vmem:[#allocation2 + $0x60] sm:$0xf]  ;;  %v815_v46 = vld [vmem:[#allocation2 + $0x7c] sm:$0xf]  ;;  %v814_v43 = vld [vmem:[#allocation2 + $0x78] sm:$0xf] }
  0xc6   : > { %1653 = vrot.lane.b32.xlu0 %v1559_v3, %s4627_s11  ;;  %v1302_v60 = vpop.permute.xlu2 %1301  ;;  %1633 = vrot.lane.b32.xlu2 %v1524_v26, %s4627_s11  ;;  %v1455_v3 = vld [vmem:[#allocation2 + $0x84] sm:$0xe]  ;;  %v1555_v26 = vsel %vm5444_vm13, %v1553_v35, %v1554_v21  ;;  %842 = vst.msk [vmem:[#allocation3 + $0x40] sm:$0xf] %vm265_vm0, %v810_v25  ;;  %v1583_v22 = vsel %vm5444_vm13, %v1581_v28, %v1582_v49  ;;  %v1609_v54 = vrot.slane %v1607_v50, 4 }
  0xc7   : > { %1394 = vst.msk [vmem:[#allocation3 + $0x10] sm:$0xf] %vm1389_vm14, %v1302_v60  ;;  %1643 = vrot.lane.b32.xlu1 %v1541_v40, %s4627_s11  ;;  %v1573_v40 = vsel %vm5444_vm13, %v4346_v20, %v1572_v34  ;;  %v4350_v27 = vrot.slane %v1455_v3, 9  ;;  %v813_v7 = vld [vmem:[#allocation2 + $0x70] sm:$0xf]  ;;  %v1602_v20 = vrot.slane %v1600_v61, 4 }
  0xc8   : > { %847 = vst.msk [vmem:[#allocation3 + $0x54] sm:$0xf] %vm265_vm0, %v815_v46  ;;  %v818_v37 = vld [vmem:[#allocation2 + $0x90] sm:$0xf]  ;;  %v5611_v18 = vld [vmem:[#allocation2 + $0xac] sm:$0xf] }
  0xc9   : > { %v1601_v29 = vsel %vm5444_vm13, %v4350_v27, %v1600_v61  ;;  %846 = vst.msk [vmem:[#allocation3 + $0x50] sm:$0xf] %vm265_vm0, %v814_v43  ;;  %v1621_v63 = vrot.slane %v5611_v18, 5  ;;  %v1449_v39 = vld [vmem:[#allocation2 + $0x6c] sm:$0xe] }
  0xca   : > { %845 = vst.msk [vmem:[#allocation3 + $0x4c] sm:$0xf] %vm265_vm0, %v813_v7  ;;  %v5624_v38 = vld [vmem:[#allocation2 + $0xb8] sm:$0xf]  ;;  %v816_v58 = vld [vmem:[#allocation2 + $0x84] sm:$0xf] }
  0xcb   : > { %850 = vst.msk [vmem:[#allocation3 + $0x60] sm:$0xf] %vm265_vm0, %v818_v37  ;;  %v821_v23 = vld [vmem:[#allocation2 + $0xa0] sm:$0xf]  ;;  %v820_v35 = vld [vmem:[#allocation2 + $0x9c] sm:$0xf] }
  0xcc   : > { %v4348_v21 = vrot.slane %v1449_v39, 9  ;;  %848 = vst.msk [vmem:[#allocation3 + $0x58] sm:$0xf] %vm265_vm0, %v816_v58  ;;  %v1628_v3 = vrot.slane %v5624_v38, 5  ;;  %v819_v42 = vld [vmem:[#allocation2 + $0x94] sm:$0xf] }
  0xcd   : > { %v1298_v24 = vpop.permute.xlu1 %1297  ;;  %853 = vst.msk [vmem:[#allocation3 + $0x6c] sm:$0xf] %vm265_vm0, %v821_v23  ;;  %v824_v46 = vld [vmem:[#allocation2 + $0xb4] sm:$0xf]  ;;  %v823_v43 = vld [vmem:[#allocation2 + $0xac] sm:$0xf] }
  0xce   : > { %1659 = vrot.lane.b32.xlu0 %v1569_v55, %s4627_s11  ;;  %1392 = vst.msk [vmem:[#allocation3 + $0x8] sm:$0xf] %vm1389_vm14, %v1298_v24  ;;  %v1304_v15 = vpop.permute.xlu2 %1303  ;;  %1639 = vrot.lane.b32.xlu2 %v1534_v51, %s4627_s11  ;;  %v4345_v55 = vrot.slane %v1440_v10, 9  ;;  %v1452_v24 = vld [vmem:[#allocation2 + $0x78] sm:$0xe]  ;;  %v1587_v27 = vsel %vm5444_vm13, %v4348_v21, %v1586_v9  ;;  %v1630_v61 = vrot.slane %v1628_v3, 4 }
  0xcf   : > { %v1306_v33 = vpop.permute.xlu0 %1305  ;;  %1395 = vst.msk [vmem:[#allocation3 + $0x14] sm:$0xf] %vm1389_vm14, %v1304_v15  ;;  %1649 = vrot.lane.b32.xlu1 %v1552_v5, %s4627_s11  ;;  %v1460_v5 = vld [vmem:[#allocation2 + $0x98] sm:$0x1]  ;;  %v5593_v51 = vld [vmem:[#allocation2 + $0x7c] sm:$0xf] }
  0xd0   : > { %1396 = vst.msk [vmem:[#allocation3 + $0x18] sm:$0xf] %vm1389_vm14, %v1306_v33  ;;  %v1566_v36 = vsel %vm5444_vm13, %v4345_v55, %v1565_v30  ;;  %v1610_v0 = vrot.slane %v1460_v5, 5  ;;  %v1445_v33 = vld [vmem:[#allocation2 + $0x5c] sm:$0x1]  ;;  %v4349_v31 = vrot.slane %v1452_v24, 9 }
  0xd1   : > { %v1593_v52 = vrot.slane %v5593_v51, 5  ;;  %v817_v30 = vld [vmem:[#allocation2 + $0x88] sm:$0xf]  ;;  %v1575_v56 = vrot.slane %v1445_v33, 5  ;;  %852 = vst.msk [vmem:[#allocation3 + $0x68] sm:$0xf] %vm265_vm0, %v820_v35 }
  0xd2   : > { %849 = vst.msk [vmem:[#allocation3 + $0x5c] sm:$0xf] %vm265_vm0, %v817_v30  ;;  %v1466_v51 = vld [vmem:[#allocation2 + $0xb0] sm:$0x1]  ;;  %v1463_v30 = vld [vmem:[#allocation2 + $0xa4] sm:$0x1] }
  0xd3   : > { %v1594_v44 = vsel %vm5444_vm13, %v4349_v31, %v1593_v52  ;;  %v1595_v9 = vrot.slane %v1593_v52, 4  ;;  %851 = vst.msk [vmem:[#allocation3 + $0x64] sm:$0xf] %vm265_vm0, %v819_v42  ;;  %v1624_v33 = vrot.slane %v1466_v51, 5  ;;  %v1764_v52 = vld [vmem:[#allocation2 + $0x18] sm:$0xf] }
  0xd4   : > { %856 = vst.msk [vmem:[#allocation3 + $0x78] sm:$0xf] %vm265_vm0, %v824_v46  ;;  %v1767_v18 = vld [vmem:[#allocation2 + $0x28] sm:$0xf]  ;;  %v1762_v14 = vld [vmem:[#allocation2 + $0xc] sm:$0xf] }
  0xd5   : > { %v1300_v53 = vpop.permute.xlu1 %1299  ;;  %855 = vst.msk [vmem:[#allocation3 + $0x74] sm:$0xf] %vm265_vm0, %v823_v43  ;;  %v1765_v39 = vld [vmem:[#allocation2 + $0x1c] sm:$0xf]  ;;  %v1773_v58 = vld [vmem:[#allocation2 + $0x4c] sm:$0xf] }
  0xd6   : > { %1665 = vrot.lane.b32.xlu0 %v1580_v17, %s4627_s11  ;;  %1393 = vst.msk [vmem:[#allocation3 + $0xc] sm:$0xf] %vm1389_vm14, %v1300_v53  ;;  %1645 = vrot.lane.b32.xlu2 %v1545_v2, %s4627_s11  ;;  %v1611_v17 = vsel %vm5444_vm13, %v1609_v54, %v1610_v0  ;;  %v1457_v53 = vld [vmem:[#allocation2 + $0x8c] sm:$0x1]  ;;  %v1623_v0 = vrot.slane %v1621_v63, 4 }
  0xd7   : > { %v1310_v41 = vpop.permute.xlu2 %1309  ;;  %v1312_v6 = vpop.permute.xlu0 %1311  ;;  %1655 = vrot.lane.b32.xlu1 %v1562_v47, %s4627_s11  ;;  %v1464_v47 = vld [vmem:[#allocation2 + $0xa8] sm:$0xe]  ;;  %v1603_v34 = vrot.slane %v1457_v53, 5  ;;  %v1467_v53 = vld [vmem:[#allocation2 + $0xb4] sm:$0xe] }
  0xd8   : > { %1398 = vst.msk [vmem:[#allocation3 + $0x20] sm:$0xf] %vm1389_vm14, %v1310_v41  ;;  %v1576_v41 = vsel %vm5444_vm13, %v1574_v62, %v1575_v56  ;;  %v4353_v19 = vrot.slane %v1464_v47, 9  ;;  %v1625_v7 = vsel %vm5444_vm13, %v1623_v0, %v1624_v33  ;;  %v1617_v47 = vrot.slane %v1463_v30, 5  ;;  %v1768_v23 = vld [vmem:[#allocation2 + $0x30] sm:$0xf] }
  0xd9   : > { %1399 = vst.msk [vmem:[#allocation3 + $0x24] sm:$0xf] %vm1389_vm14, %v1312_v6  ;;  %v1604_v1 = vsel %vm5444_vm13, %v1602_v20, %v1603_v34  ;;  %v1763_v35 = vld [vmem:[#allocation2 + $0x10] sm:$0xf]  ;;  %v787_v51 = vld [vmem:[#allocation2 + $0xc0] sm:$0xf] }
  0xda   : > { %v1785_v33 = vld [vmem:[#allocation2 + $0x94] sm:$0xf] }
  0xdd   : > { %v1308_v16 = vpop.permute.xlu1 %1307 }
  0xde   : > { %1671 = vrot.lane.b32.xlu0 %v1590_v59, %s4627_s11  ;;  %1397 = vst.msk [vmem:[#allocation3 + $0x1c] sm:$0xf] %vm1389_vm14, %v1308_v16  ;;  %1651 = vrot.lane.b32.xlu2 %v1555_v26, %s4627_s11  ;;  %v1622_v59 = vsel %vm5444_vm13, %v4353_v19, %v1621_v63  ;;  %v1461_v16 = vld [vmem:[#allocation2 + $0x9c] sm:$0xe]  ;;  %v1462_v26 = vld [vmem:[#allocation2 + $0xa0] sm:$0xf] }
  0xdf   : > { %v1316_v60 = vpop.permute.xlu2 %1315  ;;  %v1318_v32 = vpop.permute.xlu0 %1317  ;;  %1661 = vrot.lane.b32.xlu1 %v1573_v40, %s4627_s11  ;;  %v1469_v40 = vld [vmem:[#allocation2 + $0xbc] sm:$0x1]  ;;  %v4352_v49 = vrot.slane %v1461_v16, 9  ;;  %v1614_v25 = vrot.slane %v1462_v26, 5 }
  0xe0   : > { %1401 = vst.msk [vmem:[#allocation3 + $0x2c] sm:$0xf] %vm1389_vm14, %v1316_v60  ;;  %v1631_v10 = vrot.slane %v1469_v40, 5  ;;  %v1770_v63 = vld [vmem:[#allocation2 + $0x3c] sm:$0xf] }
  0xe1   : > { %1402 = vst.msk [vmem:[#allocation3 + $0x30] sm:$0xf] %vm1389_vm14, %v1318_v32  ;;  %v1454_v32 = vld [vmem:[#allocation2 + $0x80] sm:$0x1]  ;;  %v1615_v5 = vsel %vm5444_vm13, %v4352_v49, %v1614_v25  ;;  %v1766_v40 = vld [vmem:[#allocation2 + $0x24] sm:$0xf] }
  0xe2   : > { %v1596_v55 = vrot.slane %v1454_v32, 5 }
  0xe4   : > { %v1597_v24 = vsel %vm5444_vm13, %v1595_v9, %v1596_v55  ;;  %v1782_v9 = vld [vmem:[#allocation2 + $0x84] sm:$0xf] }
  0xe5   : > { %v1314_v15 = vpop.permute.xlu1 %1313 }
  0xe6   : > { %1677 = vrot.lane.b32.xlu0 %v1601_v29, %s4627_s11  ;;  %1400 = vst.msk [vmem:[#allocation3 + $0x28] sm:$0xf] %vm1389_vm14, %v1314_v15  ;;  %1657 = vrot.lane.b32.xlu2 %v1566_v36, %s4627_s11  ;;  %v1632_v29 = vsel %vm5444_vm13, %v1630_v61, %v1631_v10  ;;  %v1458_v15 = vld [vmem:[#allocation2 + $0x90] sm:$0xe]  ;;  %v1774_v61 = vld [vmem:[#allocation2 + $0x54] sm:$0xf] }
  0xe7   : > { %v1324_v57 = vpop.permute.xlu0 %1323  ;;  %1667 = vrot.lane.b32.xlu1 %v1583_v22, %s4627_s11  ;;  %v4351_v31 = vrot.slane %v1458_v15, 9  ;;  %v4560_v10 = vld [vmem:[%s6804_s1] ss:$0 sm:$0xff] }
  0xe8   : > { %1405 = vst.msk [vmem:[#allocation3 + $0x3c] sm:$0xf] %vm1389_vm14, %v1324_v57  ;;  %v822_v57 = vld [vmem:[#allocation2 + $0xa8] sm:$0xf] }
  0xe9   : > { %854 = vst.msk [vmem:[#allocation3 + $0x70] sm:$0xf] %vm265_vm0, %v822_v57  ;;  %v1608_v37 = vsel %vm5444_vm13, %v4351_v31, %v1607_v50  ;;  %v1780_v57 = vld [vmem:[#allocation2 + $0x78] sm:$0xf] }
  0xea   : > { %v228_v31 = vld [vmem:[%s4737_s5 + $0xf8] sm:$0xff] }
  0xec   : > { %v1322_v8 = vpop.permute.xlu2 %1321 }
  0xed   : > { %1404 = vst.msk [vmem:[#allocation3 + $0x38] sm:$0xf] %vm1389_vm14, %v1322_v8  ;;  %v1320_v2 = vpop.permute.xlu1 %1319  ;;  %v1616_v8 = vrot.slane %v1614_v25, 4 }
  0xee   : > { %1683 = vrot.lane.b32.xlu0 %v1611_v17, %s4627_s11  ;;  %1403 = vst.msk [vmem:[#allocation3 + $0x34] sm:$0xf] %vm1389_vm14, %v1320_v2  ;;  %1663 = vrot.lane.b32.xlu2 %v1576_v41, %s4627_s11  ;;  %v825_v17 = vld [vmem:[#allocation2 + $0xb8] sm:$0xf]  ;;  %v4354_v41 = vrot.slane %v1467_v53, 9 }
  0xef   : > { %v1330_v6 = vpop.permute.xlu0 %1329  ;;  %1673 = vrot.lane.b32.xlu1 %v1594_v44, %s4627_s11  ;;  %857 = vst.msk [vmem:[#allocation3 + $0x7c] sm:$0xf] %vm265_vm0, %v825_v17  ;;  %v1618_v50 = vsel %vm5444_vm13, %v1616_v8, %v1617_v47  ;;  %v1788_v8 = vld [vmem:[#allocation2 + $0xa8] sm:$0xf]  ;;  %v1778_v53 = vld [vmem:[#allocation2 + $0x6c] sm:$0xf] }
  0xf0   : > { %1408 = vst.msk [vmem:[#allocation3 + $0x48] sm:$0xf] %vm1389_vm14, %v1330_v6  ;;  %v1629_v6 = vsel %vm5444_vm13, %v4354_v41, %v1628_v3  ;;  %v1776_v3 = vld [vmem:[#allocation2 + $0x60] sm:$0xf] }
  0xf4   : > { %v1328_v13 = vpop.permute.xlu2 %1327 }
  0xf5   : > { %1407 = vst.msk [vmem:[#allocation3 + $0x44] sm:$0xf] %vm1389_vm14, %v1328_v13  ;;  %v1326_v60 = vpop.permute.xlu1 %1325  ;;  %v1771_v13 = vld [vmem:[#allocation2 + $0x40] sm:$0xf] }
  0xf6   : > { %1689 = vrot.lane.b32.xlu0 %v1622_v59, %s4627_s11  ;;  %1406 = vst.msk [vmem:[#allocation3 + $0x40] sm:$0xf] %vm1389_vm14, %v1326_v60  ;;  %1669 = vrot.lane.b32.xlu2 %v1587_v27, %s4627_s11  ;;  %v1779_v60 = vld [vmem:[#allocation2 + $0x70] sm:$0xf] }
  0xf7   : > { %v1336_v28 = vpop.permute.xlu0 %1335  ;;  %1679 = vrot.lane.b32.xlu1 %v1604_v1, %s4627_s11  ;;  %v227_v27 = vld [vmem:[%s4737_s5 + $0xf0] sm:$0xff] }
  0xf8   : > { %1411 = vst.msk [vmem:[#allocation3 + $0x54] sm:$0xf] %vm1389_vm14, %v1336_v28  ;;  %v263_v32 = vadd.f32 %v4560_v10, %v227_v27  ;;  %v1769_v28 = vld [vmem:[#allocation2 + $0x34] sm:$0xf] }
  0xfa   : > { %v351_v49 = vpack.c.bf16 %v263_v32, %v263_v32 }
  0xfc   : > { %v612_v42 = vshrl.u32 %v351_v49, 16 }
  0xfd   : > { %v1332_v22 = vpop.permute.xlu1 %1331 }
  0xfe   : > { %1695 = vrot.lane.b32.xlu0 %v1632_v29, %s4627_s11  ;;  %1409 = vst.msk [vmem:[#allocation3 + $0x4c] sm:$0xf] %vm1389_vm14, %v1332_v22  ;;  %1675 = vrot.lane.b32.xlu2 %v1597_v24, %s4627_s11  ;;  %v614_v55 = vrot.slane %v612_v42, 7  ;;  %v615_v29 = vshll.u32 %v351_v49, 16  ;;  %v1772_v24 = vld [vmem:[#allocation2 + $0x48] sm:$0xf] }
  0xff   : > { %1685 = vrot.lane.b32.xlu1 %v1615_v5, %s4627_s11  ;;  %v1334_v54 = vpop.permute.xlu2 %1333  ;;  %v1777_v5 = vld [vmem:[#allocation2 + $0x64] sm:$0xf] }
 0x100   : > { %v1342_v36 = vpop.permute.xlu0 %1341  ;;  %1410 = vst.msk [vmem:[#allocation3 + $0x50] sm:$0xf] %vm1389_vm14, %v1334_v54  ;;  %v617_v22 = vor.u32 %v615_v29, %v614_v55 }
 0x101   : > { %1414 = vst.msk [vmem:[#allocation3 + $0x60] sm:$0xf] %vm1389_vm14, %v1342_v36 }
 0x102   : > { %v788_v15 = vsel %vm4919_vm9, %v617_v22, %v787_v51  ;;  %vm4076_vm9 = vcmask 220160  }
 0x103   : > { %789 = vst [vmem:[#allocation2 + $0xc0] sm:$0xf] %v788_v15 }
 0x106   : > { %1830 = vrot.lane.b32.xlu0 %v1764_v52, %s4628_s12  ;;  %1681 = vrot.lane.b32.xlu2 %v1608_v37, %s4627_s11  ;;  %v264_v52 = vadd.f32 %v4560_v10, %v228_v31  ;;  %v1955_v37 = vld [vmem:[#allocation2 + $0xc] sm:$0xf]  ;;  %v1961_v31 = vld [vmem:[#allocation2 + $0x24] sm:$0xf] }
 0x107   : > { %1691 = vrot.lane.b32.xlu1 %v1625_v7, %s4627_s11  ;;  %v1340_v62 = vpop.permute.xlu2 %1339  ;;  %v2004_v47 = vshrl.u32 %v1955_v37, 16 }
 0x108   : > { %1413 = vst.msk [vmem:[#allocation3 + $0x5c] sm:$0xf] %vm1389_vm14, %v1340_v62  ;;  %v352_v30 = vpack.c.bf16 %v264_v52, %v264_v52 }
 0x109   : > { %v1338_v56 = vpop.permute.xlu1 %1337 }
 0x10a   : > { %1412 = vst.msk [vmem:[#allocation3 + $0x58] sm:$0xf] %vm1389_vm14, %v1338_v56  ;;  %v620_v56 = vshrl.u32 %v352_v30, 16 }
 0x10e   : > { %1836 = vrot.lane.b32.xlu0 %v1767_v18, %s4628_s12  ;;  %v1348_v44 = vpop.permute.xlu0 %1347  ;;  %1687 = vrot.lane.b32.xlu2 %v1618_v50, %s4627_s11  ;;  %v2007_v18 = vshll.u32 %v1955_v37, 16  ;;  %v623_v50 = vshll.u32 %v352_v30, 16 }
 0x10f   : > { %1417 = vst.msk [vmem:[#allocation3 + $0x6c] sm:$0xf] %vm1389_vm14, %v1348_v44  ;;  %1826 = vrot.lane.b32.xlu1 %v1762_v14, %s4628_s12  ;;  %v5729_v14 = vrot.slane %v620_v56, 7  ;;  %v1783_v44 = vld [vmem:[#allocation2 + $0x88] sm:$0xf] }
 0x110   : > { %v1346_v19 = vpop.permute.xlu2 %1345 }
 0x111   : > { %v1344_v2 = vpop.permute.xlu1 %1343  ;;  %1416 = vst.msk [vmem:[#allocation3 + $0x68] sm:$0xf] %vm1389_vm14, %v1346_v19  ;;  %v625_v41 = vor.u32 %v623_v50, %v5729_v14  ;;  %v2006_v19 = vrot.slane %v2004_v47, 4  ;;  %v2055_v47 = vshll.u32 %v1961_v31, 16 }
 0x112   : > { %1415 = vst.msk [vmem:[#allocation3 + $0x64] sm:$0xf] %vm1389_vm14, %v1344_v2  ;;  %v618_v2 = vrot.slane %v614_v55, 4  ;;  %v1784_v55 = vld [vmem:[#allocation2 + $0x90] sm:$0xf] }
 0x116   : > { %1842 = vrot.lane.b32.xlu0 %v1770_v63, %s4628_s12  ;;  %1693 = vrot.lane.b32.xlu2 %v1629_v6, %s4627_s11  ;;  %v2009_v63 = vrot.slane %v2007_v18, 5  ;;  %v1787_v18 = vld [vmem:[#allocation2 + $0xa0] sm:$0xf] }
 0x117   : > { %1832 = vrot.lane.b32.xlu1 %v1765_v39, %s4628_s12  ;;  %v1959_v39 = vld [vmem:[#allocation2 + $0x1c] sm:$0xf] }
 0x118   : > { %v1354_v20 = vpop.permute.xlu0 %1353  ;;  %v1352_v34 = vpop.permute.xlu2 %1351 }
 0x119   : > { %1420 = vst.msk [vmem:[#allocation3 + $0x78] sm:$0xf] %vm1389_vm14, %v1354_v20  ;;  %v1956_v20 = vld [vmem:[#allocation2 + $0x10] sm:$0xf] }
 0x11a   : > { %1419 = vst.msk [vmem:[#allocation3 + $0x74] sm:$0xf] %vm1389_vm14, %v1352_v34  ;;  %v626_v34 = vsel %vm4824_vm7, %v618_v2, %v625_v41  ;;  %v1973_v41 = vld [vmem:[#allocation2 + $0x54] sm:$0xf]  ;;  %vm3575_vm7 = vcmask 191656  }
 0x11b   : > { %790 = vst.msk [vmem:[#allocation2 + $0xc4] sm:$0xf] %vm265_vm0, %v626_v34  ;;  %v2057_v34 = vrot.slane %v2055_v47, 5  ;;  %vm1922_vm0 = vcmask 93256  }
 0x11e   : > { %1848 = vrot.lane.b32.xlu0 %v1773_v58, %s4628_s12  ;;  %1828 = vrot.lane.b32.xlu2 %v1763_v35, %s4628_s12  ;;  %v2041_v35 = vshrl.u32 %v1959_v39, 16 }
 0x11f   : > { %1838 = vrot.lane.b32.xlu1 %v1768_v23, %s4628_s12  ;;  %v2037_v23 = vshll.u32 %v1959_v39, 16 }
 0x120   : > { %v1636_v38 = vpop.permute.xlu0 %1635  ;;  %v1634_v59 = vpop.permute.xlu2 %1633 }
 0x121   : > { %1731 = vst.msk [vmem:[#allocation3 + $0x4] sm:$0xf] %vm1729_vm15, %v1636_v38  ;;  %v1350_v21 = vpop.permute.xlu1 %1349 }
 0x122   : > { %1418 = vst.msk [vmem:[#allocation3 + $0x70] sm:$0xf] %vm1389_vm14, %v1350_v21  ;;  %v1791_v21 = vld [vmem:[#allocation2 + $0xb8] sm:$0xf] }
 0x123   : > { %1730 = vst.msk [vmem:[#allocation3] sm:$0xf] %vm1729_vm15, %v1634_v59  ;;  %v2010_v59 = vor.u32 %v2009_v63, %v2006_v19 }
 0x126   : > { %1854 = vrot.lane.b32.xlu0 %v1776_v3, %s4628_s12  ;;  %1834 = vrot.lane.b32.xlu2 %v1766_v40, %s4628_s12  ;;  %v2013_v3 = vshll.u32 %v1956_v20, 16  ;;  %v5742_v40 = vrot.slane %v2037_v23, 5 }
 0x127   : > { %1844 = vrot.lane.b32.xlu1 %v1771_v13, %s4628_s12  ;;  %v1786_v13 = vld [vmem:[#allocation2 + $0x9c] sm:$0xf] }
 0x128   : > { %v1642_v1 = vpop.permute.xlu0 %1641  ;;  %v1640_v26 = vpop.permute.xlu2 %1639 }
 0x129   : > { %1734 = vst.msk [vmem:[#allocation3 + $0x10] sm:$0xf] %vm1729_vm15, %v1642_v1  ;;  %v1356_v16 = vpop.permute.xlu1 %1355  ;;  %v2043_v1 = vrot.slane %v2041_v35, 4  ;;  %v5771_v35 = vld [vmem:[#allocation2 + $0x28] sm:$0xf] }
 0x12a   : > { %1421 = vst.msk [vmem:[#allocation3 + $0x7c] sm:$0xf] %vm1389_vm14, %v1356_v16  ;;  %v2011_v16 = vrot.slane %v2010_v59, 4 }
 0x12b   : > { %1733 = vst.msk [vmem:[#allocation3 + $0xc] sm:$0xf] %vm1729_vm15, %v1640_v26  ;;  %v2015_v26 = vrot.slane %v2013_v3, 5  ;;  %v2044_v32 = vor.u32 %v2043_v1, %v5742_v40 }
 0x12d   : > { %v2045_v29 = vrot.slane %v2044_v32, 4 }
 0x12e   : > { %1860 = vrot.lane.b32.xlu0 %v1779_v60, %s4628_s12  ;;  %1840 = vrot.lane.b32.xlu2 %v1769_v28, %s4628_s12  ;;  %v1960_v60 = vld [vmem:[#allocation2 + $0x20] sm:$0x1] }
 0x12f   : > { %1850 = vrot.lane.b32.xlu1 %v1774_v61, %s4628_s12  ;;  %v1964_v61 = vld [vmem:[#allocation2 + $0x30] sm:$0xf]  ;;  %v2047_v28 = vshll.u32 %v1960_v60, 16 }
 0x130   : > { %v1648_v25 = vpop.permute.xlu0 %1647  ;;  %v1646_v43 = vpop.permute.xlu2 %1645  ;;  %v2076_v42 = vshrl.u32 %v1964_v61, 16 }
 0x131   : > { %1737 = vst.msk [vmem:[#allocation3 + $0x1c] sm:$0xf] %vm1729_vm15, %v1648_v25  ;;  %v1638_v46 = vpop.permute.xlu1 %1637  ;;  %v2016_v25 = vsel %vm4751_vm3, %v2011_v16, %v2015_v26 }
 0x132   : > { %1732 = vst.msk [vmem:[#allocation3 + $0x8] sm:$0xf] %vm1729_vm15, %v1638_v46  ;;  %v2079_v46 = vshll.u32 %v1964_v61, 16  ;;  %v2078_v22 = vrot.slane %v2076_v42, 4  ;;  %v2061_v61 = vshll.u32 %v5771_v35, 16 }
 0x133   : > { %1736 = vst.msk [vmem:[#allocation3 + $0x18] sm:$0xf] %vm1729_vm15, %v1646_v43  ;;  %v2017_v43 = vshrl.u32 %v1956_v20, 16  ;;  %v5784_v42 = vld [vmem:[#allocation2 + $0x58] sm:$0xf] }
 0x135   : > { %v2019_v15 = vrot.slane %v2017_v43, 4 }
 0x136   : > { %1866 = vrot.lane.b32.xlu0 %v1782_v9, %s4628_s12  ;;  %1846 = vrot.lane.b32.xlu2 %v1772_v24, %s4628_s12  ;;  %v1789_v9 = vld [vmem:[#allocation2 + $0xac] sm:$0xf]  ;;  %v2081_v24 = vrot.slane %v2079_v46, 5  ;;  %v1977_v46 = vld [vmem:[#allocation2 + $0x64] sm:$0xf] }
 0x137   : > { %1856 = vrot.lane.b32.xlu1 %v1777_v5, %s4628_s12  ;;  %v2049_v5 = vrot.slane %v2047_v28, 5 }
 0x138   : > { %v1654_v36 = vpop.permute.xlu0 %1653  ;;  %v1652_v0 = vpop.permute.xlu2 %1651  ;;  %v2082_v52 = vor.u32 %v2081_v24, %v2078_v22  ;;  %v5789_v24 = vrot.slane %v2061_v61, 5 }
 0x139   : > { %1740 = vst.msk [vmem:[#allocation3 + $0x28] sm:$0xf] %vm1729_vm15, %v1654_v36  ;;  %v1644_v54 = vpop.permute.xlu1 %1643  ;;  %v5754_v36 = vld [vmem:[#allocation2 + $0x34] sm:$0xf] }
 0x13a   : > { %1735 = vst.msk [vmem:[#allocation3 + $0x14] sm:$0xf] %vm1729_vm15, %v1644_v54  ;;  %v1968_v54 = vld [vmem:[#allocation2 + $0x40] sm:$0xf]  ;;  %v2083_v50 = vrot.slane %v2082_v52, 4  ;;  %v2089_v1 = vshrl.u32 %v5754_v36, 16 }
 0x13b   : > { %1739 = vst.msk [vmem:[#allocation3 + $0x24] sm:$0xf] %vm1729_vm15, %v1652_v0  ;;  %v1957_v0 = vld [vmem:[#allocation2 + $0x14] sm:$0x1]  ;;  %v2109_v37 = vshll.u32 %v1968_v54, 16  ;;  %v2113_v30 = vshrl.u32 %v1968_v54, 16 }
 0x13c   : > { %v2023_v56 = vshll.u32 %v1957_v0, 16  ;;  %v2157_v54 = vshll.u32 %v5784_v42, 16  ;;  %v2181_v0 = vshll.u32 %v1977_v46, 16 }
 0x13d   : > { %v2115_v2 = vrot.slane %v2113_v30, 4 }
 0x13e   : > { %1872 = vrot.lane.b32.xlu0 %v1785_v33, %s4628_s12  ;;  %1852 = vrot.lane.b32.xlu2 %v1775_v45, %s4628_s12  ;;  %v2025_v39 = vrot.slane %v2023_v56, 5  ;;  %v2065_v56 = vshrl.u32 %v5771_v35, 16  ;;  %v5802_v47 = vrot.slane %v2157_v54, 5  ;;  %v1975_v54 = vld [vmem:[#allocation2 + $0x5c] sm:$0x1] }
 0x13f   : > { %1862 = vrot.lane.b32.xlu1 %v1780_v57, %s4628_s12  ;;  %v2050_v57 = vsel %vm4751_vm3, %v2045_v29, %v2049_v5  ;;  %v1970_v5 = vld [vmem:[#allocation2 + $0x48] sm:$0xf] }
 0x140   : > { %v1660_v7 = vpop.permute.xlu0 %1659  ;;  %v1658_v17 = vpop.permute.xlu2 %1657  ;;  %v2127_v52 = vshll.u32 %v1970_v5, 16 }
 0x141   : > { %1743 = vst.msk [vmem:[#allocation3 + $0x34] sm:$0xf] %vm1729_vm15, %v1660_v7  ;;  %v1650_v62 = vpop.permute.xlu1 %1649  ;;  %v2085_v7 = vshll.u32 %v5754_v36, 16 }
 0x142   : > { %1738 = vst.msk [vmem:[#allocation3 + $0x20] sm:$0xf] %vm1729_vm15, %v1650_v62  ;;  %v2020_v62 = vor.u32 %v2019_v15, %v2015_v26 }
 0x143   : > { %1742 = vst.msk [vmem:[#allocation3 + $0x30] sm:$0xf] %vm1729_vm15, %v1658_v17  ;;  %v1792_v17 = vld [vmem:[#allocation2 + $0xc0] sm:$0xf] }
 0x144   : > { %v2021_v63 = vrot.slane %v2020_v62, 4 }
 0x146   : > { %1878 = vrot.lane.b32.xlu0 %v1788_v8, %s4628_s12  ;;  %1858 = vrot.lane.b32.xlu2 %v1778_v53, %s4628_s12  ;;  %v2052_v8 = vshrl.u32 %v1961_v31, 16  ;;  %v5766_v53 = vrot.slane %v2109_v37, 5  ;;  %v2026_v60 = vsel %vm4751_vm3, %v2021_v63, %v2025_v39 }
 0x147   : > { %1868 = vrot.lane.b32.xlu1 %v1783_v44, %s4628_s12  ;;  %v5764_v44 = vrot.slane %v2085_v7, 5 }
 0x148   : > { %v1666_v6 = vpop.permute.xlu0 %1665  ;;  %v1664_v38 = vpop.permute.xlu2 %1663  ;;  %v2054_v20 = vrot.slane %v2052_v8, 4 }
 0x149   : > { %1746 = vst.msk [vmem:[#allocation3 + $0x40] sm:$0xf] %vm1729_vm15, %v1666_v6  ;;  %v1656_v58 = vpop.permute.xlu1 %1655  ;;  %v1969_v6 = vld [vmem:[#allocation2 + $0x44] sm:$0x1]  ;;  %v2088_v3 = vsel %vm4751_vm3, %v2083_v50, %v5764_v44 }
 0x14a   : > { %1741 = vst.msk [vmem:[#allocation3 + $0x2c] sm:$0xf] %vm1729_vm15, %v1656_v58  ;;  %v1958_v58 = vld [vmem:[#allocation2 + $0x18] sm:$0xf] }
 0x14b   : > { %1745 = vst.msk [vmem:[#allocation3 + $0x3c] sm:$0xf] %vm1729_vm15, %v1664_v38  ;;  %v2148_v38 = vshrl.u32 %v1973_v41, 16  ;;  %v2028_v16 = vshrl.u32 %v1958_v58, 16  ;;  %v2031_v26 = vshll.u32 %v1958_v58, 16  ;;  %v2067_v58 = vrot.slane %v2065_v56, 4 }
 0x14d   : > { %v2150_v32 = vrot.slane %v2148_v38, 4  ;;  %v2033_v29 = vrot.slane %v2031_v26, 5  ;;  %v1963_v38 = vld [vmem:[#allocation2 + $0x2c] sm:$0x1] }
 0x14e   : > { %1884 = vrot.lane.b32.xlu0 %v1791_v21, %s4628_s12  ;;  %1864 = vrot.lane.b32.xlu2 %v1781_v48, %s4628_s12  ;;  %v2151_v21 = vshll.u32 %v1973_v41, 16  ;;  %v2119_v48 = vshll.u32 %v1969_v6, 16  ;;  %v2129_v41 = vrot.slane %v2127_v52, 5 }
 0x14f   : > { %1874 = vrot.lane.b32.xlu1 %v1786_v13, %s4628_s12  ;;  %v2116_v13 = vor.u32 %v2115_v2, %v5766_v53 }
 0x150   : > { %v1672_v27 = vpop.permute.xlu0 %1671  ;;  %v1670_v49 = vpop.permute.xlu2 %1669  ;;  %v2153_v28 = vrot.slane %v2151_v21, 5 }
 0x151   : > { %1749 = vst.msk [vmem:[#allocation3 + $0x4c] sm:$0xf] %vm1729_vm15, %v1672_v27  ;;  %v1662_v10 = vpop.permute.xlu1 %1661  ;;  %v2058_v27 = vor.u32 %v2057_v34, %v2054_v20  ;;  %v5807_v34 = vld [vmem:[#allocation2 + $0x4c] sm:$0xf] }
 0x152   : > { %1744 = vst.msk [vmem:[#allocation3 + $0x38] sm:$0xf] %vm1729_vm15, %v1662_v10  ;;  %v1790_v10 = vld [vmem:[#allocation2 + $0xb4] sm:$0xf]  ;;  %v2154_v36 = vor.u32 %v2153_v28, %v2150_v32  ;;  %v2133_v32 = vshll.u32 %v5807_v34, 16  ;;  %v2068_v28 = vor.u32 %v2067_v58, %v5789_v24  ;;  %v2137_v56 = vshrl.u32 %v5807_v34, 16 }
 0x153   : > { %1748 = vst.msk [vmem:[#allocation3 + $0x48] sm:$0xf] %vm1729_vm15, %v1670_v49  ;;  %v2117_v49 = vrot.slane %v2116_v13, 4  ;;  %v2059_v22 = vrot.slane %v2058_v27, 4 }
 0x154   : > { %v2155_v8 = vrot.slane %v2154_v36, 4  ;;  %v2069_v36 = vrot.slane %v2068_v28, 4 }
 0x155   : > { %v2064_v62 = vsel %vm4751_vm3, %v2059_v22, %v5789_v24  ;;  %v5831_v24 = vrot.slane %v2133_v32, 5 }
 0x156   : > { %2387 = vrot.lane.b32.xlu0 %v2016_v25, %s4629_s20  ;;  %1870 = vrot.lane.b32.xlu2 %v1784_v55, %s4628_s12  ;;  %v2121_v25 = vrot.slane %v2119_v48, 5  ;;  %v2030_v55 = vrot.slane %v2028_v16, 4  ;;  %v2161_v16 = vshrl.u32 %v5784_v42, 16 }
 0x157   : > { %1880 = vrot.lane.b32.xlu1 %v1789_v9, %s4628_s12  ;;  %v2091_v9 = vrot.slane %v2089_v1, 4  ;;  %v2160_v1 = vsel %vm4751_vm3, %v2155_v8, %v5802_v47  ;;  %v2167_v8 = vshll.u32 %v1975_v54, 16 }
 0x158   : > { %v1678_v51 = vpop.permute.xlu0 %1677  ;;  %v1676_v45 = vpop.permute.xlu2 %1675  ;;  %v2122_v31 = vsel %vm4751_vm3, %v2117_v49, %v2121_v25  ;;  %v2034_v30 = vor.u32 %v2033_v29, %v2030_v55  ;;  %v2071_v49 = vshll.u32 %v1963_v38, 16  ;;  %v2163_v55 = vrot.slane %v2161_v16, 4  ;;  %v5826_v29 = vld [vmem:[#allocation2 + $0x7c] sm:$0xf] }
 0x159   : > { %1752 = vst.msk [vmem:[#allocation3 + $0x58] sm:$0xf] %vm1729_vm15, %v1678_v51  ;;  %v1668_v33 = vpop.permute.xlu1 %1667  ;;  %v1966_v51 = vld [vmem:[#allocation2 + $0x38] sm:$0x1]  ;;  %v2092_v7 = vor.u32 %v2091_v9, %v5764_v44  ;;  %v1978_v44 = vld [vmem:[#allocation2 + $0x68] sm:$0x1] }
 0x15a   : > { %1747 = vst.msk [vmem:[#allocation3 + $0x44] sm:$0xf] %vm1729_vm15, %v1668_v33  ;;  %v2185_v33 = vshrl.u32 %v1977_v46, 16  ;;  %v2095_v37 = vshll.u32 %v1966_v51, 16  ;;  %v2035_v20 = vrot.slane %v2034_v30, 4  ;;  %v2139_v38 = vrot.slane %v2137_v56, 4 }
 0x15b   : > { %1751 = vst.msk [vmem:[#allocation3 + $0x54] sm:$0xf] %vm1729_vm15, %v1676_v45  ;;  %v2124_v45 = vshrl.u32 %v1970_v5, 16  ;;  %v2093_v39 = vrot.slane %v2092_v7, 4  ;;  %v1979_v51 = vld [vmem:[#allocation2 + $0x6c] sm:$0xf] }
 0x15c   : > { %v2187_v50 = vrot.slane %v2185_v33, 4  ;;  %v2097_v6 = vrot.slane %v2095_v37, 5  ;;  %v2040_v27 = vsel %vm4751_vm3, %v2035_v20, %v5742_v40  ;;  %v2073_v33 = vrot.slane %v2071_v49, 5 }
 0x15d   : > { %v2126_v2 = vrot.slane %v2124_v45, 4  ;;  %v2229_v45 = vshll.u32 %v5826_v29, 16  ;;  %v2196_v7 = vshrl.u32 %v1979_v51, 16  ;;  %v2199_v37 = vshll.u32 %v1979_v51, 16 }
 0x15e   : > { %2393 = vrot.lane.b32.xlu0 %v2050_v57, %s4629_s20  ;;  %1876 = vrot.lane.b32.xlu2 %v1787_v18, %s4628_s12  ;;  %v5804_v18 = vrot.slane %v2181_v0, 5  ;;  %v2233_v32 = vshrl.u32 %v5826_v29, 16  ;;  %v2140_v49 = vor.u32 %v2139_v38, %v5831_v24  ;;  %v627_v29 = vrot.slane %v5729_v14, 4  ;;  %v1988_v14 = vld [vmem:[#allocation2 + $0x90] sm:$0xf] }
 0x15f   : > { %1886 = vrot.lane.b32.xlu1 %v1792_v17, %s4628_s12  ;;  %v1793_v17 = vld [vmem:[#allocation2 + $0xc4] sm:$0xf]  ;;  %v2130_v26 = vor.u32 %v2129_v41, %v2126_v2  ;;  %v2074_v41 = vsel %vm4751_vm3, %v2069_v36, %v2073_v33  ;;  %v1995_v33 = vld [vmem:[#allocation2 + $0xac] sm:$0xf] }
 0x160   : > { %v1684_v19 = vpop.permute.xlu0 %1683  ;;  %v1682_v59 = vpop.permute.xlu2 %1681  ;;  %v2188_v21 = vor.u32 %v2187_v50, %v5804_v18  ;;  %v2141_v54 = vrot.slane %v2140_v49, 4 }
 0x161   : > { %1755 = vst.msk [vmem:[#allocation3 + $0x64] sm:$0xf] %vm1729_vm15, %v1684_v19  ;;  %v1674_v23 = vpop.permute.xlu1 %1673  ;;  %v1982_v19 = vld [vmem:[#allocation2 + $0x78] sm:$0xf]  ;;  %v2131_v9 = vrot.slane %v2130_v26, 4 }
 0x162   : > { %1750 = vst.msk [vmem:[#allocation3 + $0x50] sm:$0xf] %vm1729_vm15, %v1674_v23  ;;  %v1967_v23 = vld [vmem:[#allocation2 + $0x3c] sm:$0xf]  ;;  %v2223_v13 = vshll.u32 %v1982_v19, 16  ;;  %v2189_v25 = vrot.slane %v2188_v21, 4 }
 0x163   : > { %1754 = vst.msk [vmem:[#allocation3 + $0x60] sm:$0xf] %vm1729_vm15, %v1682_v59  ;;  %v2191_v59 = vshll.u32 %v1978_v44, 16  ;;  %v2100_v61 = vshrl.u32 %v1967_v23, 16  ;;  %v2136_v2 = vsel %vm4751_vm3, %v2131_v9, %v5831_v24  ;;  %v1987_v21 = vld [vmem:[#allocation2 + $0x8c] sm:$0x1] }
 0x165   : > { %v2193_v42 = vrot.slane %v2191_v59, 5  ;;  %v2102_v5 = vrot.slane %v2100_v61, 4  ;;  %v5853_v59 = vld [vmem:[#allocation2 + $0x70] sm:$0xf]  ;;  %v2263_v61 = vshll.u32 %v1987_v21, 16 }
 0x166   : > { %2399 = vrot.lane.b32.xlu0 %v2088_v3, %s4629_s20  ;;  %1882 = vrot.lane.b32.xlu2 %v1790_v10, %s4628_s12  ;;  %v2220_v3 = vshrl.u32 %v1982_v19, 16  ;;  %v2103_v10 = vshll.u32 %v1967_v23, 16  ;;  %v5846_v19 = vrot.slane %v2229_v45, 5  ;;  %v2169_v23 = vrot.slane %v2167_v8, 5 }
 0x167   : > { %2389 = vrot.lane.b32.xlu1 %v2026_v60, %s4629_s20  ;;  %v2098_v60 = vsel %vm4751_vm3, %v2093_v39, %v2097_v6  ;;  %v2201_v39 = vrot.slane %v2199_v37, 5  ;;  %v2205_v28 = vshll.u32 %v5853_v59, 16  ;;  %v2265_v51 = vrot.slane %v2263_v61, 5 }
 0x168   : > { %v1690_v43 = vpop.permute.xlu0 %1689  ;;  %v1688_v57 = vpop.permute.xlu2 %1687  ;;  %v2222_v46 = vrot.slane %v2220_v3, 4  ;;  %v2105_v22 = vrot.slane %v2103_v10, 5  ;;  %v1972_v3 = vld [vmem:[#allocation2 + $0x50] sm:$0x1]  ;;  %v1976_v10 = vld [vmem:[#allocation2 + $0x60] sm:$0xf] }
 0x169   : > { %1758 = vst.msk [vmem:[#allocation3 + $0x70] sm:$0xf] %vm1729_vm15, %v1690_v43  ;;  %v1680_v15 = vpop.permute.xlu1 %1679  ;;  %v2225_v43 = vrot.slane %v2223_v13, 5  ;;  %v2175_v9 = vshll.u32 %v1976_v10, 16  ;;  %v5874_v36 = vrot.slane %v2205_v28, 5  ;;  %v2329_v8 = vshrl.u32 %v1995_v33, 16 }
 0x16a   : > { %1753 = vst.msk [vmem:[#allocation3 + $0x5c] sm:$0xf] %vm1729_vm15, %v1680_v15  ;;  %v1986_v15 = vld [vmem:[#allocation2 + $0x88] sm:$0xf]  ;;  %v2106_v50 = vor.u32 %v2105_v22, %v2102_v5 }
 0x16b   : > { %1757 = vst.msk [vmem:[#allocation3 + $0x6c] sm:$0xf] %vm1729_vm15, %v1688_v57  ;;  %v2194_v57 = vsel %vm4751_vm3, %v2189_v25, %v2193_v42  ;;  %v2253_v30 = vshll.u32 %v1986_v15, 16  ;;  %v2143_v25 = vshll.u32 %v1972_v3, 16  ;;  %v2000_v3 = vld [vmem:[#allocation2 + $0xc0] sm:$0xf] }
 0x16d   : > { %v5848_v6 = vrot.slane %v2253_v30, 5  ;;  %v791_v30 = vld [vmem:[#allocation2 + $0xc8] sm:$0x1] }
 0x16e   : > { %2405 = vrot.lane.b32.xlu0 %v2122_v31, %s4629_s20  ;;  %1888 = vrot.lane.b32.xlu2 %v1793_v17, %s4628_s12  ;;  %v2226_v31 = vor.u32 %v2225_v43, %v2222_v46  ;;  %v2164_v17 = vor.u32 %v2163_v55, %v5802_v47  ;;  %v1991_v47 = vld [vmem:[#allocation2 + $0x9c] sm:$0xf]  ;;  %v2172_v43 = vshrl.u32 %v1976_v10, 16  ;;  %v1985_v10 = vld [vmem:[#allocation2 + $0x84] sm:$0xf] }
 0x16f   : > { %2395 = vrot.lane.b32.xlu1 %v2064_v62, %s4629_s20  ;;  %v2257_v62 = vshrl.u32 %v1986_v15, 16  ;;  %v5871_v15 = vld [vmem:[#allocation2 + $0xa0] sm:$0xf] }
 0x170   : > { %v1696_v63 = vpop.permute.xlu0 %1695  ;;  %v1694_v48 = vpop.permute.xlu2 %1693  ;;  %v2227_v44 = vrot.slane %v2226_v31, 4  ;;  %v2165_v58 = vrot.slane %v2164_v17, 4  ;;  %v2174_v45 = vrot.slane %v2172_v43, 4  ;;  %v2301_v37 = vshll.u32 %v5871_v15, 16 }
 0x171   : > { %1761 = vst.msk [vmem:[#allocation3 + $0x7c] sm:$0xf] %vm1729_vm15, %v1696_v63  ;;  %v1686_v35 = vpop.permute.xlu1 %1685  ;;  %v2198_v63 = vrot.slane %v2196_v7, 4  ;;  %v2259_v20 = vrot.slane %v2257_v62, 4  ;;  %v2325_v17 = vshll.u32 %v1995_v33, 16 }
 0x172   : > { %1756 = vst.msk [vmem:[#allocation3 + $0x68] sm:$0xf] %vm1729_vm15, %v1686_v35  ;;  %v2107_v35 = vrot.slane %v2106_v50, 4  ;;  %v2232_v26 = vsel %vm4751_vm3, %v2227_v44, %v5846_v19  ;;  %v2170_v42 = vsel %vm4751_vm3, %v2165_v58, %v2169_v23  ;;  %v792_v50 = vsel %vm4957_vm10, %v627_v29, %v791_v30  ;;  %v1997_v30 = vld [vmem:[#allocation2 + $0xb4] sm:$0xf] }
 0x173   : > { %1760 = vst.msk [vmem:[#allocation3 + $0x78] sm:$0xf] %vm1729_vm15, %v1694_v48  ;;  %v2292_v48 = vshrl.u32 %v1991_v47, 16  ;;  %v5893_v58 = vrot.slane %v2301_v37, 5  ;;  %v5895_v23 = vrot.slane %v2325_v17, 5  ;;  %v2247_v29 = vshll.u32 %v1985_v10, 16 }
 0x174   : > { %v2112_v46 = vsel %vm4751_vm3, %v2107_v35, %v5766_v53  ;;  %v2145_v53 = vrot.slane %v2143_v25, 5  ;;  %793 = vst [vmem:[#allocation2 + $0xc8] sm:$0x1] %v792_v50  ;;  %v2331_v35 = vrot.slane %v2329_v8, 4  ;;  %v2364_v25 = vshrl.u32 %v2000_v3, 16 }
 0x175   : > { %v2294_v55 = vrot.slane %v2292_v48, 4 }
 0x176   : > { %2411 = vrot.lane.b32.xlu0 %v2160_v1, %s4629_s20  ;;  %2391 = vrot.lane.b32.xlu2 %v2040_v27, %s4629_s20  ;;  %v2295_v1 = vshll.u32 %v1991_v47, 16  ;;  %v2260_v27 = vor.u32 %v2259_v20, %v5848_v6  ;;  %v2146_v47 = vsel %vm4751_vm3, %v2141_v54, %v2145_v53  ;;  %v2332_v28 = vor.u32 %v2331_v35, %v5895_v23 }
 0x177   : > { %2401 = vrot.lane.b32.xlu1 %v2098_v60, %s4629_s20  ;;  %v2202_v60 = vor.u32 %v2201_v39, %v2198_v63  ;;  %v2209_v63 = vshrl.u32 %v5853_v59, 16 }
 0x178   : > { %v1831_v40 = vpop.permute.xlu0 %1830  ;;  %v1829_v52 = vpop.permute.xlu2 %1828  ;;  %v2261_v22 = vrot.slane %v2260_v27, 4  ;;  %v1981_v27 = vld [vmem:[#allocation2 + $0x74] sm:$0x1] }
 0x179   : > { %1925 = vst.msk [vmem:[#allocation3 + $0x8] sm:$0xf] %vm1922_vm0, %v1831_v40  ;;  %v1692_v0 = vpop.permute.xlu1 %1691  ;;  %v2297_v40 = vrot.slane %v2295_v1, 5  ;;  %v2203_v5 = vrot.slane %v2202_v60, 4  ;;  %v5900_v1 = vld [vmem:[#allocation2 + $0x94] sm:$0xf] }
 0x17a   : > { %1759 = vst.msk [vmem:[#allocation3 + $0x74] sm:$0xf] %vm1729_vm15, %v1692_v0  ;;  %v2235_v0 = vrot.slane %v2233_v32, 4  ;;  %v2266_v56 = vsel %vm4751_vm3, %v2261_v22, %v2265_v51  ;;  %v2211_v61 = vrot.slane %v2209_v63, 4  ;;  %v2215_v51 = vshll.u32 %v1981_v27, 16 }
 0x17b   : > { %1924 = vst.msk [vmem:[#allocation3 + $0x4] sm:$0xf] %vm1922_vm0, %v1829_v52  ;;  %v2177_v52 = vrot.slane %v2175_v9, 5  ;;  %v2298_v7 = vor.u32 %v2297_v40, %v2294_v55  ;;  %v2208_v44 = vsel %vm4751_vm3, %v2203_v5, %v5874_v36  ;;  %v2277_v9 = vshll.u32 %v5900_v1, 16 }
 0x17c   : > { %v2236_v39 = vor.u32 %v2235_v0, %v5846_v19  ;;  %v1996_v19 = vld [vmem:[#allocation2 + $0xb0] sm:$0x1]  ;;  %v2244_v40 = vshrl.u32 %v1985_v10, 16  ;;  %v2212_v22 = vor.u32 %v2211_v61, %v5874_v36  ;;  %v2217_v37 = vrot.slane %v2215_v51, 5  ;;  %v1994_v61 = vld [vmem:[#allocation2 + $0xa8] sm:$0xf] }
 0x17d   : > { %v2178_v4 = vor.u32 %v2177_v52, %v2174_v45  ;;  %v2335_v49 = vshll.u32 %v1996_v19, 16  ;;  %v2249_v45 = vrot.slane %v2247_v29, 5  ;;  %v2340_v63 = vshrl.u32 %v1997_v30, 16 }
 0x17e   : > { %2417 = vrot.lane.b32.xlu0 %v2194_v57, %s4629_s20  ;;  %2397 = vrot.lane.b32.xlu2 %v2074_v41, %s4629_s20  ;;  %v1984_v57 = vld [vmem:[#allocation2 + $0x80] sm:$0x1]  ;;  %v2271_v41 = vshll.u32 %v1988_v14, 16  ;;  %v2246_v36 = vrot.slane %v2244_v40, 4 }
 0x17f   : > { %2407 = vrot.lane.b32.xlu1 %v2136_v2, %s4629_s20  ;;  %v2268_v2 = vshrl.u32 %v1988_v14, 16  ;;  %v2239_v20 = vshll.u32 %v1984_v57, 16  ;;  %v2337_v54 = vrot.slane %v2335_v49, 5  ;;  %v5918_v57 = vrot.slane %v2277_v9, 5 }
 0x180   : > { %v1837_v34 = vpop.permute.xlu0 %1836  ;;  %v1835_v16 = vpop.permute.xlu2 %1834  ;;  %v2273_v59 = vrot.slane %v2271_v41, 5  ;;  %v2342_v19 = vrot.slane %v2340_v63, 4  ;;  %v2316_v9 = vshrl.u32 %v1994_v61, 16 }
 0x181   : > { %1928 = vst.msk [vmem:[#allocation3 + $0x14] sm:$0xf] %vm1922_vm0, %v1837_v34  ;;  %v1827_v13 = vpop.permute.xlu1 %1826  ;;  %v2299_v34 = vrot.slane %v2298_v7, 4  ;;  %v2270_v21 = vrot.slane %v2268_v2, 4  ;;  %v2241_v48 = vrot.slane %v2239_v20, 5  ;;  %v2213_v7 = vrot.slane %v2212_v22, 4 }
 0x182   : > { %1923 = vst.msk [vmem:[#allocation3] sm:$0xf] %vm1922_vm0, %v1827_v13  ;;  %v2237_v13 = vrot.slane %v2236_v39, 4  ;;  %v2343_v39 = vshll.u32 %v1997_v30, 16  ;;  %v2281_v20 = vshrl.u32 %v5900_v1, 16 }
 0x183   : > { %1927 = vst.msk [vmem:[#allocation3 + $0x10] sm:$0xf] %vm1922_vm0, %v1835_v16  ;;  %v2304_v60 = vsel %vm4751_vm3, %v2299_v34, %v5893_v58  ;;  %v2274_v43 = vor.u32 %v2273_v59, %v2270_v21  ;;  %v5940_v21 = vld [vmem:[#allocation2 + $0x10] sm:$0xf]  ;;  %v1990_v1 = vld [vmem:[#allocation2 + $0x98] sm:$0x1] }
 0x184   : > { %v2242_v55 = vsel %vm4751_vm3, %v2237_v13, %v2241_v48  ;;  %v1998_v48 = vld [vmem:[#allocation2 + $0xb8] sm:$0xf]  ;;  %v2614_v27 = vrot.slane %v5940_v21, 5 }
 0x185   : > { %v2275_v33 = vrot.slane %v2274_v43, 4  ;;  %v2287_v43 = vshll.u32 %v1990_v1, 16 }
 0x186   : > { %2423 = vrot.lane.b32.xlu0 %v2232_v26, %s4629_s20  ;;  %2403 = vrot.lane.b32.xlu2 %v2112_v46, %s4629_s20  ;;  %v2179_v26 = vrot.slane %v2178_v4, 4  ;;  %v2305_v46 = vshrl.u32 %v5871_v15, 16  ;;  %v2366_v15 = vrot.slane %v2364_v25, 4  ;;  %v2616_v40 = vrot.slane %v2614_v27, 4 }
 0x187   : > { %2413 = vrot.lane.b32.xlu1 %v2170_v42, %s4629_s20  ;;  %v2367_v42 = vshll.u32 %v2000_v3, 16  ;;  %v2280_v41 = vsel %vm4751_vm3, %v2275_v33, %v5918_v57  ;;  %v2345_v3 = vrot.slane %v2343_v39, 5 }
 0x188   : > { %v1843_v24 = vpop.permute.xlu0 %1842  ;;  %v1841_v62 = vpop.permute.xlu2 %1840  ;;  %v2184_v5 = vsel %vm4751_vm3, %v2179_v26, %v5804_v18  ;;  %v2307_v14 = vrot.slane %v2305_v46, 4  ;;  %v1993_v18 = vld [vmem:[#allocation2 + $0xa4] sm:$0x1] }
 0x189   : > { %1931 = vst.msk [vmem:[#allocation3 + $0x20] sm:$0xf] %vm1922_vm0, %v1843_v24  ;;  %v1833_v31 = vpop.permute.xlu1 %1832  ;;  %v2333_v24 = vrot.slane %v2332_v28, 4  ;;  %v2369_v53 = vrot.slane %v2367_v42, 5  ;;  %v2311_v2 = vshll.u32 %v1993_v18, 16  ;;  %v2346_v25 = vor.u32 %v2345_v3, %v2342_v19 }
 0x18a   : > { %1926 = vst.msk [vmem:[#allocation3 + $0xc] sm:$0xf] %vm1922_vm0, %v1833_v31  ;;  %v5920_v31 = vld [vmem:[#allocation2 + $0xc4] sm:$0xf]  ;;  %v2308_v50 = vor.u32 %v2307_v14, %v5893_v58  ;;  %v2349_v42 = vshll.u32 %v1998_v48, 16 }
 0x18b   : > { %1930 = vst.msk [vmem:[#allocation3 + $0x1c] sm:$0xf] %vm1922_vm0, %v1841_v62  ;;  %v2370_v17 = vor.u32 %v2369_v53, %v2366_v15  ;;  %v2373_v8 = vshll.u32 %v5920_v31, 16  ;;  %v2377_v49 = vshrl.u32 %v5920_v31, 16  ;;  %v2289_v15 = vrot.slane %v2287_v43, 5 }
 0x18c   : > { %v2309_v35 = vrot.slane %v2308_v50, 4  ;;  %v2351_v22 = vrot.slane %v2349_v42, 5  ;;  %v2002_v53 = vld [vmem:[#allocation2 + $0xc8] sm:$0x1]  ;;  %v2522_v31 = vld [vmem:[#allocation2 + $0x24] sm:$0xe] }
 0x18d   : > { %v2371_v4 = vrot.slane %v2370_v17, 4  ;;  %v5937_v34 = vrot.slane %v2373_v8, 5  ;;  %v2379_v51 = vrot.slane %v2377_v49, 4  ;;  %v5967_v18 = vld [vmem:[#allocation2 + $0x28] sm:$0xf] }
 0x18e   : > { %2429 = vrot.lane.b32.xlu0 %v2266_v56, %s4629_s20  ;;  %2409 = vrot.lane.b32.xlu2 %v2146_v47, %s4629_s20  ;;  %v2338_v56 = vsel %vm4751_vm3, %v2333_v24, %v2337_v54  ;;  %v2218_v47 = vsel %vm4751_vm3, %v2213_v7, %v2217_v37  ;;  %v2353_v7 = vshrl.u32 %v1998_v48, 16  ;;  %v5977_v8 = vld [vmem:[#allocation2 + $0x34] sm:$0xf]  ;;  %v2532_v49 = vld [vmem:[#allocation2 + $0x4c] sm:$0xf] }
 0x18f   : > { %2419 = vrot.lane.b32.xlu1 %v2208_v44, %s4629_s20  ;;  %v2250_v44 = vor.u32 %v2249_v45, %v2246_v36  ;;  %v2380_v45 = vor.u32 %v2379_v51, %v5937_v34  ;;  %v2516_v43 = vld [vmem:[#allocation2 + $0xc] sm:$0xe] }
 0x190   : > { %v1849_v38 = vpop.permute.xlu0 %1848  ;;  %v1847_v32 = vpop.permute.xlu2 %1846  ;;  %v2355_v63 = vrot.slane %v2353_v7, 4  ;;  %v4355_v51 = vrot.slane %v2516_v43, 9  ;;  %v2550_v43 = vld [vmem:[#allocation2 + $0x94] sm:$0xf] }
 0x191   : > { %1934 = vst.msk [vmem:[#allocation3 + $0x2c] sm:$0xf] %vm1922_vm0, %v1849_v38  ;;  %v1839_v16 = vpop.permute.xlu1 %1838  ;;  %v2313_v38 = vrot.slane %v2311_v2, 5  ;;  %v2251_v59 = vrot.slane %v2250_v44, 4  ;;  %v2381_v50 = vrot.slane %v2380_v45, 4 }
 0x192   : > { %1929 = vst.msk [vmem:[#allocation3 + $0x18] sm:$0xf] %vm1922_vm0, %v1839_v16  ;;  %v2283_v16 = vrot.slane %v2281_v20, 4  ;;  %v2356_v19 = vor.u32 %v2355_v63, %v2351_v22 }
 0x193   : > { %1933 = vst.msk [vmem:[#allocation3 + $0x28] sm:$0xf] %vm1922_vm0, %v1847_v32  ;;  %v2314_v10 = vsel %vm4751_vm3, %v2309_v35, %v2313_v38  ;;  %v2518_v32 = vld [vmem:[#allocation2 + $0x14] sm:$0x1]  ;;  %v2256_v28 = vsel %vm4751_vm3, %v2251_v59, %v5848_v6  ;;  %v2347_v6 = vrot.slane %v2346_v25, 4 }
 0x194   : > { %v2284_v46 = vor.u32 %v2283_v16, %v5918_v57  ;;  %v2617_v29 = vrot.slane %v2518_v32, 5  ;;  %v2519_v38 = vld [vmem:[#allocation2 + $0x18] sm:$0xe]  ;;  %v2520_v59 = vld [vmem:[#allocation2 + $0x1c] sm:$0xf] }
 0x195   : > { %v2352_v36 = vsel %vm4751_vm3, %v2347_v6, %v2351_v22  ;;  %v4356_v16 = vrot.slane %v2519_v38, 9 }
 0x196   : > { %2435 = vrot.lane.b32.xlu0 %v2304_v60, %s4629_s20  ;;  %2415 = vrot.lane.b32.xlu2 %v2184_v5, %s4629_s20  ;;  %v2376_v60 = vsel %vm4751_vm3, %v2371_v4, %v5937_v34  ;;  %v2285_v54 = vrot.slane %v2284_v46, 4  ;;  %v2618_v14 = vsel %vm5444_vm13, %v2616_v40, %v2617_v29  ;;  %v2635_v4 = vrot.slane %v5977_v8, 5  ;;  %v2527_v34 = vld [vmem:[#allocation2 + $0x38] sm:$0x1]  ;;  %v2524_v46 = vld [vmem:[#allocation2 + $0x2c] sm:$0x1] }
 0x197   : > { %2425 = vrot.lane.b32.xlu1 %v2242_v55, %s4629_s20  ;;  %v2319_v55 = vshll.u32 %v1994_v61, 16  ;;  %v2638_v48 = vrot.slane %v2527_v34, 5  ;;  %v6007_v29 = vld [vmem:[#allocation2 + $0x58] sm:$0xf]  ;;  %v2631_v6 = vrot.slane %v2524_v46, 5 }
 0x198   : > { %v1855_v0 = vpop.permute.xlu0 %1854  ;;  %v1853_v62 = vpop.permute.xlu2 %1852  ;;  %v2290_v37 = vsel %vm4751_vm3, %v2285_v54, %v2289_v15  ;;  %v2656_v15 = vrot.slane %v6007_v29, 5  ;;  %v2549_v46 = vld [vmem:[#allocation2 + $0x90] sm:$0xe] }
 0x199   : > { %1937 = vst.msk [vmem:[#allocation3 + $0x38] sm:$0xf] %vm1922_vm0, %v1855_v0  ;;  %v1845_v52 = vpop.permute.xlu1 %1844  ;;  %v2318_v0 = vrot.slane %v2316_v9, 4  ;;  %v2321_v33 = vrot.slane %v2319_v55, 5  ;;  %v2649_v55 = vrot.slane %v2532_v49, 5 }
 0x19a   : > { %1932 = vst.msk [vmem:[#allocation3 + $0x24] sm:$0xf] %vm1922_vm0, %v1845_v52  ;;  %v2383_v52 = vshll.u32 %v2002_v53, 16  ;;  %v2536_v53 = vld [vmem:[#allocation2 + $0x5c] sm:$0x1] }
 0x19b   : > { %1936 = vst.msk [vmem:[#allocation3 + $0x34] sm:$0xf] %vm1922_vm0, %v1853_v62  ;;  %v2322_v30 = vor.u32 %v2321_v33, %v2318_v0  ;;  %v4357_v62 = vrot.slane %v2522_v31, 9  ;;  %v2615_v33 = vsel %vm5444_vm13, %v4355_v51, %v2614_v27  ;;  %v2521_v31 = vld [vmem:[#allocation2 + $0x20] sm:$0x1]  ;;  %v2651_v34 = vrot.slane %v2649_v55, 4 }
 0x19c   : > { %v2385_v2 = vrot.slane %v2383_v52, 5 }
 0x19d   : > { %v2323_v44 = vrot.slane %v2322_v30, 4 }
 0x19e   : > { %2441 = vrot.lane.b32.xlu0 %v2338_v56, %s4629_s20  ;;  %2421 = vrot.lane.b32.xlu2 %v2218_v47, %s4629_s20  ;;  %v2628_v56 = vrot.slane %v5967_v18, 5  ;;  %v1999_v47 = vld [vmem:[#allocation2 + $0xbc] sm:$0x1]  ;;  %v2658_v18 = vrot.slane %v2656_v15, 4 }
 0x19f   : > { %2431 = vrot.lane.b32.xlu1 %v2280_v41, %s4629_s20  ;;  %v2328_v35 = vsel %vm4751_vm3, %v2323_v44, %v5895_v23  ;;  %v2359_v3 = vshll.u32 %v1999_v47, 16  ;;  %v2525_v44 = vld [vmem:[#allocation2 + $0x30] sm:$0xe]  ;;  %v6038_v47 = vld [vmem:[#allocation2 + $0x7c] sm:$0xf] }
 0x1a0   : > { %v1861_v58 = vpop.permute.xlu0 %1860  ;;  %v1859_v26 = vpop.permute.xlu2 %1858  ;;  %v2629_v20 = vsel %vm5444_vm13, %v4357_v62, %v2628_v56  ;;  %v4358_v38 = vrot.slane %v2525_v44, 9  ;;  %v2559_v44 = vld [vmem:[#allocation2 + $0xb8] sm:$0xf] }
 0x1a1   : > { %1940 = vst.msk [vmem:[#allocation3 + $0x44] sm:$0xf] %vm1922_vm0, %v1861_v58  ;;  %v1851_v13 = vpop.permute.xlu1 %1850  ;;  %v2386_v58 = vsel %vm4751_vm3, %v2381_v50, %v2385_v2  ;;  %v2361_v61 = vrot.slane %v2359_v3, 5  ;;  %v2677_v3 = vrot.slane %v6038_v47, 5 }
 0x1a2   : > { %1935 = vst.msk [vmem:[#allocation3 + $0x30] sm:$0xf] %vm1922_vm0, %v1851_v13  ;;  %v2637_v13 = vrot.slane %v2635_v4, 4 }
 0x1a3   : > { %1939 = vst.msk [vmem:[#allocation3 + $0x40] sm:$0xf] %vm1922_vm0, %v1859_v26  ;;  %v2621_v26 = vrot.slane %v2520_v59, 5 }
 0x1a4   : > { %v2639_v32 = vsel %vm5444_vm13, %v2637_v13, %v2638_v48  ;;  %v2545_v13 = vld [vmem:[#allocation2 + $0x80] sm:$0x1] }
 0x1a5   : > { %v2622_v25 = vsel %vm5444_vm13, %v4356_v16, %v2621_v26  ;;  %v2623_v7 = vrot.slane %v2621_v26, 4  ;;  %v2537_v16 = vld [vmem:[#allocation2 + $0x60] sm:$0xe]  ;;  %v2538_v26 = vld [vmem:[#allocation2 + $0x64] sm:$0xf] }
 0x1a6   : > { %2447 = vrot.lane.b32.xlu0 %v2376_v60, %s4629_s20  ;;  %2427 = vrot.lane.b32.xlu2 %v2256_v28, %s4629_s20  ;;  %v2357_v60 = vrot.slane %v2356_v19, 4  ;;  %v2531_v28 = vld [vmem:[#allocation2 + $0x48] sm:$0xe]  ;;  %v4362_v8 = vrot.slane %v2537_v16, 9 }
 0x1a7   : > { %2437 = vrot.lane.b32.xlu1 %v2314_v10, %s4629_s20  ;;  %v4360_v9 = vrot.slane %v2531_v28, 9 }
 0x1a8   : > { %v1867_v5 = vpop.permute.xlu0 %1866  ;;  %v1865_v57 = vpop.permute.xlu2 %1864  ;;  %v2362_v42 = vsel %vm4751_vm3, %v2357_v60, %v2361_v61  ;;  %v2679_v60 = vrot.slane %v2677_v3, 4  ;;  %v2680_v61 = vrot.slane %v2545_v13, 5 }
 0x1a9   : > { %1943 = vst.msk [vmem:[#allocation3 + $0x50] sm:$0xf] %vm1922_vm0, %v1867_v5  ;;  %v1857_v24 = vpop.permute.xlu1 %1856  ;;  %v2630_v5 = vrot.slane %v2628_v56, 4  ;;  %v2650_v54 = vsel %vm5444_vm13, %v4360_v9, %v2649_v55  ;;  %v2540_v56 = vld [vmem:[#allocation2 + $0x6c] sm:$0xe] }
 0x1aa   : > { %1938 = vst.msk [vmem:[#allocation3 + $0x3c] sm:$0xf] %vm1922_vm0, %v1857_v24  ;;  %v4363_v63 = vrot.slane %v2540_v56, 9 }
 0x1ab   : > { %1942 = vst.msk [vmem:[#allocation3 + $0x4c] sm:$0xf] %vm1922_vm0, %v1865_v57  ;;  %v2632_v0 = vsel %vm5444_vm13, %v2630_v5, %v2631_v6  ;;  %v2528_v57 = vld [vmem:[#allocation2 + $0x3c] sm:$0xe]  ;;  %v2534_v5 = vld [vmem:[#allocation2 + $0x54] sm:$0xe] }
 0x1ac   : > { %v4359_v21 = vrot.slane %v2528_v57, 9  ;;  %v4366_v6 = vrot.slane %v2549_v46, 9 }
 0x1ae   : > { %2726 = vrot.lane.b32.xlu0 %v2618_v14, %s4630_s22  ;;  %2433 = vrot.lane.b32.xlu2 %v2290_v37, %s4629_s20  ;;  %v2529_v14 = vld [vmem:[#allocation2 + $0x40] sm:$0xf]  ;;  %v2624_v37 = vrot.slane %v2521_v31, 5 }
 0x1af   : > { %2443 = vrot.lane.b32.xlu1 %v2352_v36, %s4629_s20  ;;  %v2659_v36 = vrot.slane %v2536_v53, 5  ;;  %v2642_v52 = vrot.slane %v2529_v14, 5 }
 0x1b0   : > { %v1873_v17 = vpop.permute.xlu0 %1872  ;;  %v1871_v39 = vpop.permute.xlu2 %1870  ;;  %v2625_v2 = vsel %vm5444_vm13, %v2623_v7, %v2624_v37 }
 0x1b1   : > { %1946 = vst.msk [vmem:[#allocation3 + $0x5c] sm:$0xf] %vm1922_vm0, %v1873_v17  ;;  %v1863_v41 = vpop.permute.xlu1 %1862  ;;  %v2660_v62 = vsel %vm5444_vm13, %v2658_v18, %v2659_v36  ;;  %v2541_v17 = vld [vmem:[#allocation2 + $0x70] sm:$0xf]  ;;  %v2643_v50 = vsel %vm5444_vm13, %v4359_v21, %v2642_v52  ;;  %v2554_v18 = vld [vmem:[#allocation2 + $0xa4] sm:$0x1] }
 0x1b2   : > { %1941 = vst.msk [vmem:[#allocation3 + $0x48] sm:$0xf] %vm1922_vm0, %v1863_v41  ;;  %v2533_v41 = vld [vmem:[#allocation2 + $0x50] sm:$0x1]  ;;  %v2546_v21 = vld [vmem:[#allocation2 + $0x84] sm:$0xe] }
 0x1b3   : > { %1945 = vst.msk [vmem:[#allocation3 + $0x58] sm:$0xf] %vm1922_vm0, %v1871_v39  ;;  %v2670_v39 = vrot.slane %v2541_v17, 5  ;;  %v2701_v37 = vrot.slane %v2554_v18, 5  ;;  %v4365_v29 = vrot.slane %v2546_v21, 9 }
 0x1b5   : > { %v2671_v19 = vsel %vm5444_vm13, %v4363_v63, %v2670_v39 }
 0x1b6   : > { %2732 = vrot.lane.b32.xlu0 %v2629_v20, %s4630_s22  ;;  %2439 = vrot.lane.b32.xlu2 %v2328_v35, %s4629_s20 }
 0x1b7   : > { %2449 = vrot.lane.b32.xlu1 %v2386_v58, %s4629_s20  ;;  %v2652_v58 = vrot.slane %v2533_v41, 5  ;;  %v2558_v41 = vld [vmem:[#allocation2 + $0xb4] sm:$0xe] }
 0x1b8   : > { %v1879_v1 = vpop.permute.xlu0 %1878  ;;  %v1877_v10 = vpop.permute.xlu2 %1876 }
 0x1b9   : > { %1949 = vst.msk [vmem:[#allocation3 + $0x68] sm:$0xf] %vm1922_vm0, %v1879_v1  ;;  %v1869_v23 = vpop.permute.xlu1 %1868  ;;  %v2653_v48 = vsel %vm5444_vm13, %v2651_v34, %v2652_v58  ;;  %v2636_v1 = vsel %vm5444_vm13, %v4358_v38, %v2635_v4  ;;  %v2644_v4 = vrot.slane %v2642_v52, 4  ;;  %v2547_v52 = vld [vmem:[#allocation2 + $0x88] sm:$0xf]  ;;  %v4369_v58 = vrot.slane %v2558_v41, 9 }
 0x1ba   : > { %1944 = vst.msk [vmem:[#allocation3 + $0x54] sm:$0xf] %vm1922_vm0, %v1869_v23  ;;  %v2530_v23 = vld [vmem:[#allocation2 + $0x44] sm:$0x1]  ;;  %v2543_v34 = vld [vmem:[#allocation2 + $0x78] sm:$0xe] }
 0x1bb   : > { %1948 = vst.msk [vmem:[#allocation3 + $0x64] sm:$0xf] %vm1922_vm0, %v1877_v10  ;;  %v2645_v49 = vrot.slane %v2530_v23, 5 }
 0x1bd   : > { %v2646_v55 = vsel %vm5444_vm13, %v2644_v4, %v2645_v49 }
 0x1be   : > { %2738 = vrot.lane.b32.xlu0 %v2639_v32, %s4630_s22  ;;  %2445 = vrot.lane.b32.xlu2 %v2362_v42, %s4629_s20  ;;  %v2663_v32 = vrot.slane %v2538_v26, 5  ;;  %v2681_v42 = vsel %vm5444_vm13, %v2679_v60, %v2680_v61  ;;  %v2563_v60 = vld [vmem:[#allocation2 + $0xc8] sm:$0x1] }
 0x1bf   : > { %2728 = vrot.lane.b32.xlu1 %v2622_v25, %s4630_s22  ;;  %v2722_v49 = vrot.slane %v2563_v60, 5 }
 0x1c0   : > { %v1885_v40 = vpop.permute.xlu0 %1884  ;;  %v1883_v24 = vpop.permute.xlu2 %1882  ;;  %v2664_v9 = vsel %vm5444_vm13, %v4362_v8, %v2663_v32  ;;  %v2555_v8 = vld [vmem:[#allocation2 + $0xa8] sm:$0xe] }
 0x1c1   : > { %1952 = vst.msk [vmem:[#allocation3 + $0x74] sm:$0xf] %vm1922_vm0, %v1885_v40  ;;  %v1875_v22 = vpop.permute.xlu1 %1874  ;;  %v2542_v40 = vld [vmem:[#allocation2 + $0x74] sm:$0x1]  ;;  %v4368_v47 = vrot.slane %v2555_v8, 9 }
 0x1c2   : > { %1947 = vst.msk [vmem:[#allocation3 + $0x60] sm:$0xf] %vm1922_vm0, %v1875_v22  ;;  %v2691_v22 = vrot.slane %v2550_v43, 5  ;;  %v2673_v53 = vrot.slane %v2542_v40, 5  ;;  %v3084_v8 = vld [vmem:[#allocation2 + $0xac] sm:$0xf] }
 0x1c3   : > { %1951 = vst.msk [vmem:[#allocation3 + $0x70] sm:$0xf] %vm1922_vm0, %v1883_v24  ;;  %v6069_v24 = vld [vmem:[#allocation2 + $0xa0] sm:$0xf] }
 0x1c4   : > { %v2692_v14 = vsel %vm5444_vm13, %v4366_v6, %v2691_v22  ;;  %v2698_v31 = vrot.slane %v6069_v24, 5  ;;  %v2560_v6 = vld [vmem:[#allocation2 + $0xbc] sm:$0x1] }
 0x1c6   : > { %2744 = vrot.lane.b32.xlu0 %v2650_v54, %s4630_s22  ;;  %2724 = vrot.lane.b32.xlu2 %v2615_v33, %s4630_s22  ;;  %v2672_v54 = vrot.slane %v2670_v39, 4  ;;  %v4361_v33 = vrot.slane %v2534_v5, 9  ;;  %v2700_v7 = vrot.slane %v2698_v31, 4 }
 0x1c7   : > { %2734 = vrot.lane.b32.xlu1 %v2632_v0, %s4630_s22 }
 0x1c8   : > { %v2388_v45 = vpop.permute.xlu0 %2387  ;;  %v1889_v30 = vpop.permute.xlu2 %1888  ;;  %v2674_v36 = vsel %vm5444_vm13, %v2672_v54, %v2673_v53  ;;  %v2715_v53 = vrot.slane %v2560_v6, 5  ;;  %v3085_v6 = vld [vmem:[#allocation2 + $0xb0] sm:$0x1] }
 0x1c9   : > { %2484 = vst.msk [vmem:[#allocation3] sm:$0xf] %vm2483_vm1, %v2388_v45  ;;  %v1881_v27 = vpop.permute.xlu1 %1880  ;;  %v2657_v45 = vsel %vm5444_vm13, %v4361_v33, %v2656_v15  ;;  %v2665_v15 = vrot.slane %v2663_v32, 4  ;;  %v2556_v32 = vld [vmem:[#allocation2 + $0xac] sm:$0xf] }
 0x1ca   : > { %1950 = vst.msk [vmem:[#allocation3 + $0x6c] sm:$0xf] %vm1922_vm0, %v1881_v27  ;;  %v2539_v27 = vld [vmem:[#allocation2 + $0x68] sm:$0x1] }
 0x1cb   : > { %1954 = vst.msk [vmem:[#allocation3 + $0x7c] sm:$0xf] %vm1922_vm0, %v1889_v30  ;;  %v2666_v17 = vrot.slane %v2539_v27, 5 }
 0x1cd   : > { %v2667_v39 = vsel %vm5444_vm13, %v2665_v15, %v2666_v17 }
 0x1ce   : > { %2750 = vrot.lane.b32.xlu0 %v2660_v62, %s4630_s22  ;;  %2730 = vrot.lane.b32.xlu2 %v2625_v2, %s4630_s22  ;;  %v2684_v62 = vrot.slane %v2547_v52, 5  ;;  %v2702_v2 = vsel %vm5444_vm13, %v2700_v7, %v2701_v37  ;;  %v2859_v37 = vld [vmem:[#allocation2 + $0x34] sm:$0xf] }
 0x1cf   : > { %2740 = vrot.lane.b32.xlu1 %v2643_v50, %s4630_s22 }
 0x1d0   : > { %v2394_v20 = vpop.permute.xlu0 %2393  ;;  %v2392_v59 = vpop.permute.xlu2 %2391  ;;  %v2685_v63 = vsel %vm5444_vm13, %v4365_v29, %v2684_v62  ;;  %v2561_v29 = vld [vmem:[#allocation2 + $0xc0] sm:$0xe] }
 0x1d1   : > { %2487 = vst.msk [vmem:[#allocation3 + $0xc] sm:$0xf] %vm2483_vm1, %v2394_v20  ;;  %v1887_v35 = vpop.permute.xlu1 %1886  ;;  %v2551_v20 = vld [vmem:[#allocation2 + $0x98] sm:$0x1]  ;;  %v4370_v15 = vrot.slane %v2561_v29, 9 }
 0x1d2   : > { %1953 = vst.msk [vmem:[#allocation3 + $0x78] sm:$0xf] %vm1922_vm0, %v1887_v35  ;;  %v2712_v35 = vrot.slane %v2559_v44, 5  ;;  %v2694_v13 = vrot.slane %v2551_v20, 5  ;;  %v2865_v20 = vld [vmem:[#allocation2 + $0x58] sm:$0xf] }
 0x1d3   : > { %2486 = vst.msk [vmem:[#allocation3 + $0x8] sm:$0xf] %vm2483_vm1, %v2392_v59  ;;  %v6100_v59 = vld [vmem:[#allocation2 + $0xc4] sm:$0xf]  ;;  %v3644_v29 = vld [vmem:[#allocation2 + $0xa8] sm:$0xe] }
 0x1d4   : > { %v2713_v26 = vsel %vm5444_vm13, %v4369_v58, %v2712_v35  ;;  %v2719_v23 = vrot.slane %v6100_v59, 5  ;;  %v2714_v54 = vrot.slane %v2712_v35, 4  ;;  %v2855_v58 = vld [vmem:[#allocation2 + $0x1c] sm:$0xf] }
 0x1d6   : > { %2756 = vrot.lane.b32.xlu0 %v2671_v19, %s4630_s22  ;;  %2736 = vrot.lane.b32.xlu2 %v2636_v1, %s4630_s22  ;;  %v2693_v19 = vrot.slane %v2691_v22, 4  ;;  %v4364_v1 = vrot.slane %v2543_v34, 9  ;;  %v2721_v4 = vrot.slane %v2719_v23, 4  ;;  %v2552_v22 = vld [vmem:[#allocation2 + $0x9c] sm:$0xe]  ;;  %v2716_v18 = vsel %vm5444_vm13, %v2714_v54, %v2715_v53 }
 0x1d7   : > { %2746 = vrot.lane.b32.xlu1 %v2653_v48, %s4630_s22  ;;  %v4367_v33 = vrot.slane %v2552_v22, 9  ;;  %v2720_v41 = vsel %vm5444_vm13, %v4370_v15, %v2719_v23  ;;  %v2860_v34 = vld [vmem:[#allocation2 + $0x3c] sm:$0xf] }
 0x1d8   : > { %v2400_v10 = vpop.permute.xlu0 %2399  ;;  %v2398_v25 = vpop.permute.xlu2 %2397  ;;  %v2695_v61 = vsel %vm5444_vm13, %v2693_v19, %v2694_v13  ;;  %v2868_v13 = vld [vmem:[#allocation2 + $0x6c] sm:$0xf] }
 0x1d9   : > { %2490 = vst.msk [vmem:[#allocation3 + $0x18] sm:$0xf] %vm2483_vm1, %v2400_v10  ;;  %v2390_v28 = vpop.permute.xlu1 %2389  ;;  %v2678_v10 = vsel %vm5444_vm13, %v4364_v1, %v2677_v3  ;;  %v2686_v3 = vrot.slane %v2684_v62, 4 }
 0x1da   : > { %2485 = vst.msk [vmem:[#allocation3 + $0x4] sm:$0xf] %vm2483_vm1, %v2390_v28  ;;  %v2548_v28 = vld [vmem:[#allocation2 + $0x8c] sm:$0x1] }
 0x1db   : > { %2489 = vst.msk [vmem:[#allocation3 + $0x14] sm:$0xf] %vm2483_vm1, %v2398_v25  ;;  %v2687_v43 = vrot.slane %v2548_v28, 5  ;;  %v2871_v28 = vld [vmem:[#allocation2 + $0x7c] sm:$0xf] }
 0x1dd   : > { %v2688_v5 = vsel %vm5444_vm13, %v2686_v3, %v2687_v43  ;;  %v2861_v3 = vld [vmem:[#allocation2 + $0x40] sm:$0xf] }
 0x1de   : > { %2762 = vrot.lane.b32.xlu0 %v2681_v42, %s4630_s22  ;;  %2742 = vrot.lane.b32.xlu2 %v2646_v55, %s4630_s22  ;;  %v2705_v42 = vrot.slane %v2556_v32, 5  ;;  %v2723_v55 = vsel %vm5444_vm13, %v2721_v4, %v2722_v49 }
 0x1df   : > { %2752 = vrot.lane.b32.xlu1 %v2664_v9, %s4630_s22 }
 0x1e0   : > { %v2406_v51 = vpop.permute.xlu0 %2405  ;;  %v2404_v57 = vpop.permute.xlu2 %2403  ;;  %v2706_v40 = vsel %vm5444_vm13, %v4368_v47, %v2705_v42  ;;  %v2707_v27 = vrot.slane %v2705_v42, 4  ;;  %v3393_v47 = vshll.u32 %v3084_v8, 16  ;;  %v3397_v42 = vshrl.u32 %v3084_v8, 16 }
 0x1e1   : > { %2493 = vst.msk [vmem:[#allocation3 + $0x24] sm:$0xf] %vm2483_vm1, %v2406_v51  ;;  %v2396_v0 = vpop.permute.xlu1 %2395 }
 0x1e2   : > { %2488 = vst.msk [vmem:[#allocation3 + $0x10] sm:$0xf] %vm2483_vm1, %v2396_v0 }
 0x1e3   : > { %2492 = vst.msk [vmem:[#allocation3 + $0x20] sm:$0xf] %vm2483_vm1, %v2404_v57 }
 0x1e6   : > { %2768 = vrot.lane.b32.xlu0 %v2692_v14, %s4630_s22  ;;  %2748 = vrot.lane.b32.xlu2 %v2657_v45, %s4630_s22  ;;  %v2856_v14 = vld [vmem:[#allocation2 + $0x24] sm:$0xf]  ;;  %v2557_v45 = vld [vmem:[#allocation2 + $0xb0] sm:$0x1] }
 0x1e7   : > { %2758 = vrot.lane.b32.xlu1 %v2674_v36, %s4630_s22  ;;  %v2699_v36 = vsel %vm5444_vm13, %v4367_v33, %v2698_v31  ;;  %v2708_v7 = vrot.slane %v2557_v45, 5  ;;  %v2854_v31 = vld [vmem:[#allocation2 + $0x18] sm:$0xf]  ;;  %v2869_v33 = vld [vmem:[#allocation2 + $0x70] sm:$0xf] }
 0x1e8   : > { %v2412_v30 = vpop.permute.xlu0 %2411  ;;  %v2410_v50 = vpop.permute.xlu2 %2409 }
 0x1e9   : > { %2496 = vst.msk [vmem:[#allocation3 + $0x30] sm:$0xf] %vm2483_vm1, %v2412_v30  ;;  %v2402_v56 = vpop.permute.xlu1 %2401  ;;  %v2709_v30 = vsel %vm5444_vm13, %v2707_v27, %v2708_v7  ;;  %v3073_v7 = vld [vmem:[#allocation2 + $0x80] sm:$0x1] }
 0x1ea   : > { %2491 = vst.msk [vmem:[#allocation3 + $0x1c] sm:$0xf] %vm2483_vm1, %v2402_v56 }
 0x1eb   : > { %2495 = vst.msk [vmem:[#allocation3 + $0x2c] sm:$0xf] %vm2483_vm1, %v2410_v50  ;;  %v2862_v50 = vld [vmem:[#allocation2 + $0x48] sm:$0xf] }
 0x1ee   : > { %2774 = vrot.lane.b32.xlu0 %v2702_v2, %s4630_s22  ;;  %2754 = vrot.lane.b32.xlu2 %v2667_v39, %s4630_s22  ;;  %v2857_v2 = vld [vmem:[#allocation2 + $0x28] sm:$0xf] }
 0x1ef   : > { %2764 = vrot.lane.b32.xlu1 %v2685_v63, %s4630_s22 }
 0x1f0   : > { %v2418_v38 = vpop.permute.xlu0 %2417  ;;  %v2416_v16 = vpop.permute.xlu2 %2415 }
 0x1f1   : > { %2499 = vst.msk [vmem:[#allocation3 + $0x3c] sm:$0xf] %vm2483_vm1, %v2418_v38  ;;  %v2408_v48 = vpop.permute.xlu1 %2407  ;;  %v3071_v38 = vld [vmem:[#allocation2 + $0x78] sm:$0xf] }
 0x1f2   : > { %2494 = vst.msk [vmem:[#allocation3 + $0x28] sm:$0xf] %vm2483_vm1, %v2408_v48  ;;  %v3288_v48 = vshrl.u32 %v3071_v38, 16  ;;  %v3291_v1 = vshll.u32 %v3071_v38, 16 }
 0x1f3   : > { %2498 = vst.msk [vmem:[#allocation3 + $0x38] sm:$0xf] %vm2483_vm1, %v2416_v16  ;;  %v2863_v16 = vld [vmem:[#allocation2 + $0x4c] sm:$0xf] }
 0x1f4   : > { %v3290_v23 = vrot.slane %v3288_v48, 4  ;;  %v3293_v60 = vrot.slane %v3291_v1, 5  ;;  %v3083_v48 = vld [vmem:[#allocation2 + $0xa8] sm:$0xf] }
 0x1f6   : > { %2780 = vrot.lane.b32.xlu0 %v2713_v26, %s4630_s22  ;;  %2760 = vrot.lane.b32.xlu2 %v2678_v10, %s4630_s22  ;;  %v2858_v26 = vld [vmem:[#allocation2 + $0x30] sm:$0xf]  ;;  %v3072_v10 = vld [vmem:[#allocation2 + $0x7c] sm:$0xf]  ;;  %v3294_v49 = vor.u32 %v3293_v60, %v3290_v23  ;;  %v3384_v60 = vshrl.u32 %v3083_v48, 16 }
 0x1f7   : > { %2770 = vrot.lane.b32.xlu1 %v2695_v61, %s4630_s22  ;;  %v6213_v23 = vld [vmem:[#allocation2 + $0x7c] sm:$0xf] }
 0x1f8   : > { %v2424_v25 = vpop.permute.xlu0 %2423  ;;  %v2422_v9 = vpop.permute.xlu2 %2421  ;;  %v3295_v43 = vrot.slane %v3294_v49, 4 }
 0x1f9   : > { %2502 = vst.msk [vmem:[#allocation3 + $0x48] sm:$0xf] %vm2483_vm1, %v2424_v25  ;;  %v2414_v46 = vpop.permute.xlu1 %2413  ;;  %v3297_v25 = vshll.u32 %v3072_v10, 16 }
 0x1fa   : > { %2497 = vst.msk [vmem:[#allocation3 + $0x34] sm:$0xf] %vm2483_vm1, %v2414_v46  ;;  %v2866_v46 = vld [vmem:[#allocation2 + $0x60] sm:$0xf] }
 0x1fb   : > { %2501 = vst.msk [vmem:[#allocation3 + $0x44] sm:$0xf] %vm2483_vm1, %v2422_v9  ;;  %v3299_v9 = vrot.slane %v3297_v25, 5  ;;  %v3386_v25 = vrot.slane %v3384_v60, 4 }
 0x1fd   : > { %v3300_v54 = vsel %vm4751_vm3, %v3295_v43, %v3299_v9  ;;  %v3608_v43 = vld [vmem:[#allocation2 + $0x18] sm:$0xe] }
 0x1fe   : > { %2786 = vrot.lane.b32.xlu0 %v2723_v55, %s4630_s22  ;;  %2766 = vrot.lane.b32.xlu2 %v2688_v5, %s4630_s22  ;;  %v6178_v55 = vrot.slane %v3393_v47, 5 }
 0x1ff   : > { %2776 = vrot.lane.b32.xlu1 %v2706_v40, %s4630_s22  ;;  %v3399_v40 = vrot.slane %v3397_v42, 4  ;;  %v3059_v42 = vld [vmem:[#allocation2 + $0x48] sm:$0xf] }
 0x200   : > { %v2430_v51 = vpop.permute.xlu0 %2429  ;;  %v2428_v57 = vpop.permute.xlu2 %2427 }
 0x201   : > { %2505 = vst.msk [vmem:[#allocation3 + $0x54] sm:$0xf] %vm2483_vm1, %v2430_v51  ;;  %v2420_v0 = vpop.permute.xlu1 %2419  ;;  %v3400_v53 = vor.u32 %v3399_v40, %v6178_v55 }
 0x202   : > { %2500 = vst.msk [vmem:[#allocation3 + $0x40] sm:$0xf] %vm2483_vm1, %v2420_v0  ;;  %v3403_v0 = vshll.u32 %v3085_v6, 16  ;;  %v3195_v6 = vshll.u32 %v3059_v42, 16 }
 0x203   : > { %2504 = vst.msk [vmem:[#allocation3 + $0x50] sm:$0xf] %vm2483_vm1, %v2428_v57  ;;  %v3301_v57 = vshrl.u32 %v3072_v10, 16 }
 0x206   : > { %2922 = vrot.lane.b32.xlu0 %v2856_v14, %s4631_s23  ;;  %2772 = vrot.lane.b32.xlu2 %v2699_v36, %s4630_s22  ;;  %v2864_v14 = vld [vmem:[#allocation2 + $0x54] sm:$0xf]  ;;  %v3405_v36 = vrot.slane %v3403_v0, 5 }
 0x207   : > { %2782 = vrot.lane.b32.xlu1 %v2716_v18, %s4630_s22  ;;  %v3401_v18 = vrot.slane %v3400_v53, 4  ;;  %v4371_v53 = vrot.slane %v3608_v43, 9 }
 0x208   : > { %v2436_v21 = vpop.permute.xlu0 %2435  ;;  %v2434_v24 = vpop.permute.xlu2 %2433 }
 0x209   : > { %2508 = vst.msk [vmem:[#allocation3 + $0x60] sm:$0xf] %vm2483_vm1, %v2436_v21  ;;  %v2426_v52 = vpop.permute.xlu1 %2425  ;;  %v3048_v21 = vld [vmem:[#allocation2 + $0x1c] sm:$0xf] }
 0x20a   : > { %2503 = vst.msk [vmem:[#allocation3 + $0x4c] sm:$0xf] %vm2483_vm1, %v2426_v52  ;;  %v3303_v52 = vrot.slane %v3301_v57, 4  ;;  %v6230_v57 = vld [vmem:[#allocation2 + $0x4c] sm:$0xf] }
 0x20b   : > { %2507 = vst.msk [vmem:[#allocation3 + $0x5c] sm:$0xf] %vm2483_vm1, %v2434_v24 }
 0x20c   : > { %v3304_v15 = vor.u32 %v3303_v52, %v3299_v9  ;;  %v6223_v9 = vld [vmem:[#allocation2 + $0x1c] sm:$0xf] }
 0x20d   : > { %v3706_v0 = vrot.slane %v6223_v9, 5  ;;  %v3061_v9 = vld [vmem:[#allocation2 + $0x50] sm:$0x1] }
 0x20e   : > { %2928 = vrot.lane.b32.xlu0 %v2859_v37, %s4631_s23  ;;  %2778 = vrot.lane.b32.xlu2 %v2709_v30, %s4630_s22  ;;  %v3406_v37 = vsel %vm4751_vm3, %v3401_v18, %v3405_v36  ;;  %v3109_v30 = vshrl.u32 %v3048_v21, 16 }
 0x20f   : > { %2918 = vrot.lane.b32.xlu1 %v2854_v31, %s4631_s23  ;;  %v3105_v31 = vshll.u32 %v3048_v21, 16 }
 0x210   : > { %v2442_v62 = vpop.permute.xlu0 %2441  ;;  %v2440_v17 = vpop.permute.xlu2 %2439 }
 0x211   : > { %2511 = vst.msk [vmem:[#allocation3 + $0x6c] sm:$0xf] %vm2483_vm1, %v2442_v62  ;;  %v2432_v56 = vpop.permute.xlu1 %2431  ;;  %v6196_v62 = vld [vmem:[#allocation2 + $0xac] sm:$0xf] }
 0x212   : > { %2506 = vst.msk [vmem:[#allocation3 + $0x58] sm:$0xf] %vm2483_vm1, %v2432_v56  ;;  %v2878_v56 = vld [vmem:[#allocation2 + $0xa8] sm:$0xf] }
 0x213   : > { %2510 = vst.msk [vmem:[#allocation3 + $0x68] sm:$0xf] %vm2483_vm1, %v2440_v17  ;;  %v3307_v17 = vshll.u32 %v3073_v7, 16 }
 0x216   : > { %2934 = vrot.lane.b32.xlu0 %v2862_v50, %s4631_s23  ;;  %2784 = vrot.lane.b32.xlu2 %v2720_v41, %s4630_s22  ;;  %v2867_v50 = vld [vmem:[#allocation2 + $0x64] sm:$0xf]  ;;  %v3790_v41 = vrot.slane %v6196_v62, 5 }
 0x217   : > { %2924 = vrot.lane.b32.xlu1 %v2857_v2, %s4631_s23  ;;  %v4383_v2 = vrot.slane %v3644_v29, 9 }
 0x218   : > { %v2448_v44 = vpop.permute.xlu0 %2447  ;;  %v2446_v39 = vpop.permute.xlu2 %2445 }
 0x219   : > { %2514 = vst.msk [vmem:[#allocation3 + $0x78] sm:$0xf] %vm2483_vm1, %v2448_v44  ;;  %v2438_v63 = vpop.permute.xlu1 %2437  ;;  %v6200_v44 = vrot.slane %v3105_v31, 5  ;;  %v3047_v31 = vld [vmem:[#allocation2 + $0x18] sm:$0xf] }
 0x21a   : > { %2509 = vst.msk [vmem:[#allocation3 + $0x64] sm:$0xf] %vm2483_vm1, %v2438_v63  ;;  %v3111_v63 = vrot.slane %v3109_v30, 4  ;;  %v3622_v30 = vld [vmem:[#allocation2 + $0x50] sm:$0x1] }
 0x21b   : > { %2513 = vst.msk [vmem:[#allocation3 + $0x74] sm:$0xf] %vm2483_vm1, %v2446_v39 }
 0x21e   : > { %2940 = vrot.lane.b32.xlu0 %v2865_v20, %s4631_s23  ;;  %2920 = vrot.lane.b32.xlu2 %v2855_v58, %s4631_s23  ;;  %v3049_v20 = vld [vmem:[#allocation2 + $0x20] sm:$0x1]  ;;  %v3309_v58 = vrot.slane %v3307_v17, 5  ;;  %v3096_v17 = vshrl.u32 %v3047_v31, 16 }
 0x21f   : > { %2930 = vrot.lane.b32.xlu1 %v2860_v34, %s4631_s23  ;;  %v3305_v34 = vrot.slane %v3304_v15, 4 }
 0x220   : > { %v2727_v35 = vpop.permute.xlu0 %2726  ;;  %v2725_v19 = vpop.permute.xlu2 %2724 }
 0x221   : > { %2822 = vst.msk [vmem:[#allocation3 + $0x4] sm:$0xf] %vm2820_vm2, %v2727_v35  ;;  %v2444_v59 = vpop.permute.xlu1 %2443  ;;  %v3310_v1 = vsel %vm4751_vm3, %v3305_v34, %v3309_v58 }
 0x222   : > { %2512 = vst.msk [vmem:[#allocation3 + $0x70] sm:$0xf] %vm2483_vm1, %v2444_v59  ;;  %v3791_v59 = vsel %vm5444_vm13, %v4383_v2, %v3790_v41  ;;  %v3634_v2 = vld [vmem:[#allocation2 + $0x80] sm:$0x1] }
 0x223   : > { %2821 = vst.msk [vmem:[#allocation3] sm:$0xf] %vm2820_vm2, %v2725_v19  ;;  %v3112_v19 = vor.u32 %v3111_v63, %v6200_v44  ;;  %v3737_v63 = vrot.slane %v3622_v30, 5 }
 0x225   : > { %v3113_v10 = vrot.slane %v3112_v19, 4 }
 0x226   : > { %2946 = vrot.lane.b32.xlu0 %v2868_v13, %s4631_s23  ;;  %2926 = vrot.lane.b32.xlu2 %v2858_v26, %s4631_s23  ;;  %v3115_v13 = vshll.u32 %v3049_v20, 16  ;;  %v3632_v26 = vld [vmem:[#allocation2 + $0x78] sm:$0xe]  ;;  %v3075_v20 = vld [vmem:[#allocation2 + $0x88] sm:$0xf] }
 0x227   : > { %2936 = vrot.lane.b32.xlu1 %v2863_v16, %s4631_s23  ;;  %v2870_v16 = vld [vmem:[#allocation2 + $0x78] sm:$0xf] }
 0x228   : > { %v2733_v61 = vpop.permute.xlu0 %2732  ;;  %v2731_v4 = vpop.permute.xlu2 %2730  ;;  %v3117_v8 = vrot.slane %v3115_v13, 5 }
 0x229   : > { %2825 = vst.msk [vmem:[#allocation3 + $0x10] sm:$0xf] %vm2820_vm2, %v2733_v61  ;;  %v2450_v32 = vpop.permute.xlu1 %2449  ;;  %v3387_v61 = vshll.u32 %v3083_v48, 16 }
 0x22a   : > { %2515 = vst.msk [vmem:[#allocation3 + $0x7c] sm:$0xf] %vm2483_vm1, %v2450_v32 }
 0x22b   : > { %2824 = vst.msk [vmem:[#allocation3 + $0xc] sm:$0xf] %vm2820_vm2, %v2731_v4  ;;  %v3762_v4 = vrot.slane %v6213_v23, 5  ;;  %v3389_v47 = vrot.slane %v3387_v61, 5  ;;  %v3610_v61 = vld [vmem:[#allocation2 + $0x20] sm:$0x1] }
 0x22e   : > { %2952 = vrot.lane.b32.xlu0 %v2871_v28, %s4631_s23  ;;  %2932 = vrot.lane.b32.xlu2 %v2861_v3, %s4631_s23  ;;  %v4379_v28 = vrot.slane %v3632_v26, 9  ;;  %v3118_v3 = vsel %vm4751_vm3, %v3113_v10, %v3117_v8 }
 0x22f   : > { %2942 = vrot.lane.b32.xlu1 %v2866_v46, %s4631_s23 }
 0x230   : > { %v2739_v5 = vpop.permute.xlu0 %2738  ;;  %v2737_v51 = vpop.permute.xlu2 %2736  ;;  %v3763_v40 = vsel %vm5444_vm13, %v4379_v28, %v3762_v4 }
 0x231   : > { %2828 = vst.msk [vmem:[#allocation3 + $0x1c] sm:$0xf] %vm2820_vm2, %v2739_v5  ;;  %v2729_v22 = vpop.permute.xlu1 %2728  ;;  %v3192_v5 = vshrl.u32 %v3059_v42, 16 }
 0x232   : > { %2823 = vst.msk [vmem:[#allocation3 + $0x8] sm:$0xf] %vm2820_vm2, %v2729_v22  ;;  %v2879_v22 = vld [vmem:[#allocation2 + $0xac] sm:$0xf] }
 0x233   : > { %2827 = vst.msk [vmem:[#allocation3 + $0x18] sm:$0xf] %vm2820_vm2, %v2737_v51  ;;  %v3646_v51 = vld [vmem:[#allocation2 + $0xb0] sm:$0x1]  ;;  %v3194_v36 = vrot.slane %v3192_v5, 4 }
 0x234   : > { %v3793_v18 = vrot.slane %v3646_v51, 5 }
 0x236   : > { %3511 = vrot.lane.b32.xlu0 %v3300_v54, %s4632_s27  ;;  %2938 = vrot.lane.b32.xlu2 %v2864_v14, %s4631_s23  ;;  %v3390_v54 = vor.u32 %v3389_v47, %v3386_v25  ;;  %v3792_v14 = vrot.slane %v3790_v41, 4  ;;  %v3709_v25 = vrot.slane %v3610_v61, 5 }
 0x237   : > { %2948 = vrot.lane.b32.xlu1 %v2869_v33, %s4631_s23 }
 0x238   : > { %v2745_v45 = vpop.permute.xlu0 %2744  ;;  %v2743_v24 = vpop.permute.xlu2 %2742  ;;  %v3391_v52 = vrot.slane %v3390_v54, 4  ;;  %v3794_v29 = vsel %vm5444_vm13, %v3792_v14, %v3793_v18  ;;  %v3211_v54 = vshll.u32 %v3061_v9, 16 }
 0x239   : > { %2831 = vst.msk [vmem:[#allocation3 + $0x28] sm:$0xf] %vm2820_vm2, %v2745_v45  ;;  %v2735_v27 = vpop.permute.xlu1 %2734  ;;  %v3197_v45 = vrot.slane %v3195_v6, 5 }
 0x23a   : > { %2826 = vst.msk [vmem:[#allocation3 + $0x14] sm:$0xf] %vm2820_vm2, %v2735_v27  ;;  %v3060_v27 = vld [vmem:[#allocation2 + $0x4c] sm:$0xf]  ;;  %v3396_v15 = vsel %vm4751_vm3, %v3391_v52, %v6178_v55  ;;  %v3635_v52 = vld [vmem:[#allocation2 + $0x84] sm:$0xe] }
 0x23b   : > { %2830 = vst.msk [vmem:[#allocation3 + $0x24] sm:$0xf] %vm2820_vm2, %v2743_v24  ;;  %v3707_v24 = vsel %vm5444_vm13, %v4371_v53, %v3706_v0  ;;  %v3198_v62 = vor.u32 %v3197_v45, %v3194_v36  ;;  %v3205_v23 = vshrl.u32 %v3060_v27, 16  ;;  %v3213_v36 = vrot.slane %v3211_v54, 5  ;;  %v3086_v45 = vld [vmem:[#allocation2 + $0xb4] sm:$0xf] }
 0x23c   : > { %v3637_v54 = vld [vmem:[#allocation2 + $0x8c] sm:$0x1] }
 0x23d   : > { %v3199_v34 = vrot.slane %v3198_v62, 4  ;;  %v4380_v62 = vrot.slane %v3635_v52, 9 }
 0x23e   : > { %3529 = vrot.lane.b32.xlu0 %v3406_v37, %s4632_s27  ;;  %2944 = vrot.lane.b32.xlu2 %v2867_v50, %s4631_s23  ;;  %v3734_v37 = vrot.slane %v6230_v57, 5  ;;  %v3099_v50 = vshll.u32 %v3047_v31, 16  ;;  %v3411_v31 = vshll.u32 %v3086_v45, 16 }
 0x23f   : > { %2966 = vrot.lane.b32.xlu1 %v2878_v56, %s4631_s23  ;;  %v3201_v56 = vshll.u32 %v3060_v27, 16  ;;  %v6280_v27 = vld [vmem:[#allocation2 + $0x88] sm:$0xf] }
 0x240   : > { %v2751_v39 = vpop.permute.xlu0 %2750  ;;  %v2749_v38 = vpop.permute.xlu2 %2748  ;;  %v3736_v41 = vrot.slane %v3734_v37, 4  ;;  %v3101_v19 = vrot.slane %v3099_v50, 5  ;;  %v3062_v50 = vld [vmem:[#allocation2 + $0x54] sm:$0xf] }
 0x241   : > { %2834 = vst.msk [vmem:[#allocation3 + $0x34] sm:$0xf] %vm2820_vm2, %v2751_v39  ;;  %v2741_v35 = vpop.permute.xlu1 %2740  ;;  %v3203_v58 = vrot.slane %v3201_v56, 5  ;;  %v3769_v56 = vrot.slane %v6280_v27, 5  ;;  %v3613_v27 = vld [vmem:[#allocation2 + $0x2c] sm:$0x1] }
 0x242   : > { %2829 = vst.msk [vmem:[#allocation3 + $0x20] sm:$0xf] %vm2820_vm2, %v2741_v35  ;;  %v3764_v35 = vrot.slane %v3762_v4, 4  ;;  %v3738_v48 = vsel %vm5444_vm13, %v3736_v41, %v3737_v63  ;;  %v3076_v4 = vld [vmem:[#allocation2 + $0x8c] sm:$0x1]  ;;  %v3413_v41 = vrot.slane %v3411_v31, 5 }
 0x243   : > { %2833 = vst.msk [vmem:[#allocation3 + $0x30] sm:$0xf] %vm2820_vm2, %v2749_v38  ;;  %v3765_v38 = vrot.slane %v3634_v2, 5  ;;  %v3204_v26 = vsel %vm4751_vm3, %v3199_v34, %v3203_v58  ;;  %v3331_v5 = vshll.u32 %v3076_v4, 16  ;;  %v3063_v4 = vld [vmem:[#allocation2 + $0x58] sm:$0xf] }
 0x244   : > { %v3225_v9 = vshll.u32 %v3063_v4, 16 }
 0x245   : > { %v3766_v60 = vsel %vm5444_vm13, %v3764_v35, %v3765_v38  ;;  %v3074_v35 = vld [vmem:[#allocation2 + $0x84] sm:$0xf]  ;;  %v3216_v38 = vshrl.u32 %v3062_v50, 16 }
 0x246   : > { %3864 = vrot.lane.b32.xlu0 %v3791_v59, %s4633_s28  ;;  %2950 = vrot.lane.b32.xlu2 %v2870_v16, %s4631_s23  ;;  %v3098_v59 = vrot.slane %v3096_v17, 4  ;;  %v3325_v16 = vshrl.u32 %v3075_v20, 16 }
 0x247   : > { %3513 = vrot.lane.b32.xlu1 %v3310_v1, %s4632_s27  ;;  %v3321_v1 = vshll.u32 %v3075_v20, 16  ;;  %v3087_v20 = vld [vmem:[#allocation2 + $0xb8] sm:$0xf] }
 0x248   : > { %v2757_v32 = vpop.permute.xlu0 %2756  ;;  %v2755_v46 = vpop.permute.xlu2 %2754  ;;  %v3102_v10 = vor.u32 %v3101_v19, %v3098_v59  ;;  %v3219_v59 = vshll.u32 %v3062_v50, 16  ;;  %v3649_v19 = vld [vmem:[#allocation2 + $0xbc] sm:$0x1]  ;;  %v3229_v50 = vshrl.u32 %v3063_v4, 16 }
 0x249   : > { %2837 = vst.msk [vmem:[#allocation3 + $0x40] sm:$0xf] %vm2820_vm2, %v2757_v32  ;;  %v2747_v49 = vpop.permute.xlu1 %2746  ;;  %v6259_v8 = vrot.slane %v3321_v1, 5  ;;  %v3327_v32 = vrot.slane %v3325_v16, 4  ;;  %v3417_v1 = vshll.u32 %v3087_v20, 16  ;;  %v3800_v61 = vrot.slane %v3649_v19, 5 }
 0x24a   : > { %2832 = vst.msk [vmem:[#allocation3 + $0x2c] sm:$0xf] %vm2820_vm2, %v2747_v49  ;;  %v3708_v49 = vrot.slane %v3706_v0, 4  ;;  %v3103_v42 = vrot.slane %v3102_v10, 4  ;;  %v3333_v0 = vrot.slane %v3331_v5, 5  ;;  %v3218_v10 = vrot.slane %v3216_v38, 4 }
 0x24b   : > { %2836 = vst.msk [vmem:[#allocation3 + $0x3c] sm:$0xf] %vm2820_vm2, %v2755_v46  ;;  %v2880_v46 = vld [vmem:[#allocation2 + $0xb4] sm:$0xf]  ;;  %v3231_v19 = vrot.slane %v3229_v50, 4 }
 0x24c   : > { %v3710_v6 = vsel %vm5444_vm13, %v3708_v49, %v3709_v25 }
 0x24e   : > { %3481 = vrot.lane.b32.xlu0 %v3118_v3, %s4632_s27  ;;  %2968 = vrot.lane.b32.xlu2 %v2879_v22, %s4631_s23  ;;  %v3207_v3 = vrot.slane %v3205_v23, 4  ;;  %v3108_v22 = vsel %vm4751_vm3, %v3103_v42, %v6200_v44  ;;  %v3315_v23 = vshll.u32 %v3074_v35, 16  ;;  %v3050_v42 = vld [vmem:[#allocation2 + $0x24] sm:$0xf] }
 0x24f   : > { %3848 = vrot.lane.b32.xlu1 %v3763_v40, %s4633_s28  ;;  %v3328_v40 = vor.u32 %v3327_v32, %v6259_v8  ;;  %v3221_v32 = vrot.slane %v3219_v59, 5  ;;  %v3120_v5 = vshrl.u32 %v3050_v42, 16 }
 0x250   : > { %v2763_v33 = vpop.permute.xlu0 %2762  ;;  %v2761_v7 = vpop.permute.xlu2 %2760  ;;  %v3208_v51 = vor.u32 %v3207_v3, %v3203_v58 }
 0x251   : > { %2840 = vst.msk [vmem:[#allocation3 + $0x4c] sm:$0xf] %vm2820_vm2, %v2763_v33  ;;  %v2753_v21 = vpop.permute.xlu1 %2752  ;;  %v3329_v53 = vrot.slane %v3328_v40, 4 }
 0x252   : > { %2835 = vst.msk [vmem:[#allocation3 + $0x38] sm:$0xf] %vm2820_vm2, %v2753_v21  ;;  %v3209_v18 = vrot.slane %v3208_v51, 4  ;;  %v2873_v51 = vld [vmem:[#allocation2 + $0x88] sm:$0xf] }
 0x253   : > { %2839 = vst.msk [vmem:[#allocation3 + $0x48] sm:$0xf] %vm2820_vm2, %v2761_v7  ;;  %v3334_v21 = vsel %vm4751_vm3, %v3329_v53, %v3333_v0  ;;  %v2872_v7 = vld [vmem:[#allocation2 + $0x84] sm:$0xf] }
 0x254   : > { %v3214_v30 = vsel %vm4751_vm3, %v3209_v18, %v3213_v36  ;;  %v6316_v18 = vld [vmem:[#allocation2 + $0x28] sm:$0xf]  ;;  %v3771_v36 = vrot.slane %v3769_v56, 4 }
 0x256   : > { %3816 = vrot.lane.b32.xlu0 %v3707_v24, %s4633_s28  ;;  %3527 = vrot.lane.b32.xlu2 %v3396_v15, %s4632_s27  ;;  %v3408_v24 = vshrl.u32 %v3086_v45, 16  ;;  %v6286_v15 = vld [vmem:[#allocation2 + $0xb8] sm:$0xf]  ;;  %v3772_v45 = vrot.slane %v3637_v54, 5 }
 0x257   : > { %3866 = vrot.lane.b32.xlu1 %v3794_v29, %s4633_s28  ;;  %v3620_v29 = vld [vmem:[#allocation2 + $0x48] sm:$0xe]  ;;  %v3797_v34 = vrot.slane %v6286_v15, 5 }
 0x258   : > { %v2769_v39 = vpop.permute.xlu0 %2768  ;;  %v2767_v13 = vpop.permute.xlu2 %2766  ;;  %v3410_v2 = vrot.slane %v3408_v24, 4  ;;  %v3051_v24 = vld [vmem:[#allocation2 + $0x28] sm:$0xf] }
 0x259   : > { %2843 = vst.msk [vmem:[#allocation3 + $0x58] sm:$0xf] %vm2820_vm2, %v2769_v39  ;;  %v2759_v55 = vpop.permute.xlu1 %2758  ;;  %v4375_v39 = vrot.slane %v3620_v29, 9 }
 0x25a   : > { %2838 = vst.msk [vmem:[#allocation3 + $0x44] sm:$0xf] %vm2820_vm2, %v2759_v55  ;;  %v3770_v55 = vsel %vm5444_vm13, %v4380_v62, %v3769_v56  ;;  %v3088_v62 = vld [vmem:[#allocation2 + $0xbc] sm:$0x1]  ;;  %v3773_v56 = vsel %vm5444_vm13, %v3771_v36, %v3772_v45  ;;  %v6362_v36 = vld [vmem:[#allocation2 + $0xc4] sm:$0xf] }
 0x25b   : > { %2842 = vst.msk [vmem:[#allocation3 + $0x54] sm:$0xf] %vm2820_vm2, %v2767_v13  ;;  %v2881_v13 = vld [vmem:[#allocation2 + $0xb8] sm:$0xf]  ;;  %v3735_v16 = vsel %vm5444_vm13, %v4375_v39, %v3734_v37  ;;  %v3419_v37 = vrot.slane %v3417_v1, 5 }
 0x25c   : > { %v3064_v1 = vld [vmem:[#allocation2 + $0x5c] sm:$0x1]  ;;  %v3077_v45 = vld [vmem:[#allocation2 + $0x90] sm:$0xf] }
 0x25e   : > { %3834 = vrot.lane.b32.xlu0 %v3738_v48, %s4633_s28  ;;  %3850 = vrot.lane.b32.xlu2 %v3766_v60, %s4633_s28  ;;  %v3414_v48 = vor.u32 %v3413_v41, %v3410_v2  ;;  %v3799_v60 = vrot.slane %v3797_v34, 4  ;;  %v3129_v41 = vshll.u32 %v3051_v24, 16 }
 0x25f   : > { %3495 = vrot.lane.b32.xlu1 %v3204_v26, %s4632_s27  ;;  %v3312_v26 = vshrl.u32 %v3074_v35, 16 }
 0x260   : > { %v2775_v28 = vpop.permute.xlu0 %2774  ;;  %v2773_v43 = vpop.permute.xlu2 %2772  ;;  %v3415_v57 = vrot.slane %v3414_v48, 4  ;;  %v3801_v3 = vsel %vm5444_vm13, %v3799_v60, %v3800_v61  ;;  %v3131_v59 = vrot.slane %v3129_v41, 5  ;;  %v3235_v61 = vshll.u32 %v3064_v1, 16 }
 0x261   : > { %2846 = vst.msk [vmem:[#allocation3 + $0x64] sm:$0xf] %vm2820_vm2, %v2775_v28  ;;  %v2765_v47 = vpop.permute.xlu1 %2764  ;;  %v3314_v25 = vrot.slane %v3312_v26, 4 }
 0x262   : > { %2841 = vst.msk [vmem:[#allocation3 + $0x50] sm:$0xf] %vm2820_vm2, %v2765_v47  ;;  %v3317_v47 = vrot.slane %v3315_v23, 5  ;;  %v3420_v40 = vsel %vm4751_vm3, %v3415_v57, %v3419_v37  ;;  %v3089_v57 = vld [vmem:[#allocation2 + $0xc0] sm:$0xf] }
 0x263   : > { %2845 = vst.msk [vmem:[#allocation3 + $0x60] sm:$0xf] %vm2820_vm2, %v2773_v43  ;;  %v3222_v43 = vor.u32 %v3221_v32, %v3218_v10  ;;  %v3133_v10 = vshrl.u32 %v3051_v24, 16 }
 0x264   : > { %v3318_v53 = vor.u32 %v3317_v47, %v3314_v25 }
 0x265   : > { %v3223_v0 = vrot.slane %v3222_v43, 4  ;;  %v3052_v43 = vld [vmem:[#allocation2 + $0x2c] sm:$0x1] }
 0x266   : > { %2970 = vrot.lane.b32.xlu0 %v2880_v46, %s4631_s23  ;;  %3479 = vrot.lane.b32.xlu2 %v3108_v22, %s4632_s27  ;;  %v3421_v22 = vshrl.u32 %v3087_v20, 16  ;;  %v3427_v20 = vshll.u32 %v3088_v62, 16  ;;  %v3336_v62 = vshrl.u32 %v3077_v45, 16 }
 0x267   : > { %3818 = vrot.lane.b32.xlu1 %v3710_v6, %s4633_s28  ;;  %v3123_v6 = vshll.u32 %v3050_v42, 16  ;;  %v2874_v42 = vld [vmem:[#allocation2 + $0x90] sm:$0xf] }
 0x268   : > { %v2781_v33 = vpop.permute.xlu0 %2780  ;;  %v2779_v44 = vpop.permute.xlu2 %2778  ;;  %v3423_v31 = vrot.slane %v3421_v22, 4  ;;  %v3429_v48 = vrot.slane %v3427_v20, 5  ;;  %v3623_v22 = vld [vmem:[#allocation2 + $0x54] sm:$0xe]  ;;  %v3053_v20 = vld [vmem:[#allocation2 + $0x30] sm:$0xf] }
 0x269   : > { %2849 = vst.msk [vmem:[#allocation3 + $0x70] sm:$0xf] %vm2820_vm2, %v2781_v33  ;;  %v2771_v14 = vpop.permute.xlu1 %2770  ;;  %v3227_v33 = vrot.slane %v3225_v9, 5  ;;  %v3432_v9 = vshrl.u32 %v3089_v57, 16  ;;  %v4376_v15 = vrot.slane %v3623_v22, 9 }
 0x26a   : > { %2844 = vst.msk [vmem:[#allocation3 + $0x5c] sm:$0xf] %vm2820_vm2, %v2771_v14  ;;  %v3424_v39 = vor.u32 %v3423_v31, %v3419_v37  ;;  %v3611_v31 = vld [vmem:[#allocation2 + $0x24] sm:$0xe] }
 0x26b   : > { %2848 = vst.msk [vmem:[#allocation3 + $0x6c] sm:$0xf] %vm2820_vm2, %v2779_v44  ;;  %v3122_v44 = vrot.slane %v3120_v5, 4  ;;  %v3228_v29 = vsel %vm4751_vm3, %v3223_v0, %v3227_v33  ;;  %v3232_v60 = vor.u32 %v3231_v19, %v3227_v33  ;;  %v3434_v0 = vrot.slane %v3432_v9, 4  ;;  %v4497_v9 = vld [vmem:[%s6805_s2] sm:$0xff] }
 0x26d   : > { %v3233_v37 = vrot.slane %v3232_v60, 4 }
 0x26e   : > { %3517 = vrot.lane.b32.xlu0 %v3334_v21, %s4632_s27  ;;  %3497 = vrot.lane.b32.xlu2 %v3214_v30, %s4632_s27  ;;  %v3125_v21 = vrot.slane %v3123_v6, 5 }
 0x26f   : > { %2954 = vrot.lane.b32.xlu1 %v2872_v7, %s4631_s23  ;;  %v3319_v7 = vrot.slane %v3318_v53, 4  ;;  %v3139_v53 = vshll.u32 %v3052_v43, 16 }
 0x270   : > { %v2787_v17 = vpop.permute.xlu0 %2786  ;;  %v2785_v58 = vpop.permute.xlu2 %2784  ;;  %v3126_v2 = vor.u32 %v3125_v21, %v3122_v44 }
 0x271   : > { %2852 = vst.msk [vmem:[#allocation3 + $0x7c] sm:$0xf] %vm2820_vm2, %v2787_v17  ;;  %v2777_v63 = vpop.permute.xlu1 %2776  ;;  %v3713_v17 = vrot.slane %v6316_v18, 5 }
 0x272   : > { %2847 = vst.msk [vmem:[#allocation3 + $0x68] sm:$0xf] %vm2820_vm2, %v2777_v63  ;;  %v3324_v63 = vsel %vm4751_vm3, %v3319_v7, %v6259_v8  ;;  %v3127_v38 = vrot.slane %v3126_v2, 4  ;;  %v3425_v8 = vrot.slane %v3424_v39, 4  ;;  %v2883_v7 = vld [vmem:[#allocation2 + $0xc4] sm:$0xf] }
 0x273   : > { %2851 = vst.msk [vmem:[#allocation3 + $0x78] sm:$0xf] %vm2820_vm2, %v2785_v58  ;;  %v3715_v58 = vrot.slane %v3713_v17, 4  ;;  %v4372_v2 = vrot.slane %v3611_v31, 9  ;;  %v6379_v39 = vld [vmem:[#allocation2 + $0x94] sm:$0xf] }
 0x274   : > { %v3132_v23 = vsel %vm4751_vm3, %v3127_v38, %v3131_v59  ;;  %v3430_v32 = vsel %vm4751_vm3, %v3425_v8, %v3429_v48  ;;  %v4498_v38 = vld [vmem:[%s6805_s2 + $0x8] sm:$0x30]  ;;  %v6390_v8 = vld [vmem:[#allocation2 + $0x94] sm:$0xf]  ;;  %v3640_v48 = vld [vmem:[#allocation2 + $0x98] sm:$0x1] }
 0x275   : > { %v3776_v1 = vrot.slane %v6379_v39, 5 }
 0x276   : > { %3852 = vrot.lane.b32.xlu0 %v3770_v55, %s4633_s28  ;;  %3832 = vrot.lane.b32.xlu2 %v3735_v16, %s4633_s28  ;;  %v3716_v55 = vrot.slane %v3613_v27, 5 }
 0x277   : > { %2972 = vrot.lane.b32.xlu1 %v2881_v13, %s4631_s23 }
 0x278   : > { %v2923_v28 = vpop.permute.xlu0 %2922  ;;  %v2921_v46 = vpop.permute.xlu2 %2920  ;;  %v3717_v26 = vsel %vm5444_vm13, %v3715_v58, %v3716_v55  ;;  %v3338_v55 = vrot.slane %v3336_v62, 4 }
 0x279   : > { %3017 = vst.msk [vmem:[#allocation3 + $0x8] sm:$0xf] %vm3014_vm4, %v2923_v28  ;;  %v2783_v49 = vpop.permute.xlu1 %2782  ;;  %v3647_v28 = vld [vmem:[#allocation2 + $0xb4] sm:$0xe] }
 0x27a   : > { %2850 = vst.msk [vmem:[#allocation3 + $0x74] sm:$0xf] %vm2820_vm2, %v2783_v49  ;;  %v3237_v49 = vrot.slane %v3235_v61, 5  ;;  %v4384_v47 = vrot.slane %v3647_v28, 9  ;;  %v3144_v61 = vshrl.u32 %v3053_v20, 16 }
 0x27b   : > { %3016 = vst.msk [vmem:[#allocation3 + $0x4] sm:$0xf] %vm3014_vm4, %v2921_v46  ;;  %v3135_v46 = vrot.slane %v3133_v10, 4  ;;  %v3147_v10 = vshll.u32 %v3053_v20, 16 }
 0x27c   : > { %v3238_v5 = vsel %vm4751_vm3, %v3233_v37, %v3237_v49  ;;  %v3798_v6 = vsel %vm5444_vm13, %v4384_v47, %v3797_v34  ;;  %v3345_v49 = vshll.u32 %v6390_v8, 16  ;;  %v3778_v47 = vrot.slane %v3776_v1, 4 }
 0x27d   : > { %v3136_v54 = vor.u32 %v3135_v46, %v3131_v59  ;;  %v3625_v46 = vld [vmem:[#allocation2 + $0x5c] sm:$0x1]  ;;  %v3149_v43 = vrot.slane %v3147_v10, 5 }
 0x27e   : > { %3870 = vrot.lane.b32.xlu0 %v3801_v3, %s4633_s28  ;;  %2956 = vrot.lane.b32.xlu2 %v2873_v51, %s4631_s23  ;;  %v6359_v51 = vld [vmem:[#allocation2 + $0x58] sm:$0xf] }
 0x27f   : > { %3531 = vrot.lane.b32.xlu1 %v3420_v40, %s4632_s27  ;;  %v3435_v40 = vshll.u32 %v3089_v57, 16  ;;  %v3741_v34 = vrot.slane %v6359_v51, 5  ;;  %v3137_v21 = vrot.slane %v3136_v54, 4  ;;  %v3445_v57 = vshrl.u32 %v6362_v36, 16 }
 0x280   : > { %v2929_v14 = vpop.permute.xlu0 %2928  ;;  %v2927_v30 = vpop.permute.xlu2 %2926 }
 0x281   : > { %3020 = vst.msk [vmem:[#allocation3 + $0x14] sm:$0xf] %vm3014_vm4, %v2929_v14  ;;  %v2919_v52 = vpop.permute.xlu1 %2918  ;;  %v3437_v33 = vrot.slane %v3435_v40, 5  ;;  %v3742_v27 = vsel %vm5444_vm13, %v4376_v15, %v3741_v34  ;;  %v3066_v40 = vld [vmem:[#allocation2 + $0x64] sm:$0xf]  ;;  %v3447_v22 = vrot.slane %v3445_v57, 4 }
 0x282   : > { %3015 = vst.msk [vmem:[#allocation3] sm:$0xf] %vm3014_vm4, %v2919_v52  ;;  %v3141_v52 = vrot.slane %v3139_v53, 5  ;;  %v3743_v53 = vrot.slane %v3741_v34, 4 }
 0x283   : > { %3019 = vst.msk [vmem:[#allocation3 + $0x10] sm:$0xf] %vm3014_vm4, %v2927_v30  ;;  %v3438_v30 = vor.u32 %v3437_v33, %v3434_v0  ;;  %v3744_v0 = vrot.slane %v3625_v46, 5  ;;  %v6457_v46 = vld [vmem:[#allocation2 + $0x64] sm:$0xf] }
 0x284   : > { %v3142_v50 = vsel %vm4751_vm3, %v3137_v21, %v3141_v52  ;;  %v3253_v21 = vshrl.u32 %v3066_v40, 16 }
 0x285   : > { %v3439_v41 = vrot.slane %v3438_v30, 4 }
 0x286   : > { %3499 = vrot.lane.b32.xlu0 %v3228_v29, %s4632_s27  ;;  %3515 = vrot.lane.b32.xlu2 %v3324_v63, %s4632_s27  ;;  %v3441_v29 = vshll.u32 %v6362_v36, 16  ;;  %v3255_v62 = vrot.slane %v3253_v21, 4 }
 0x287   : > { %3854 = vrot.lane.b32.xlu1 %v3773_v56, %s4633_s28  ;;  %v3339_v56 = vshll.u32 %v3077_v45, 16 }
 0x288   : > { %v2935_v35 = vpop.permute.xlu0 %2934  ;;  %v2933_v16 = vpop.permute.xlu2 %2932  ;;  %v6377_v63 = vrot.slane %v3441_v29, 5 }
 0x289   : > { %3023 = vst.msk [vmem:[#allocation3 + $0x20] sm:$0xf] %vm3014_vm4, %v2935_v35  ;;  %v2925_v13 = vpop.permute.xlu1 %2924  ;;  %v4457_v35 = vld [vmem:[%s6805_s2 + $0x8] sm:$0xf]  ;;  %v3341_v59 = vrot.slane %v3339_v56, 5 }
 0x28a   : > { %3018 = vst.msk [vmem:[#allocation3 + $0xc] sm:$0xf] %vm3014_vm4, %v2925_v13  ;;  %v4458_v19 = vor.u32 %v4498_v38, %v4457_v35  ;;  %v3444_v60 = vsel %vm4751_vm3, %v3439_v41, %v6377_v63  ;;  %v3448_v34 = vor.u32 %v3447_v22, %v6377_v63  ;;  %v3067_v56 = vld [vmem:[#allocation2 + $0x68] sm:$0x1]  ;;  %v3080_v22 = vld [vmem:[#allocation2 + $0x9c] sm:$0xf] }
 0x28b   : > { %3022 = vst.msk [vmem:[#allocation3 + $0x1c] sm:$0xf] %vm3014_vm4, %v2933_v16  ;;  %v4634_v16 = vmov 65535   ;;  %v3342_v37 = vor.u32 %v3341_v59, %v3338_v55  ;;  %v3079_v55 = vld [vmem:[#allocation2 + $0x98] sm:$0x1]  ;;  %v3259_v38 = vshll.u32 %v3067_v56, 16 }
 0x28c   : > { %v3081_v56 = vld [vmem:[#allocation2 + $0xa0] sm:$0xf] }
 0x28e   : > { %3822 = vrot.lane.b32.xlu0 %v3717_v26, %s4633_s28  ;;  %3533 = vrot.lane.b32.xlu2 %v3430_v32, %s4632_s27  ;;  %v4127_v26 = vsel %vm4125_vm5, 4294967295, %v4634_v16 }
 0x28f   : > { %3483 = vrot.lane.b32.xlu1 %v3132_v23, %s4632_s27  ;;  %v4128_v32 = vsel %vm4126_vm6, %v4127_v26, 0  ;;  %v3355_v26 = vshll.u32 %v3079_v55, 16 }
 0x290   : > { %v2941_v4 = vpop.permute.xlu0 %2940  ;;  %v2939_v3 = vpop.permute.xlu2 %2938  ;;  %v4130_v28 = vand.u32 %v4458_v19, %v4128_v32  ;;  %v2882_v19 = vld [vmem:[#allocation2 + $0xc0] sm:$0xf] }
 0x291   : > { %3026 = vst.msk [vmem:[#allocation3 + $0x2c] sm:$0xf] %vm3014_vm4, %v2941_v4  ;;  %v2931_v25 = vpop.permute.xlu1 %2930  ;;  %v2875_v4 = vld [vmem:[#allocation2 + $0x94] sm:$0xf] }
 0x292   : > { %3021 = vst.msk [vmem:[#allocation3 + $0x18] sm:$0xf] %vm3014_vm4, %v2931_v25  ;;  %v3714_v25 = vsel %vm5444_vm13, %v4372_v2, %v3713_v17  ;;  %4501 = vmatpush.bf16.msra.mxu2 %v4130_v28  ;;  %4502 = vmatpush.bf16.msra.mxu3 %v4130_v28  ;;  %v6411_v17 = vld [vmem:[#allocation2 + $0x34] sm:$0xf] }
 0x293   : > { %3025 = vst.msk [vmem:[#allocation3 + $0x28] sm:$0xf] %vm3014_vm4, %v2939_v3  ;;  %v3146_v3 = vrot.slane %v3144_v61, 4  ;;  %4500 = vmatpush.bf16.msra.mxu1 %v4130_v28  ;;  %4138 = vmatpush.bf16.msra.mxu0 %v4130_v28  ;;  %v3153_v45 = vshll.u32 %v6411_v17, 16 }
 0x295   : > { %v3150_v15 = vor.u32 %v3149_v43, %v3146_v3  ;;  %v3155_v30 = vrot.slane %v3153_v45, 5  ;;  %v3360_v45 = vshrl.u32 %v3080_v22, 16 }
 0x296   : > { %2958 = vrot.lane.b32.xlu0 %v2874_v42, %s4631_s23  ;;  %3868 = vrot.lane.b32.xlu2 %v3798_v6, %s4633_s28  ;;  %v3779_v42 = vrot.slane %v3640_v48, 5  ;;  %v6415_v6 = vrot.slane %v3345_v49, 5  ;;  %v6446_v48 = vld [vmem:[#allocation2 + $0xc4] sm:$0xf]  ;;  %v3055_v49 = vld [vmem:[#allocation2 + $0x38] sm:$0x1] }
 0x297   : > { %3501 = vrot.lane.b32.xlu1 %v3238_v5, %s4632_s27  ;;  %v3343_v5 = vrot.slane %v3342_v37, 4  ;;  %4504 = vmatpush.bf16.msra.mxu2 %v4497_v9  ;;  %v3151_v31 = vrot.slane %v3150_v15, 4  ;;  %v3804_v32 = vrot.slane %v6446_v48, 5  ;;  %v3357_v37 = vrot.slane %v3355_v26, 5  ;;  %v3065_v15 = vld [vmem:[#allocation2 + $0x60] sm:$0xf] }
 0x298   : > { %v2947_v14 = vpop.permute.xlu0 %2946  ;;  %v2945_v24 = vpop.permute.xlu2 %2944  ;;  %v3780_v33 = vsel %vm5444_vm13, %v3778_v47, %v3779_v42  ;;  %4505 = vmatpush.bf16.msra.mxu3 %v4497_v9  ;;  %4503 = vmatpush.bf16.msra.mxu1 %v4497_v9  ;;  %v3626_v42 = vld [vmem:[#allocation2 + $0x60] sm:$0xe]  ;;  %v3628_v26 = vld [vmem:[#allocation2 + $0x68] sm:$0x1] }
 0x299   : > { %3029 = vst.msk [vmem:[#allocation3 + $0x38] sm:$0xf] %vm3014_vm4, %v2947_v14  ;;  %v2937_v44 = vpop.permute.xlu1 %2936  ;;  %v3091_v14 = vld [vmem:[#allocation2 + $0xc8] sm:$0x1]  ;;  %4139 = vmatpush.bf16.msra.mxu0 %v4497_v9  ;;  %v3348_v51 = vsel %vm4751_vm3, %v3343_v5, %v6415_v6  ;;  %v3163_v9 = vshll.u32 %v3055_v49, 16  ;;  %v3748_v5 = vrot.slane %v6457_v46, 5 }
 0x29a   : > { %3024 = vst.msk [vmem:[#allocation3 + $0x24] sm:$0xf] %vm3014_vm4, %v2937_v44  ;;  %v3249_v44 = vshll.u32 %v3066_v40, 16  ;;  %v3451_v52 = vshll.u32 %v3091_v14, 16  ;;  %v4377_v40 = vrot.slane %v3626_v42, 9 }
 0x29b   : > { %3028 = vst.msk [vmem:[#allocation3 + $0x34] sm:$0xf] %vm3014_vm4, %v2945_v24  ;;  %v3745_v24 = vsel %vm5444_vm13, %v3743_v53, %v3744_v0  ;;  %v3165_v53 = vrot.slane %v3163_v9, 5 }
 0x29c   : > { %v6432_v29 = vrot.slane %v3249_v44, 5  ;;  %v3453_v2 = vrot.slane %v3451_v52, 5  ;;  %v3363_v44 = vshll.u32 %v3080_v22, 16  ;;  %v6481_v52 = vld [vmem:[#allocation2 + $0x34] sm:$0xf] }
 0x29e   : > { %2976 = vrot.lane.b32.xlu0 %v2883_v7, %s4631_s23  ;;  %3485 = vrot.lane.b32.xlu2 %v3142_v50, %s4632_s27  ;;  %v3349_v7 = vshrl.u32 %v6390_v8, 16  ;;  %v3449_v50 = vrot.slane %v3448_v34, 4  ;;  %v3256_v35 = vor.u32 %v3255_v62, %v6432_v29  ;;  %v3650_v8 = vld [vmem:[#allocation2 + $0xc0] sm:$0xe]  ;;  %v3614_v34 = vld [vmem:[#allocation2 + $0x30] sm:$0xe] }
 0x29f   : > { %3836 = vrot.lane.b32.xlu1 %v3742_v27, %s4633_s28  ;;  %v4385_v10 = vrot.slane %v3650_v8, 9  ;;  %v3365_v62 = vrot.slane %v3363_v44, 5  ;;  %v4373_v39 = vrot.slane %v3614_v34, 9  ;;  %v6521_v34 = vld [vmem:[#allocation2 + $0xd0] sm:$0xf] }
 0x2a0   : > { %v2953_v58 = vpop.permute.xlu0 %2952  ;;  %v2951_v23 = vpop.permute.xlu2 %2950  ;;  %v3351_v63 = vrot.slane %v3349_v7, 4  ;;  %v3454_v59 = vsel %vm4751_vm3, %v3449_v50, %v3453_v2  ;;  %v3240_v7 = vshrl.u32 %v3065_v15, 16  ;;  %v3093_v50 = vld [vmem:[#allocation2 + $0xd0] sm:$0xf]  ;;  %v3806_v2 = vrot.slane %v3804_v32, 4 }
 0x2a1   : > { %3032 = vst.msk [vmem:[#allocation3 + $0x44] sm:$0xf] %vm3014_vm4, %v2953_v58  ;;  %v2943_v13 = vpop.permute.xlu1 %2942  ;;  %v3156_v58 = vsel %vm4751_vm3, %v3151_v31, %v3155_v30  ;;  %v3805_v3 = vsel %vm5444_vm13, %v4385_v10, %v3804_v32  ;;  %v3652_v31 = vld [vmem:[#allocation2 + $0xc8] sm:$0x1]  ;;  %v3469_v8 = vshrl.u32 %v3093_v50, 16 }
 0x2a2   : > { %3027 = vst.msk [vmem:[#allocation3 + $0x30] sm:$0xf] %vm3014_vm4, %v2943_v13  ;;  %v3157_v13 = vshrl.u32 %v6411_v17, 16  ;;  %v3352_v16 = vor.u32 %v3351_v63, %v6415_v6  ;;  %v3638_v17 = vld [vmem:[#allocation2 + $0x90] sm:$0xe]  ;;  %v3242_v55 = vrot.slane %v3240_v7, 4 }
 0x2a3   : > { %3031 = vst.msk [vmem:[#allocation3 + $0x40] sm:$0xf] %vm3014_vm4, %v2951_v23  ;;  %v3257_v23 = vrot.slane %v3256_v35, 4  ;;  %v3471_v32 = vrot.slane %v3469_v8, 4  ;;  %v6542_v8 = vld [vmem:[#allocation2 + $0xa0] sm:$0xf] }
 0x2a4   : > { %v3159_v28 = vrot.slane %v3157_v13, 4  ;;  %v3353_v57 = vrot.slane %v3352_v16, 4  ;;  %v3465_v13 = vshll.u32 %v3093_v50, 16 }
 0x2a6   : > { %3535 = vrot.lane.b32.xlu0 %v3444_v60, %s4632_s27  ;;  %3820 = vrot.lane.b32.xlu2 %v3714_v25, %s4633_s28  ;;  %v3261_v60 = vrot.slane %v3259_v38, 5  ;;  %v3160_v43 = vor.u32 %v3159_v28, %v3155_v30  ;;  %v3362_v30 = vrot.slane %v3360_v45, 4  ;;  %v6495_v10 = vrot.slane %v3465_v13, 5  ;;  %v3641_v13 = vld [vmem:[#allocation2 + $0x9c] sm:$0xe] }
 0x2a7   : > { %2960 = vrot.lane.b32.xlu1 %v2875_v4, %s4631_s23 }
 0x2a8   : > { %v3512_v18 = vpop.permute.xlu0 %3511  ;;  %v2969_v36 = vpop.permute.xlu2 %2968  ;;  %v3262_v47 = vsel %vm4751_vm3, %v3257_v23, %v3261_v60 }
 0x2a9   : > { %3592 = vst.msk [vmem:[#allocation3 + $0x40] sm:$0xf] %vm3575_vm7, %v3512_v18  ;;  %v2949_v54 = vpop.permute.xlu1 %2948  ;;  %v3358_v18 = vsel %vm4751_vm3, %v3353_v57, %v3357_v37  ;;  %v3750_v57 = vrot.slane %v3748_v5, 4  ;;  %v3751_v37 = vrot.slane %v3628_v26, 5 }
 0x2aa   : > { %3030 = vst.msk [vmem:[#allocation3 + $0x3c] sm:$0xf] %vm3014_vm4, %v2949_v54  ;;  %v3161_v54 = vrot.slane %v3160_v43, 4  ;;  %v3472_v43 = vor.u32 %v3471_v32, %v6495_v10  ;;  %v3783_v32 = vrot.slane %v6542_v8, 5  ;;  %v3619_v8 = vld [vmem:[#allocation2 + $0x44] sm:$0x1] }
 0x2ab   : > { %3040 = vst.msk [vmem:[#allocation3 + $0x64] sm:$0xf] %vm3014_vm4, %v2969_v36  ;;  %v3749_v36 = vsel %vm5444_vm13, %v4377_v40, %v3748_v5  ;;  %v3752_v46 = vsel %vm5444_vm13, %v3750_v57, %v3751_v37  ;;  %v3616_v40 = vld [vmem:[#allocation2 + $0x38] sm:$0x1]  ;;  %v3068_v37 = vld [vmem:[#allocation2 + $0x6c] sm:$0xf] }
 0x2ac   : > { %v3166_v21 = vsel %vm4751_vm3, %v3161_v54, %v3165_v53  ;;  %v3473_v5 = vrot.slane %v3472_v43, 4  ;;  %v3057_v54 = vld [vmem:[#allocation2 + $0x40] sm:$0xf]  ;;  %v3264_v43 = vshrl.u32 %v3068_v37, 16 }
 0x2ad   : > { %v3177_v44 = vshll.u32 %v3057_v54, 16 }
 0x2ae   : > { %3858 = vrot.lane.b32.xlu0 %v3780_v33, %s4633_s28  ;;  %3838 = vrot.lane.b32.xlu2 %v3745_v24, %s4633_s28  ;;  %v4381_v33 = vrot.slane %v3638_v17, 9  ;;  %v3243_v24 = vshll.u32 %v3065_v15, 16 }
 0x2af   : > { %3519 = vrot.lane.b32.xlu1 %v3348_v51, %s4632_s27 }
 0x2b0   : > { %v3530_v27 = vpop.permute.xlu0 %3529  ;;  %v3528_v20 = vpop.permute.xlu2 %3527  ;;  %v3777_v51 = vsel %vm5444_vm13, %v4381_v33, %v3776_v1  ;;  %v3720_v1 = vrot.slane %v6481_v52, 5  ;;  %v3245_v35 = vrot.slane %v3243_v24, 5  ;;  %v2884_v52 = vld [vmem:[#allocation2 + $0xcc] sm:$0xf] }
 0x2b1   : > { %3601 = vst.msk [vmem:[#allocation3 + $0x64] sm:$0xf] %vm3575_vm7, %v3530_v27  ;;  %v2967_v41 = vpop.permute.xlu1 %2966 }
 0x2b2   : > { %3039 = vst.msk [vmem:[#allocation3 + $0x60] sm:$0xf] %vm3014_vm4, %v2967_v41  ;;  %v3721_v48 = vsel %vm5444_vm13, %v4373_v39, %v3720_v1  ;;  %v3246_v23 = vor.u32 %v3245_v35, %v3242_v55  ;;  %v3722_v33 = vrot.slane %v3720_v1, 4  ;;  %v3058_v39 = vld [vmem:[#allocation2 + $0x44] sm:$0x1] }
 0x2b3   : > { %3600 = vst.msk [vmem:[#allocation3 + $0x60] sm:$0xf] %vm3575_vm7, %v3528_v20  ;;  %v3807_v20 = vrot.slane %v3652_v31, 5  ;;  %v3187_v35 = vshll.u32 %v3058_v39, 16 }
 0x2b5   : > { %v3808_v16 = vsel %vm5444_vm13, %v3806_v2, %v3807_v20 }
 0x2b6   : > { %3487 = vrot.lane.b32.xlu0 %v3156_v58, %s4632_s27  ;;  %2974 = vrot.lane.b32.xlu2 %v2882_v19, %s4631_s23  ;;  %v2877_v58 = vld [vmem:[#allocation2 + $0xa0] sm:$0xf]  ;;  %v3369_v19 = vshll.u32 %v3081_v56, 16 }
 0x2b7   : > { %3537 = vrot.lane.b32.xlu1 %v3454_v59, %s4632_s27  ;;  %v3366_v59 = vor.u32 %v3365_v62, %v3362_v30  ;;  %v3811_v62 = vrot.slane %v6521_v34, 5 }
 0x2b8   : > { %v3865_v61 = vpop.permute.xlu0 %3864  ;;  %v3851_v25 = vpop.permute.xlu2 %3850 }
 0x2b9   : > { %3937 = vst.msk [vmem:[#allocation3 + $0x60] sm:$0xf] %vm3912_vm8, %v3865_v61  ;;  %v3514_v4 = vpop.permute.xlu1 %3513  ;;  %v3367_v60 = vrot.slane %v3366_v59, 4  ;;  %v3371_v61 = vrot.slane %v3369_v19, 5  ;;  %v2876_v19 = vld [vmem:[#allocation2 + $0x9c] sm:$0xf] }
 0x2ba   : > { %3593 = vst.msk [vmem:[#allocation3 + $0x44] sm:$0xf] %vm3575_vm7, %v3514_v4  ;;  %v3094_v4 = vld [vmem:[#allocation2 + $0xd4] sm:$0x1] }
 0x2bb   : > { %3930 = vst.msk [vmem:[#allocation3 + $0x44] sm:$0xf] %vm3912_vm8, %v3851_v25  ;;  %v3475_v9 = vshll.u32 %v3094_v4, 16 }
 0x2be   : > { %3505 = vrot.lane.b32.xlu0 %v3262_v47, %s4632_s27  ;;  %3521 = vrot.lane.b32.xlu2 %v3358_v18, %s4632_s27  ;;  %v3247_v47 = vrot.slane %v3246_v23, 4  ;;  %v3373_v18 = vshrl.u32 %v3081_v56, 16  ;;  %v3189_v23 = vrot.slane %v3187_v35, 5 }
 0x2bf   : > { %3872 = vrot.lane.b32.xlu1 %v3805_v3, %s4633_s28  ;;  %v3372_v3 = vsel %vm4751_vm3, %v3367_v60, %v3371_v61 }
 0x2c0   : > { %v3482_v6 = vpop.permute.xlu0 %3481  ;;  %v3480_v14 = vpop.permute.xlu2 %3479  ;;  %v3252_v17 = vsel %vm4751_vm3, %v3247_v47, %v6432_v29  ;;  %v3375_v53 = vrot.slane %v3373_v18, 4  ;;  %v3617_v47 = vld [vmem:[#allocation2 + $0x3c] sm:$0xe]  ;;  %v3655_v18 = vld [vmem:[#allocation2 + $0xd4] sm:$0x1] }
 0x2c1   : > { %3577 = vst.msk [vmem:[#allocation3 + $0x4] sm:$0xf] %vm3575_vm7, %v3482_v6  ;;  %v3849_v0 = vpop.permute.xlu1 %3848  ;;  %v3477_v6 = vrot.slane %v3475_v9, 5  ;;  %v3267_v9 = vshll.u32 %v3068_v37, 16 }
 0x2c2   : > { %3929 = vst.msk [vmem:[#allocation3 + $0x40] sm:$0xf] %vm3912_vm8, %v3849_v0  ;;  %v3376_v7 = vor.u32 %v3375_v53, %v3371_v61  ;;  %v4382_v61 = vrot.slane %v3641_v13, 9  ;;  %v3814_v53 = vrot.slane %v3655_v18, 5 }
 0x2c3   : > { %3576 = vst.msk [vmem:[#allocation3] sm:$0xf] %vm3575_vm7, %v3480_v14  ;;  %v3723_v14 = vrot.slane %v3616_v40, 5  ;;  %v3478_v45 = vsel %vm4751_vm3, %v3473_v5, %v3477_v6  ;;  %v4374_v40 = vrot.slane %v3617_v47, 9 }
 0x2c4   : > { %v3377_v1 = vrot.slane %v3376_v7, 4 }
 0x2c5   : > { %v3724_v31 = vsel %vm5444_vm13, %v3722_v33, %v3723_v14  ;;  %v3269_v33 = vrot.slane %v3267_v9, 5 }
 0x2c6   : > { %3840 = vrot.lane.b32.xlu0 %v3749_v36, %s4633_s28  ;;  %3856 = vrot.lane.b32.xlu2 %v3777_v51, %s4633_s28  ;;  %v3082_v36 = vld [vmem:[#allocation2 + $0xa4] sm:$0x1]  ;;  %v3653_v51 = vld [vmem:[#allocation2 + $0xcc] sm:$0xe] }
 0x2c7   : > { %3489 = vrot.lane.b32.xlu1 %v3166_v21, %s4632_s27  ;;  %v3181_v21 = vshrl.u32 %v3057_v54, 16  ;;  %v3379_v24 = vshll.u32 %v3082_v36, 16  ;;  %v4386_v30 = vrot.slane %v3653_v51, 9  ;;  %v3813_v54 = vrot.slane %v3811_v62, 4  ;;  %v3631_v51 = vld [vmem:[#allocation2 + $0x74] sm:$0x1] }
 0x2c8   : > { %v3817_v27 = vpop.permute.xlu0 %3816  ;;  %v3498_v38 = vpop.permute.xlu2 %3497 }
 0x2c9   : > { %3913 = vst.msk [vmem:[#allocation3] sm:$0xf] %vm3912_vm8, %v3817_v27  ;;  %v3867_v41 = vpop.permute.xlu1 %3866  ;;  %v4489_v63 = vld [vmem:[#allocation3 + $0x40] sm:$0xff]  ;;  %v6528_v27 = vrot.slane %v3177_v44, 5  ;;  %v3183_v56 = vrot.slane %v3181_v21, 4  ;;  %v3381_v2 = vrot.slane %v3379_v24, 5  ;;  %v3815_v34 = vsel %vm5444_vm13, %v3813_v54, %v3814_v53 }
 0x2ca   : > { %3938 = vst.msk [vmem:[#allocation3 + $0x64] sm:$0xf] %vm3912_vm8, %v3867_v41  ;;  %4467 = vmatmul.msk.bf16.vlgmr.msra.gmra.mxu2 %vm4076_vm9, %v4489_v63  ;;  %v3056_v21 = vld [vmem:[#allocation2 + $0x3c] sm:$0xf] }
 0x2cb   : > { %3585 = vst.msk [vmem:[#allocation3 + $0x24] sm:$0xf] %vm3575_vm7, %v3498_v38  ;;  %v3184_v55 = vor.u32 %v3183_v56, %v6528_v27  ;;  %v3092_v38 = vld [vmem:[#allocation2 + $0xcc] sm:$0xf]  ;;  %v3382_v59 = vsel %vm4751_vm3, %v3377_v1, %v3381_v2 }
 0x2cd   : > { %v3185_v26 = vrot.slane %v3184_v55, 4 }
 0x2ce   : > { %2964 = vrot.lane.b32.xlu0 %v2877_v58, %s4631_s23  ;;  %3874 = vrot.lane.b32.xlu2 %v3808_v16, %s4633_s28  ;;  %v3812_v58 = vsel %vm5444_vm13, %v4386_v30, %v3811_v62  ;;  %v3459_v16 = vshll.u32 %v3092_v38, 16  ;;  %v3171_v30 = vshll.u32 %v3056_v21, 16  ;;  %v3643_v62 = vld [vmem:[#allocation2 + $0xa4] sm:$0x1] }
 0x2cf   : > { %3824 = vrot.lane.b32.xlu1 %v3721_v48, %s4633_s28  ;;  %v3456_v48 = vshrl.u32 %v3092_v38, 16 }
 0x2d0   : > { %v3835_v28 = vpop.permute.xlu0 %3834  ;;  %v3833_v42 = vpop.permute.xlu2 %3832  ;;  %v3461_v57 = vrot.slane %v3459_v16, 5 }
 0x2d1   : > { %3922 = vst.msk [vmem:[#allocation3 + $0x24] sm:$0xf] %vm3912_vm8, %v3835_v28  ;;  %v3496_v49 = vpop.permute.xlu1 %3495  ;;  %v4493_v25 = vld [vmem:[#allocation3 + $0x60] sm:$0xff]  ;;  %v3458_v4 = vrot.slane %v3456_v48, 4 }
 0x2d2   : > { %3584 = vst.msk [vmem:[#allocation3 + $0x20] sm:$0xf] %vm3575_vm7, %v3496_v49  ;;  %4471 = vmatmul.msk.bf16.vlgmr.msra.gmra.mxu3 %vm4076_vm9, %v4493_v25  ;;  %v3190_v25 = vsel %vm4751_vm3, %v3185_v26, %v3189_v23  ;;  %v3730_v23 = vrot.slane %v3619_v8, 5 }
 0x2d3   : > { %3921 = vst.msk [vmem:[#allocation3 + $0x20] sm:$0xf] %vm3912_vm8, %v3833_v42  ;;  %v6552_v42 = vld [vmem:[#allocation2 + $0x40] sm:$0xf] }
 0x2d4   : > { %v3727_v5 = vrot.slane %v6552_v42, 5 }
 0x2d6   : > { %3523 = vrot.lane.b32.xlu0 %v3372_v3, %s4632_s27  ;;  %3503 = vrot.lane.b32.xlu2 %v3252_v17, %s4632_s27  ;;  %v3784_v3 = vsel %vm5444_vm13, %v4382_v61, %v3783_v32  ;;  %v3462_v17 = vor.u32 %v3461_v57, %v3458_v4  ;;  %v3729_v26 = vrot.slane %v3727_v5, 4  ;;  %v3070_v57 = vld [vmem:[#allocation2 + $0x74] sm:$0x1] }
 0x2d7   : > { %3842 = vrot.lane.b32.xlu1 %v3752_v46, %s4633_s28  ;;  %v2885_v46 = vld [vmem:[#allocation2 + $0xd0] sm:$0xf]  ;;  %v3283_v47 = vshll.u32 %v3070_v57, 16 }
 0x2d8   : > { %v2971_v22 = vpop.permute.xlu0 %2970  ;;  %v2957_v29 = vpop.permute.xlu2 %2956  ;;  %v3463_v36 = vrot.slane %v3462_v17, 4  ;;  %v3731_v37 = vsel %vm5444_vm13, %v3729_v26, %v3730_v23  ;;  %v3629_v17 = vld [vmem:[#allocation2 + $0x6c] sm:$0xe] }
 0x2d9   : > { %3041 = vst.msk [vmem:[#allocation3 + $0x68] sm:$0xf] %vm3014_vm4, %v2971_v22  ;;  %v3819_v0 = vpop.permute.xlu1 %3818  ;;  %v6559_v22 = vld [vmem:[#allocation2 + $0x70] sm:$0xf]  ;;  %v3285_v9 = vrot.slane %v3283_v47, 5 }
 0x2da   : > { %3914 = vst.msk [vmem:[#allocation3 + $0x4] sm:$0xf] %vm3912_vm8, %v3819_v0  ;;  %v4485_v15 = vld [vmem:[#allocation3 + $0x20] sm:$0xff]  ;;  %v3266_v0 = vrot.slane %v3264_v43, 4  ;;  %v3755_v44 = vrot.slane %v6559_v22, 5  ;;  %v3468_v24 = vsel %vm4751_vm3, %v3463_v36, %v6495_v10  ;;  %v3785_v10 = vrot.slane %v3783_v32, 4 }
 0x2db   : > { %3034 = vst.msk [vmem:[#allocation3 + $0x4c] sm:$0xf] %vm3014_vm4, %v2957_v29  ;;  %4463 = vmatmul.msk.bf16.vlgmr.msra.gmra.mxu1 %vm4076_vm9, %v4485_v15  ;;  %v3069_v29 = vld [vmem:[#allocation2 + $0x70] sm:$0xf] }
 0x2dc   : > { %v3273_v7 = vshll.u32 %v3069_v29, 16  ;;  %v3757_v56 = vrot.slane %v3755_v44, 4 }
 0x2de   : > { %3541 = vrot.lane.b32.xlu0 %v3478_v45, %s4632_s27  ;;  %3826 = vrot.lane.b32.xlu2 %v3724_v31, %s4633_s28  ;;  %v3728_v45 = vsel %vm5444_vm13, %v4374_v40, %v3727_v5  ;;  %v3168_v31 = vshrl.u32 %v3056_v21, 16  ;;  %v3275_v2 = vrot.slane %v3273_v7, 5 }
 0x2df   : > { %2978 = vrot.lane.b32.xlu1 %v2884_v52, %s4631_s23  ;;  %v3270_v52 = vor.u32 %v3269_v33, %v3266_v0 }
 0x2e0   : > { %v3518_v50 = vpop.permute.xlu0 %3517  ;;  %v3516_v20 = vpop.permute.xlu2 %3515 }
 0x2e1   : > { %3595 = vst.msk [vmem:[#allocation3 + $0x4c] sm:$0xf] %vm3575_vm7, %v3518_v50  ;;  %v2955_v41 = vpop.permute.xlu1 %2954  ;;  %v4481_v63 = vld [vmem:[#allocation3] sm:$0xff]  ;;  %v3758_v50 = vrot.slane %v3631_v51, 5  ;;  %v3271_v1 = vrot.slane %v3270_v52, 4 }
 0x2e2   : > { %3033 = vst.msk [vmem:[#allocation3 + $0x48] sm:$0xf] %vm3014_vm4, %v2955_v41  ;;  %4459 = vmatmul.msk.bf16.vlgmr.msra.gmra.mxu0 %vm4076_vm9, %v4481_v63  ;;  %v3786_v63 = vrot.slane %v3643_v62, 5 }
 0x2e3   : > { %3594 = vst.msk [vmem:[#allocation3 + $0x48] sm:$0xf] %vm3575_vm7, %v3516_v20  ;;  %v3170_v20 = vrot.slane %v3168_v31, 4  ;;  %v3759_v38 = vsel %vm5444_vm13, %v3757_v56, %v3758_v50 }
 0x2e4   : > { %v3787_v13 = vsel %vm5444_vm13, %v3785_v10, %v3786_v63 }
 0x2e6   : > { %3876 = vrot.lane.b32.xlu0 %v3812_v58, %s4633_s28  ;;  %2962 = vrot.lane.b32.xlu2 %v2876_v19, %s4631_s23  ;;  %v3173_v58 = vrot.slane %v3171_v30, 5  ;;  %v3277_v19 = vshrl.u32 %v3069_v29, 16 }
 0x2e7   : > { %3525 = vrot.lane.b32.xlu1 %v3382_v59, %s4632_s27  ;;  %v3276_v59 = vsel %vm4751_vm3, %v3271_v1, %v3275_v2 }
 0x2e8   : > { %v3853_v60 = vpop.permute.xlu0 %3852  ;;  %v3534_v49 = vpop.permute.xlu2 %3533  ;;  %v3174_v48 = vor.u32 %v3173_v58, %v3170_v20 }
 0x2e9   : > { %3931 = vst.msk [vmem:[#allocation3 + $0x48] sm:$0xf] %vm3912_vm8, %v3853_v60  ;;  %v2973_v28 = vpop.permute.xlu1 %2972 }
 0x2ea   : > { %3042 = vst.msk [vmem:[#allocation3 + $0x6c] sm:$0xf] %vm3014_vm4, %v2973_v28  ;;  %v3175_v32 = vrot.slane %v3174_v48, 4  ;;  %v3279_v28 = vrot.slane %v3277_v19, 4 }
 0x2eb   : > { %3603 = vst.msk [vmem:[#allocation3 + $0x6c] sm:$0xf] %vm3575_vm7, %v3534_v49 }
 0x2ec   : > { %v3180_v49 = vsel %vm4751_vm3, %v3175_v32, %v6528_v27 }
 0x2ee   : > { %3493 = vrot.lane.b32.xlu0 %v3190_v25, %s4632_s27  ;;  %2980 = vrot.lane.b32.xlu2 %v2885_v46, %s4631_s23  ;;  %v3280_v25 = vor.u32 %v3279_v28, %v3275_v2  ;;  %s4266_s23 = scalar_lea.hbm %s6807_s4, %s4499_s14 }
 0x2ef   : > { %3860 = vrot.lane.b32.xlu1 %v3784_v3, %s4633_s28  ;;  %s4269_s19 = sshll.u32 %s4266_s23, 4  ;;  %s4270_s19 = int_to_ptr.hbm [resolvable:$true] %s4269_s19 }
 0x2f0   : > { %v3871_v6 = vpop.permute.xlu0 %3870  ;;  %v3869_v15 = vpop.permute.xlu2 %3868  ;;  %v3281_v43 = vrot.slane %v3280_v25, 4  ;;  %s4575_s29 = sshra.s32 %s4270_s19, 4  ;;  %s4576_s29 = int_to_ptr.hbm [resolvable:$true] %s4575_s29 }
 0x2f1   : > { %3940 = vst.msk [vmem:[#allocation3 + $0x6c] sm:$0xf] %vm3912_vm8, %v3871_v6  ;;  %v3532_v14 = vpop.permute.xlu1 %3531  ;;  %v4378_v6 = vrot.slane %v3629_v17, 9  ;;  %s4577_s30 = scalar_lea.hbm %s4576_s29, 256  ;;  %p4582_p0 = scmp.lt.s32.totalorder %s4576_s29, %s6807_s4 }
 0x2f2   : > { %3602 = vst.msk [vmem:[#allocation3 + $0x68] sm:$0xf] %vm3575_vm7, %v3532_v14  ;;  %v3286_v27 = vsel %vm4751_vm3, %v3281_v43, %v3285_v9  ;;  %vm4221_vm3 = vcmask 130048   ;;  %p4578_p11 = scmp.ne.s32.totalorder %s4576_s29, %s4577_s30  ;;  %p4583_p1 = scmp.lt.s32.totalorder %s4581_s7, %s4577_s30 }
 0x2f3   : > { %3939 = vst.msk [vmem:[#allocation3 + $0x68] sm:$0xf] %vm3912_vm8, %v3869_v15  ;;  %v3756_v53 = vsel %vm5444_vm13, %v4378_v6, %v3755_v44 }
 0x2f4   : > { %p4579_p12 = pnand %p4578_p11, %p4700_p5  ;;  %p4584_p2 = por %p4583_p1, %p4582_p0 }
 0x2f6   : > { %3828 = vrot.lane.b32.xlu0 %v3728_v45, %s4633_s28  ;;  %3539 = vrot.lane.b32.xlu2 %v3468_v24, %s4632_s27  ;;  %p4580_p13 = pneg %p4579_p12 }
 0x2f7   : > { %3878 = vrot.lane.b32.xlu1 %v3815_v34, %s4633_s28 }
 0x2f8   : > { %v3500_v39 = vpop.permute.xlu0 %3499  ;;  %v3486_v55 = vpop.permute.xlu2 %3485  ;;  %p4585_p3 = pnand %p4584_p2, %p4580_p13 }
 0x2f9   : > { %3586 = vst.msk [vmem:[#allocation3 + $0x28] sm:$0xf] %vm3575_vm7, %v3500_v39  ;;  %v3855_v41 = vpop.permute.xlu1 %3854 }
 0x2fa   : > { %3932 = vst.msk [vmem:[#allocation3 + $0x4c] sm:$0xf] %vm3912_vm8, %v3855_v41  ;;  %v4494_v35 = vld [vmem:[#allocation3 + $0x68] sm:$0xff] }
 0x2fb   : > { %3579 = vst.msk [vmem:[#allocation3 + $0xc] sm:$0xf] %vm3575_vm7, %v3486_v55  ;;  %4472 = vmatmul.msk.bf16.gmra.mxu3 %vm4076_vm9, %v4494_v35  ;;  %v6648_v41 = vld [vmem:[%s6806_s3] ss:$0 sm:$0xff] }
 0x2fe   : > { %3846 = vrot.lane.b32.xlu0 %v3759_v38, %s4633_s28  ;;  %3862 = vrot.lane.b32.xlu2 %v3787_v13, %s4633_s28 }
 0x2ff   : > { %3507 = vrot.lane.b32.xlu1 %v3276_v59, %s4632_s27 }
 0x300   : > { %v3823_v16 = vpop.permute.xlu0 %3822  ;;  %v3821_v4 = vpop.permute.xlu2 %3820 }
 0x301   : > { %3916 = vst.msk [vmem:[#allocation3 + $0xc] sm:$0xf] %vm3912_vm8, %v3823_v16  ;;  %v3484_v60 = vpop.permute.xlu1 %3483  ;;  %v4490_v61 = vld [vmem:[#allocation3 + $0x48] sm:$0xff] }
 0x302   : > { %3578 = vst.msk [vmem:[#allocation3 + $0x8] sm:$0xf] %vm3575_vm7, %v3484_v60  ;;  %4468 = vmatmul.msk.bf16.gmra.mxu2 %vm4076_vm9, %v4490_v61 }
 0x303   : > { %3915 = vst.msk [vmem:[#allocation3 + $0x8] sm:$0xf] %vm3912_vm8, %v3821_v4 }
 0x306   : > { %3491 = vrot.lane.b32.xlu2 %v3180_v49, %s4632_s27 }
 0x307   : > { %3830 = vrot.lane.b32.xlu1 %v3731_v37, %s4633_s28 }
 0x308   : > { %v2959_v42 = vpop.permute.xlu0 %2958  ;;  %v3839_v46 = vpop.permute.xlu2 %3838 }
 0x309   : > { %3035 = vst.msk [vmem:[#allocation3 + $0x50] sm:$0xf] %vm3014_vm4, %v2959_v42  ;;  %v3502_v3 = vpop.permute.xlu1 %3501 }
 0x30a   : > { %3587 = vst.msk [vmem:[#allocation3 + $0x2c] sm:$0xf] %vm3575_vm7, %v3502_v3  ;;  %v4482_v18 = vld [vmem:[#allocation3 + $0x8] sm:$0xff] }
 0x30b   : > { %3924 = vst.msk [vmem:[#allocation3 + $0x2c] sm:$0xf] %vm3912_vm8, %v3839_v46  ;;  %4460 = vmatmul.msk.bf16.gmra.mxu0 %vm4076_vm9, %v4482_v18 }
 0x30e   : > { %3509 = vrot.lane.b32.xlu2 %v3286_v27, %s4632_s27  ;;  %s4267_s27 = sshll.u32 %s6652_s13, 4  ;;  %s4268_s27 = int_to_ptr.vmem [resolvable:$true] %s4267_s27 }
 0x310   : > { %v2977_v40 = vpop.permute.xlu0 %2976  ;;  %v2975_v54 = vpop.permute.xlu2 %2974 }
 0x311   : > { %3044 = vst.msk [vmem:[#allocation3 + $0x74] sm:$0xf] %vm3014_vm4, %v2977_v40  ;;  %v3837_v5 = vpop.permute.xlu1 %3836 }
 0x312   : > { %3923 = vst.msk [vmem:[#allocation3 + $0x28] sm:$0xf] %vm3912_vm8, %v3837_v5 }
 0x313   : > { %3043 = vst.msk [vmem:[#allocation3 + $0x70] sm:$0xf] %vm3014_vm4, %v2975_v54 }
 0x316   : > { %3844 = vrot.lane.b32.xlu2 %v3756_v53, %s4633_s28  ;;  %s4255_s28 = scalar_lea.sflag [#allocation5], %s188_s9 }
 0x318   : > { %v3536_v12 = vpop.permute.xlu0 %3535  ;;  %v3522_v14 = vpop.permute.xlu2 %3521 }
 0x319   : > { %3604 = vst.msk [vmem:[#allocation3 + $0x70] sm:$0xf] %vm3575_vm7, %v3536_v12  ;;  %v2961_v0 = vpop.permute.xlu1 %2960  ;;  %v4486_v33 = vld [vmem:[#allocation3 + $0x28] sm:$0xff] }
 0x31a   : > { %3036 = vst.msk [vmem:[#allocation3 + $0x54] sm:$0xf] %vm3014_vm4, %v2961_v0  ;;  %4464 = vmatmul.msk.bf16.gmra.mxu1 %vm4076_vm9, %v4486_v33 }
 0x31b   : > { %3597 = vst.msk [vmem:[#allocation3 + $0x54] sm:$0xf] %vm3575_vm7, %v3522_v14 }
 0x320   : > { %v3859_v36 = vpop.permute.xlu0 %3858  ;;  %v3857_v11 = vpop.permute.xlu2 %3856 }
 0x321   : > { %3934 = vst.msk [vmem:[#allocation3 + $0x54] sm:$0xf] %vm3912_vm8, %v3859_v36  ;;  %v3520_v22 = vpop.permute.xlu1 %3519 }
 0x322   : > { %3596 = vst.msk [vmem:[#allocation3 + $0x50] sm:$0xf] %vm3575_vm7, %v3520_v22 }
 0x323   : > { %3933 = vst.msk [vmem:[#allocation3 + $0x50] sm:$0xf] %vm3912_vm8, %v3857_v11 }
 0x328   : > { %v3488_v29 = vpop.permute.xlu0 %3487  ;;  %v3875_v45 = vpop.permute.xlu2 %3874 }
 0x329   : > { %3580 = vst.msk [vmem:[#allocation3 + $0x10] sm:$0xf] %vm3575_vm7, %v3488_v29  ;;  %v3538_v15 = vpop.permute.xlu1 %3537 }
 0x32a   : > { %3605 = vst.msk [vmem:[#allocation3 + $0x74] sm:$0xf] %vm3575_vm7, %v3538_v15  ;;  %v4491_v44 = vld [vmem:[#allocation3 + $0x50] sm:$0xff] }
 0x32b   : > { %3942 = vst.msk [vmem:[#allocation3 + $0x74] sm:$0xf] %vm3912_vm8, %v3875_v45  ;;  %4469 = vmatmul.msk.bf16.gmra.mxu2 %vm4076_vm9, %v4491_v44 }
 0x330   : > { %v3506_v21 = vpop.permute.xlu0 %3505  ;;  %v3504_v34 = vpop.permute.xlu2 %3503 }
 0x331   : > { %3589 = vst.msk [vmem:[#allocation3 + $0x34] sm:$0xf] %vm3575_vm7, %v3506_v21  ;;  %v3873_v51 = vpop.permute.xlu1 %3872 }
 0x332   : > { %3941 = vst.msk [vmem:[#allocation3 + $0x70] sm:$0xf] %vm3912_vm8, %v3873_v51 }
 0x333   : > { %3588 = vst.msk [vmem:[#allocation3 + $0x30] sm:$0xf] %vm3575_vm7, %v3504_v34 }
 0x338   : > { %v3841_v52 = vpop.permute.xlu0 %3840  ;;  %v3827_v31 = vpop.permute.xlu2 %3826 }
 0x339   : > { %3925 = vst.msk [vmem:[#allocation3 + $0x30] sm:$0xf] %vm3912_vm8, %v3841_v52  ;;  %v3490_v7 = vpop.permute.xlu1 %3489  ;;  %v4495_v24 = vld [vmem:[#allocation3 + $0x70] sm:$0xff] }
 0x33a   : > { %3581 = vst.msk [vmem:[#allocation3 + $0x14] sm:$0xf] %vm3575_vm7, %v3490_v7  ;;  %4473 = vmatmul.msk.bf16.gmra.mxu3 %vm4076_vm9, %v4495_v24 }
 0x33b   : > { %3918 = vst.msk [vmem:[#allocation3 + $0x14] sm:$0xf] %vm3912_vm8, %v3827_v31 }
 0x340   : > { %v2965_v30 = vpop.permute.xlu0 %2964  ;;  %v2963_v56 = vpop.permute.xlu2 %2962 }
 0x341   : > { %3038 = vst.msk [vmem:[#allocation3 + $0x5c] sm:$0xf] %vm3014_vm4, %v2965_v30  ;;  %v3825_v62 = vpop.permute.xlu1 %3824 }
 0x342   : > { %3917 = vst.msk [vmem:[#allocation3 + $0x10] sm:$0xf] %vm3912_vm8, %v3825_v62 }
 0x343   : > { %3037 = vst.msk [vmem:[#allocation3 + $0x58] sm:$0xf] %vm3014_vm4, %v2963_v56 }
 0x348   : > { %v3524_v50 = vpop.permute.xlu0 %3523  ;;  %v2981_v2 = vpop.permute.xlu2 %2980 }
 0x349   : > { %3598 = vst.msk [vmem:[#allocation3 + $0x58] sm:$0xf] %vm3575_vm7, %v3524_v50  ;;  %v3843_v39 = vpop.permute.xlu1 %3842  ;;  %v4483_v1 = vld [vmem:[#allocation3 + $0x10] sm:$0xff] }
 0x34a   : > { %3926 = vst.msk [vmem:[#allocation3 + $0x34] sm:$0xf] %vm3912_vm8, %v3843_v39  ;;  %4461 = vmatmul.msk.bf16.gmra.mxu0 %vm4076_vm9, %v4483_v1 }
 0x34b   : > { %3046 = vst.msk [vmem:[#allocation3 + $0x7c] sm:$0xf] %vm3014_vm4, %v2981_v2 }
 0x34d   : > { %v4181_v10 = vpop.f32.mrf.mxu2 }
 0x34e   : > { %v4182_v63 = vadd.f32 %v6648_v41, %v4181_v10 }
 0x350   : > { %v3542_v20 = vpop.permute.xlu0 %3541  ;;  %4238 = vst.msk [vmem:[%s6652_s13 + $0x80] sm:$0xff] %vm4221_vm3, %v4182_v63  ;;  %v3540_v35 = vpop.permute.xlu2 %3539 }
 0x351   : > { %3607 = vst.msk [vmem:[#allocation3 + $0x7c] sm:$0xf] %vm3575_vm7, %v3542_v20  ;;  %v2979_v58 = vpop.permute.xlu1 %2978  ;;  %v4487_v55 = vld [vmem:[#allocation3 + $0x30] sm:$0xff] }
 0x352   : > { %3045 = vst.msk [vmem:[#allocation3 + $0x78] sm:$0xf] %vm3014_vm4, %v2979_v58  ;;  %4465 = vmatmul.msk.bf16.gmra.mxu1 %vm4076_vm9, %v4487_v55 }
 0x353   : > { %3606 = vst.msk [vmem:[#allocation3 + $0x78] sm:$0xf] %vm3575_vm7, %v3540_v35 }
 0x355   : > { %v4183_v38 = vpop.f32.mrf.mxu2  ;;  %v4201_v59 = vpop.f32.mrf.mxu3 }
 0x356   : > { %v4184_v19 = vadd.f32 %v6648_v41, %v4183_v38  ;;  %v4202_v13 = vadd.f32 %v6648_v41, %v4201_v59 }
 0x358   : > { %v3877_v8 = vpop.permute.xlu0 %3876  ;;  %4239 = vst.msk [vmem:[%s6652_s13 + $0x88] sm:$0xff] %vm4221_vm3, %v4184_v19  ;;  %v4161_v16 = vpop.f32.mrf.mxu1 }
 0x359   : > { %3943 = vst.msk [vmem:[#allocation3 + $0x78] sm:$0xf] %vm3912_vm8, %v3877_v8  ;;  %v3526_v48 = vpop.permute.xlu1 %3525  ;;  %v3863_v26 = vpop.permute.xlu2 %3862  ;;  %v4162_v23 = vadd.f32 %v6648_v41, %v4161_v16 }
 0x35a   : > { %4246 = vst.msk [vmem:[%s6652_s13 + $0xc0] sm:$0xff] %vm4221_vm3, %v4202_v13 }
 0x35b   : > { %3599 = vst.msk [vmem:[#allocation3 + $0x5c] sm:$0xf] %vm3575_vm7, %v3526_v48 }
 0x35c   : > { %3936 = vst.msk [vmem:[#allocation3 + $0x5c] sm:$0xf] %vm3912_vm8, %v3863_v26 }
 0x35d   : > { %4230 = vst.msk [vmem:[%s6652_s13 + $0x40] sm:$0xff] %vm4221_vm3, %v4162_v23  ;;  %v4203_v60 = vpop.f32.mrf.mxu3 }
 0x35e   : > { %v4204_v61 = vadd.f32 %v6648_v41, %v4203_v60 }
 0x35f   : > { %v4141_v28 = vpop.f32.mrf.mxu0 }
 0x360   : > { %v3494_v32 = vpop.permute.xlu0 %3493  ;;  %4247 = vst.msk [vmem:[%s6652_s13 + $0xc8] sm:$0xff] %vm4221_vm3, %v4204_v61  ;;  %v4142_v4 = vadd.f32 %v6648_v41, %v4141_v28  ;;  %v4163_v37 = vpop.f32.mrf.mxu1 }
 0x361   : > { %3583 = vst.msk [vmem:[#allocation3 + $0x1c] sm:$0xf] %vm3575_vm7, %v3494_v32  ;;  %v3861_v57 = vpop.permute.xlu1 %3860  ;;  %v3492_v49 = vpop.permute.xlu2 %3491  ;;  %v4164_v25 = vadd.f32 %v6648_v41, %v4163_v37 }
 0x362   : > { %3935 = vst.msk [vmem:[#allocation3 + $0x58] sm:$0xf] %vm3912_vm8, %v3861_v57 }
 0x363   : > { %4222 = vst.msk [vmem:[%s6652_s13] sm:$0xff] %vm4221_vm3, %v4142_v4 }
 0x364   : > { %3582 = vst.msk [vmem:[#allocation3 + $0x18] sm:$0xf] %vm3575_vm7, %v3492_v49 }
 0x365   : > { %4231 = vst.msk [vmem:[%s6652_s13 + $0x48] sm:$0xff] %vm4221_vm3, %v4164_v25 }
 0x367   : > { %v4143_v42 = vpop.f32.mrf.mxu0 }
 0x368   : > { %v3829_v47 = vpop.permute.xlu0 %3828  ;;  %v4144_v3 = vadd.f32 %v6648_v41, %v4143_v42 }
 0x369   : > { %3919 = vst.msk [vmem:[#allocation3 + $0x18] sm:$0xf] %vm3912_vm8, %v3829_v47  ;;  %v3879_v43 = vpop.permute.xlu1 %3878  ;;  %v4492_v9 = vld [vmem:[#allocation3 + $0x58] sm:$0xff]  ;;  %v3510_v46 = vpop.permute.xlu2 %3509 }
 0x36a   : > { %3944 = vst.msk [vmem:[#allocation3 + $0x7c] sm:$0xf] %vm3912_vm8, %v3879_v43  ;;  %4470 = vmatmul.msk.bf16.gmra.mxu2 %vm4076_vm9, %v4492_v9 }
 0x36b   : > { %4223 = vst.msk [vmem:[%s6652_s13 + $0x8] sm:$0xff] %vm4221_vm3, %v4144_v3 }
 0x36c   : > { %3591 = vst.msk [vmem:[#allocation3 + $0x3c] sm:$0xf] %vm3575_vm7, %v3510_v46 }
 0x370   : > { %v3847_v18 = vpop.permute.xlu0 %3846 }
 0x371   : > { %3928 = vst.msk [vmem:[#allocation3 + $0x3c] sm:$0xf] %vm3912_vm8, %v3847_v18  ;;  %v3508_v27 = vpop.permute.xlu1 %3507  ;;  %v4496_v17 = vld [vmem:[#allocation3 + $0x78] sm:$0xff]  ;;  %v3845_v40 = vpop.permute.xlu2 %3844 }
 0x372   : > { %3590 = vst.msk [vmem:[#allocation3 + $0x38] sm:$0xf] %vm3575_vm7, %v3508_v27  ;;  %4474 = vmatmul.msk.bf16.gmra.mxu3 %vm4076_vm9, %v4496_v17 }
 0x373   : > { %3927 = vst.msk [vmem:[#allocation3 + $0x38] sm:$0xf] %vm3912_vm8, %v3845_v40 }
 0x379   : > { %v3831_v5 = vpop.permute.xlu1 %3830 }
 0x37a   : > { %3920 = vst.msk [vmem:[#allocation3 + $0x1c] sm:$0xf] %vm3912_vm8, %v3831_v5  ;;  %v4488_v6 = vld [vmem:[#allocation3 + $0x38] sm:$0xff] }
 0x37b   : > { %4466 = vmatmul.msk.bf16.gmra.mxu1 %vm4076_vm9, %v4488_v6 }
 0x37e   : > { %v4206_v54 = vpop.f32.mrf.mxu3 }
 0x37f   : > { %v4207_v53 = vadd.f32 %v6648_v41, %v4206_v54 }
 0x381   : > { %v4484_v12 = vld [vmem:[#allocation3 + $0x18] sm:$0xff]  ;;  %4248 = vst.msk [vmem:[%s6652_s13 + $0xd0] sm:$0xff] %vm4221_vm3, %v4207_v53 }
 0x382   : > { %4462 = vmatmul.msk.bf16.gmra.mxu0 %vm4076_vm9, %v4484_v12 }
 0x385   : > { %v4186_v0 = vpop.f32.mrf.mxu2 }
 0x386   : > { %v4187_v33 = vadd.f32 %v6648_v41, %v4186_v0  ;;  %v4208_v14 = vpop.f32.mrf.mxu3 }
 0x387   : > { %v4209_v36 = vadd.f32 %v6648_v41, %v4208_v14 }
 0x388   : > { %4240 = vst.msk [vmem:[%s6652_s13 + $0x90] sm:$0xff] %vm4221_vm3, %v4187_v33  ;;  %v4146_v22 = vpop.f32.mrf.mxu0 }
 0x389   : > { %4249 = vst.msk [vmem:[%s6652_s13 + $0xd8] sm:$0xff] %vm4221_vm3, %v4209_v36  ;;  %v4147_v11 = vadd.f32 %v6648_v41, %v4146_v22 }
 0x38b   : > { %4224 = vst.msk [vmem:[%s6652_s13 + $0x10] sm:$0xff] %vm4221_vm3, %v4147_v11 }
 0x38d   : > { %v4188_v29 = vpop.f32.mrf.mxu2 }
 0x38e   : > { %v4189_v15 = vadd.f32 %v6648_v41, %v4188_v29 }
 0x390   : > { %4241 = vst.msk [vmem:[%s6652_s13 + $0x98] sm:$0xff] %vm4221_vm3, %v4189_v15  ;;  %v4148_v45 = vpop.f32.mrf.mxu0 }
 0x391   : > { %v4149_v44 = vadd.f32 %v6648_v41, %v4148_v45 }
 0x393   : > { %4225 = vst.msk [vmem:[%s6652_s13 + $0x18] sm:$0xff] %vm4221_vm3, %v4149_v44 }
 0x397   : > { %v4166_v21 = vpop.f32.mrf.mxu1 }
 0x398   : > { %v4167_v51 = vadd.f32 %v6648_v41, %v4166_v21 }
 0x39a   : > { %4232 = vst.msk [vmem:[%s6652_s13 + $0x50] sm:$0xff] %vm4221_vm3, %v4167_v51 }
 0x39f   : > { %v4168_v34 = vpop.f32.mrf.mxu1 }
 0x3a0   : > { %v4169_v52 = vadd.f32 %v6648_v41, %v4168_v34 }
 0x3a2   : > { %4233 = vst.msk [vmem:[%s6652_s13 + $0x58] sm:$0xff] %vm4221_vm3, %v4169_v52 }
 0x3ae   : > { %v4191_v7 = vpop.f32.mrf.mxu2 }
 0x3af   : > { %v4192_v24 = vadd.f32 %v6648_v41, %v4191_v7 }
 0x3b1   : > { %4242 = vst.msk [vmem:[%s6652_s13 + $0xa0] sm:$0xff] %vm4221_vm3, %v4192_v24 }
 0x3b6   : > { %v4193_v31 = vpop.f32.mrf.mxu2 }
 0x3b7   : > { %v4194_v30 = vadd.f32 %v6648_v41, %v4193_v31 }
 0x3b9   : > { %4243 = vst.msk [vmem:[%s6652_s13 + $0xa8] sm:$0xff] %vm4221_vm3, %v4194_v30 }
 0x3bd   : > { %v4211_v62 = vpop.f32.mrf.mxu3 }
 0x3be   : > { %v4212_v56 = vadd.f32 %v6648_v41, %v4211_v62 }
 0x3c0   : > { %4250 = vst.msk [vmem:[%s6652_s13 + $0xe0] sm:$0xff] %vm4221_vm3, %v4212_v56 }
 0x3c5   : > { %v4213_v50 = vpop.f32.mrf.mxu3 }
 0x3c6   : > { %v4214_v39 = vadd.f32 %v6648_v41, %v4213_v50 }
 0x3c7   : > { %v4151_v1 = vpop.f32.mrf.mxu0 }
 0x3c8   : > { %4251 = vst.msk [vmem:[%s6652_s13 + $0xe8] sm:$0xff] %vm4221_vm3, %v4214_v39  ;;  %v4152_v2 = vadd.f32 %v6648_v41, %v4151_v1 }
 0x3ca   : > { %4226 = vst.msk [vmem:[%s6652_s13 + $0x20] sm:$0xff] %vm4221_vm3, %v4152_v2 }
 0x3cf   : > { %v4153_v10 = vpop.f32.mrf.mxu0  ;;  %v4171_v63 = vpop.f32.mrf.mxu1 }
 0x3d0   : > { %v4154_v20 = vadd.f32 %v6648_v41, %v4153_v10  ;;  %v4172_v58 = vadd.f32 %v6648_v41, %v4171_v63 }
 0x3d2   : > { %4227 = vst.msk [vmem:[%s6652_s13 + $0x28] sm:$0xff] %vm4221_vm3, %v4154_v20 }
 0x3d3   : > { %4234 = vst.msk [vmem:[%s6652_s13 + $0x60] sm:$0xff] %vm4221_vm3, %v4172_v58 }
 0x3d7   : > { %v4173_v55 = vpop.f32.mrf.mxu1 }
 0x3d8   : > { %v4174_v35 = vadd.f32 %v6648_v41, %v4173_v55 }
 0x3da   : > { %4235 = vst.msk [vmem:[%s6652_s13 + $0x68] sm:$0xff] %vm4221_vm3, %v4174_v35 }
 0x3ed   : > { %v4196_v38 = vpop.f32.mrf.mxu2 }
 0x3ee   : > { %v4197_v59 = vadd.f32 %v6648_v41, %v4196_v38 }
 0x3f0   : > { %4244 = vst.msk [vmem:[%s6652_s13 + $0xb0] sm:$0xff] %vm4221_vm3, %v4197_v59 }
 0x3f5   : > { %v4198_v19 = vpop.f32.mrf.mxu2  ;;  %v4216_v13 = vpop.f32.mrf.mxu3 }
 0x3f6   : > { %v4199_v8 = vadd.f32 %v6648_v41, %v4198_v19  ;;  %v4217_v48 = vadd.f32 %v6648_v41, %v4216_v13 }
 0x3f8   : > { %4245 = vst.msk [vmem:[%s6652_s13 + $0xb8] sm:$0xff] %vm4221_vm3, %v4199_v8  ;;  %v4176_v16 = vpop.f32.mrf.mxu1 }
 0x3f9   : > { %4252 = vst.msk [vmem:[%s6652_s13 + $0xf0] sm:$0xff] %vm4221_vm3, %v4217_v48  ;;  %v4177_v26 = vadd.f32 %v6648_v41, %v4176_v16 }
 0x3fb   : > { %4236 = vst.msk [vmem:[%s6652_s13 + $0x70] sm:$0xff] %vm4221_vm3, %v4177_v26 }
 0x3fd   : > { %v4218_v23 = vpop.f32.mrf.mxu3 }
 0x3fe   : > { %v4219_v60 = vadd.f32 %v6648_v41, %v4218_v23 }
 0x3ff   : > { %v4156_v61 = vpop.f32.mrf.mxu0 }
 0x400   : > { %4253 = vst.msk [vmem:[%s6652_s13 + $0xf8] sm:$0xff] %vm4221_vm3, %v4219_v60  ;;  %v4157_v32 = vadd.f32 %v6648_v41, %v4156_v61  ;;  %v4178_v28 = vpop.f32.mrf.mxu1 }
 0x401   : > { %v4179_v4 = vadd.f32 %v6648_v41, %v4178_v28 }
 0x402   : > { %4228 = vst.msk [vmem:[%s6652_s13 + $0x30] sm:$0xff] %vm4221_vm3, %v4157_v32 }
 0x403   : > { %4237 = vst.msk [vmem:[%s6652_s13 + $0x78] sm:$0xff] %vm4221_vm3, %v4179_v4 }
 0x407   : > { %v4158_v57 = vpop.f32.mrf.mxu0 }
 0x408   : > { %v4159_v37 = vadd.f32 %v6648_v41, %v4158_v57 }
 0x40a   : > { %4229 = vst.msk [vmem:[%s6652_s13 + $0x38] sm:$0xff] %vm4221_vm3, %v4159_v37 }
 0x40b   : > { %4588 = shalt.err (!%p4585_p3)
}
 0x40c   : > { %s4635_s9 = smov 128   ;;  %s4636_s11 = smov 8  }
 0x40d   : > { %4506 = dma.vmem_to_hbm [thread:$0]  (%p4700_p5), %s4268_s27, 4096, %s4270_s19, %s4255_s28, %s4635_s9, %s4635_s9, %s4636_s11  }
 0x40e PF: > { %p4512_p4 = scmp.ge.s32.totalorder %s4623_s18, 2  ;;  %s4284_s12 = sand.u32 1, %s4611_s15  }
 0x40f   : > { %s4285_s13 = scalar_lea.sflag [#allocation5], %s4284_s12 }
 0x410   : > { %p4509_p7 = pnand %p4512_p4, %p4704_p6 }
 0x412   : > { %p4510_p8 = pneg %p4509_p7 }
 0x414   : > { %4606 = dma.done.wait (%p4510_p8), %s4285_s13, 4096  }
 0x415   : > { %4608 = vsyncadd (%p4510_p8), %s4285_s13, 4294963200  ;;  %p14_p9 = scmp.ge.s32.totalorder %s4687_s21, 4   ;;  %s6820_s15 = smov %s4615_s16 }
 0x416   : > { %s6821_s16 = smov %s4619_s17  ;;  %s6822_s17 = smov %s4698_s24 }
 0x417   : > { %s6823_s18 = smov %s4687_s21  ;;  %16 = sbr.rel (!%p14_p9) target bundleno = 3 (0x3), region = 73 }
 0x41c   :  { %4291 = vsyncpa [#allocation5], 1 }
 0x41d   :  { %4293 = vsyncpa [#allocation5 + $0x1], 1 }

</bundles_post_ra>
